<compile_context>
chip_gen: v5e
topology: v5e:2x2
jax: 0.10.0
libtpu: 0.0.40
codegen_flags: <defaults>
</compile_context>

<pallas_src>
import numpy as np
import jax
import jax.numpy as jnp
from jax import lax
from jax.experimental import pallas as pl
from jax.experimental.pallas import tpu as pltpu

L_IN = 20                     # sequence length implied by view(-1, 210*10)
PAD_MAX = 3                   # max conv padding (kernel 7, padding 3)
L_PAD = L_IN + 2 * PAD_MAX    # 26
C_IN = 4
L_POOL = L_IN // 2            # 10
Y_DIM = 40                    # 140 - 100 (fc1 output width)
FEAT = 210 * L_POOL           # 2100

K_PAD = 128                   # conv contraction dim 104 -> 128
TK = 256                      # FEAT chunk width for the fused conv+fc1 loop
FEAT_PAD = ((FEAT + TK - 1) // TK) * TK   # 2304
NK = FEAT_PAD // TK           # 9 chunks
H1 = 128                      # fc1 output 100 -> 128 (lane-dense)
HY = 128                      # y lanes 40 -> 128
H2 = 128                      # fc2 hidden dims 100/80/60 -> 128


def deepseq_kernel(x_ref, y_ref,
                   me_ref, mo_ref, bb_ref,
                   w1_ref, b1_ref,
                   w2ah_ref, w2ay_ref, b2a_ref,
                   w2b_ref, b2b_ref,
                   w2c_ref, b2c_ref,
                   w2d_ref, b2d_ref,
                   o_ref, acc_ref):
    bf16 = jnp.bfloat16
    x = x_ref[...]                         # (TB, 128) bf16: padded, flattened conv input
    y = y_ref[...]                         # (TB, 128) bf16: y zero-padded to 128 lanes

    # ---- fused conv(1/2/3) + MaxPool1d(2) + ReLU + fc1, K-blocked over FEAT ----
    # Per chunk the intermediates are only (TB, TK); the fc1 partial sums go
    # straight into the persistent f32 accumulator, so the full (TB, 2100)
    # activation is never materialized (kills the VMEM store/drain bottleneck).
    for k in range(NK):                    # NK = 9, statically unrolled
        c0, c1 = k * TK, (k + 1) * TK
        ze = jnp.dot(x, me_ref[:, c0:c1], preferred_element_type=jnp.float32)  # (TB, TK)
        zo = jnp.dot(x, mo_ref[:, c0:c1], preferred_element_type=jnp.float32)
        # MaxPool1d(2) == max(even, odd); per-channel bias after max
        # (mathematically equivalent); then ReLU.
        z = jnp.maximum(jnp.maximum(ze, zo) + bb_ref[:, c0:c1], 0.0)            # (TB, TK) f32
        part = jnp.dot(z.astype(bf16), w1_ref[c0:c1, :],
                       preferred_element_type=jnp.float32)                      # (TB, 128)
        if k == 0:
            acc_ref[...] = part
        else:
            acc_ref[...] += part

    h = jnp.maximum(acc_ref[...] + b1_ref[...], 0.0)                            # (TB, 128)

    # ---- fc2 chain; Linear(140,100) with the [h | y] concat split into two GEMMs ----
    g = jnp.maximum(
        jnp.dot(h.astype(bf16), w2ah_ref[...], preferred_element_type=jnp.float32)
        + jnp.dot(y, w2ay_ref[...], preferred_element_type=jnp.float32)
        + b2a_ref[...], 0.0)                                                    # (TB, 128)
    g = jnp.maximum(jnp.dot(g.astype(bf16), w2b_ref[...],
                            preferred_element_type=jnp.float32) + b2b_ref[...], 0.0)
    g = jnp.maximum(jnp.dot(g.astype(bf16), w2c_ref[...],
                            preferred_element_type=jnp.float32) + b2c_ref[...], 0.0)
    # Final Linear(60, 1): VPU multiply + cross-lane reduce instead of an N=1
    # MXU matmul (padded lanes of g and w2d are zero, so they contribute nothing).
    logit = jnp.sum(g * w2d_ref[...], axis=-1, keepdims=True) + b2d_ref[...]
    o_ref[...] = jax.nn.sigmoid(logit)                                          # (TB, 1)


def build_conv_mats(w, b, pad):
    """Scatter Conv1d weights (O, C, K) into conv-as-matmul matrices.

    Column o*10+p of Me/Mo produces conv output channel o at sequence position
    2p / 2p+1 (the two elements MaxPool1d(2) reduces over)."""
    w_np = np.asarray(w, np.float32)
    O, C, K = w_np.shape
    Me = np.zeros((C * L_PAD, O * L_POOL), np.float32)
    Mo = np.zeros((C * L_PAD, O * L_POOL), np.float32)
    start = PAD_MAX - pad
    for o in range(O):
        for c in range(C):
            for k in range(K):
                for p in range(L_POOL):
                    Me[c * L_PAD + start + 2 * p + k,     o * L_POOL + p] += w_np[o, c, k]
                    Mo[c * L_PAD + start + 2 * p + 1 + k, o * L_POOL + p] += w_np[o, c, k]
    bb = np.repeat(np.asarray(b, np.float32), L_POOL)
    return Me, Mo, bb


def init_params(key):
    def uniform(k, shape, fan_in):
        s = 1.0 / np.sqrt(fan_in)
        return jax.random.uniform(k, shape, jnp.float32, -s, s)
    keys = jax.random.split(key, 16)
    p = {}
    p['conv1_w'] = uniform(keys[0], (100, 4, 3), 4 * 3); p['conv1_b'] = uniform(keys[1], (100,), 4 * 3)
    p['conv2_w'] = uniform(keys[2], (70, 4, 5), 4 * 5);  p['conv2_b'] = uniform(keys[3], (70,), 4 * 5)
    p['conv3_w'] = uniform(keys[4], (40, 4, 7), 4 * 7);  p['conv3_b'] = uniform(keys[5], (40,), 4 * 7)
    p['fc1_w'] = uniform(keys[6], (100, 2100), 2100);    p['fc1_b'] = uniform(keys[7], (100,), 2100)
    p['fc2a_w'] = uniform(keys[8], (100, 140), 140);     p['fc2a_b'] = uniform(keys[9], (100,), 140)
    p['fc2b_w'] = uniform(keys[10], (80, 100), 100);     p['fc2b_b'] = uniform(keys[11], (80,), 100)
    p['fc2c_w'] = uniform(keys[12], (60, 80), 80);       p['fc2c_b'] = uniform(keys[13], (60,), 80)
    p['fc2d_w'] = uniform(keys[14], (1, 60), 60);        p['fc2d_b'] = uniform(keys[15], (1,), 60)
    return p


def _round_up(a, m):
    return (a + m - 1) // m * m


def deepseq_forward(x, y, p, tb=1024):
    B = x.shape[0]
    bf16 = jnp.bfloat16

    # ---- one-time parameter reshuffling (glue, not hot-path compute) ----
    m1e, m1o, bb1 = build_conv_mats(p['conv1_w'], p['conv1_b'], 1)
    m2e, m2o, bb2 = build_conv_mats(p['conv2_w'], p['conv2_b'], 2)
    m3e, m3o, bb3 = build_conv_mats(p['conv3_w'], p['conv3_b'], 3)
    # Fused conv matrices: columns already follow PyTorch's cat + view order.
    # Padded: contraction 104 -> 128 (zero rows), FEAT 2100 -> 2304 (zero cols).
    me_np = np.zeros((K_PAD, FEAT_PAD), np.float32)
    mo_np = np.zeros((K_PAD, FEAT_PAD), np.float32)
    bb_np = np.zeros((1, FEAT_PAD), np.float32)
    me_np[:C_IN * L_PAD, :FEAT] = np.concatenate([m1e, m2e, m3e], axis=1)
    mo_np[:C_IN * L_PAD, :FEAT] = np.concatenate([m1o, m2o, m3o], axis=1)
    bb_np[0, :FEAT] = np.concatenate([bb1, bb2, bb3])
    me_all = jnp.asarray(me_np, bf16)                 # (128, 2304)
    mo_all = jnp.asarray(mo_np, bf16)                 # (128, 2304)
    bb_all = jnp.asarray(bb_np, jnp.float32)          # (1, 2304)

    def pad2(a, shape):
        out = np.zeros(shape, np.float32)
        a = np.asarray(a, np.float32)
        out[:a.shape[0], :a.shape[1]] = a
        return out

    # fc1: (2100, 100) -> (2304, 128)  (zero rows for FEAT pad, zero out-cols)
    w1 = jnp.asarray(pad2(np.asarray(p['fc1_w'], np.float32).T, (FEAT_PAD, H1)), bf16)
    b1 = jnp.asarray(pad2(np.asarray(p['fc1_b'], np.float32)[None, :], (1, H1)))

    w2a = np.asarray(p['fc2a_w'], np.float32)                      # (100, 140)
    w2ah = jnp.asarray(pad2(w2a[:, :100].T, (H1, H2)), bf16)       # h block (128, 128)
    w2ay = jnp.asarray(pad2(w2a[:, 100:].T, (HY, H2)), bf16)       # y block (128, 128)
    b2a = jnp.asarray(pad2(np.asarray(p['fc2a_b'], np.float32)[None, :], (1, H2)))
    w2b = jnp.asarray(pad2(np.asarray(p['fc2b_w'], np.float32).T, (H2, H2)), bf16)
    b2b = jnp.asarray(pad2(np.asarray(p['fc2b_b'], np.float32)[None, :], (1, H2)))
    w2c = jnp.asarray(pad2(np.asarray(p['fc2c_w'], np.float32).T, (H2, H2)), bf16)
    b2c = jnp.asarray(pad2(np.asarray(p['fc2c_b'], np.float32)[None, :], (1, H2)))
    w2d = jnp.asarray(pad2(np.asarray(p['fc2d_w'], np.float32), (1, H2)))   # f32 row (1, 128)
    b2d = jnp.asarray(np.asarray(p['fc2d_b'], np.float32).reshape(1, 1))    # (1, 1)

    # ---- batch tiling: TB-row tiles, padded batch, weights pinned in VMEM ----
    tb = min(tb, _round_up(B, 8))
    if B >= 512:
        # Ensure >= 2 batch tiles so both v7x TensorCores get work through the
        # ("parallel",) batch axis (megacore split).
        tb = min(tb, _round_up(-(-B // 2), 8))
    tb = _round_up(max(tb, 8), 8)          # aligned row count -> unmasked stores
    b_pad = _round_up(B, tb)

    x_pad = jnp.pad(x, ((0, b_pad - B), (0, 0), (PAD_MAX, PAD_MAX)))
    x_flat = x_pad.reshape(b_pad, C_IN * L_PAD)
    x_flat = jnp.pad(x_flat, ((0, 0), (0, K_PAD - C_IN * L_PAD))).astype(bf16)  # (B_pad, 128)
    y_padded = jnp.pad(y, ((0, b_pad - B), (0, HY - Y_DIM))).astype(bf16)       # (B_pad, 128)

    weights = (me_all, mo_all, bb_all, w1, b1,
               w2ah, w2ay, b2a, w2b, b2b, w2c, b2c, w2d, b2d)

    def pinned(a):  # full-array block, constant index map -> stays VMEM resident
        nd = a.ndim
        return pl.BlockSpec(a.shape, lambda i, _nd=nd: (0,) * _nd)

    grid = (b_pad // tb,)
    out = pl.pallas_call(
        deepseq_kernel,
        out_shape=jax.ShapeDtypeStruct((b_pad, 1), jnp.float32),
        grid=grid,
        in_specs=[pl.BlockSpec((tb, K_PAD), lambda i: (i, 0)),
                  pl.BlockSpec((tb, HY), lambda i: (i, 0))]
                 + [pinned(a) for a in weights],
        out_specs=pl.BlockSpec((tb, 1), lambda i: (i, 0)),
        scratch_shapes=[pltpu.VMEM((tb, H1), jnp.float32)],   # fc1 accumulator
        compiler_params=pltpu.CompilerParams(
            dimension_semantics=("parallel",),
            vmem_limit_bytes=40 * 1024 * 1024),
    )(x_flat, y_padded, *weights)
    return out[:B]


def reference_forward(x, y, p):
    """Plain-JAX f32 reference mirroring the PyTorch forward (eval mode)."""
    def conv1d(xx, w, b, pad):
        out = lax.conv_general_dilated(xx, w, (1,), [(pad, pad)],
                                       dimension_numbers=('NCH', 'OIH', 'NCH'))
        return out + b[None, :, None]

    def branch(w, b, pad):
        z = conv1d(x, w, b, pad)                                       # (B, O, 20)
        z = jnp.max(z.reshape(z.shape[0], z.shape[1], L_POOL, 2), -1)  # MaxPool1d(2)
        return jnp.maximum(z, 0.0)                                     # ReLU

    x1 = branch(p['conv1_w'], p['conv1_b'], 1)
    x2 = branch(p['conv2_w'], p['conv2_b'], 2)
    x3 = branch(p['conv3_w'], p['conv3_b'], 3)
    xc = jnp.concatenate([x1, x2, x3], axis=1).reshape(x.shape[0], FEAT)
    h = jnp.maximum(xc @ p['fc1_w'].T + p['fc1_b'], 0.0)
    g = jnp.concatenate([h, y], axis=1)
    g = jnp.maximum(g @ p['fc2a_w'].T + p['fc2a_b'], 0.0)
    g = jnp.maximum(g @ p['fc2b_w'].T + p['fc2b_b'], 0.0)
    g = jnp.maximum(g @ p['fc2c_w'].T + p['fc2c_b'], 0.0)
    return jax.nn.sigmoid(g @ p['fc2d_w'].T + p['fc2d_b'])


if __name__ == "__main__":
    key = jax.random.PRNGKey(0)
    kx, ky, kp = jax.random.split(key, 3)
    B = 2
    x = jax.random.normal(kx, (B, C_IN, L_IN), jnp.float32)   # NCW like PyTorch
    y = jax.random.normal(ky, (B, Y_DIM), jnp.float32)
    params = init_params(kp)

    out = deepseq_forward(x, y, params)
    out = jax.block_until_ready(out)

    ref = reference_forward(x, y, params)
    # bf16 MXU inputs with f32 accumulation: loose-ish tolerance vs f32 reference.
    np.testing.assert_allclose(np.asarray(out), np.asarray(ref), rtol=2e-2, atol=2e-2)
    print("KERNEL_OK")
</pallas_src>

<mosaic_0001>
module attributes {stable_mosaic.version = 11 : i64} {
  func.func @deepseq_kernel(%arg0: i32, %arg1: memref<8x128xbf16, #tpu.memory_space<vmem>>, %arg2: memref<8x128xbf16, #tpu.memory_space<vmem>>, %arg3: memref<128x2304xbf16, #tpu.memory_space<vmem>>, %arg4: memref<128x2304xbf16, #tpu.memory_space<vmem>>, %arg5: memref<1x2304xf32, #tpu.memory_space<vmem>>, %arg6: memref<2304x128xbf16, #tpu.memory_space<vmem>>, %arg7: memref<1x128xf32, #tpu.memory_space<vmem>>, %arg8: memref<128x128xbf16, #tpu.memory_space<vmem>>, %arg9: memref<128x128xbf16, #tpu.memory_space<vmem>>, %arg10: memref<1x128xf32, #tpu.memory_space<vmem>>, %arg11: memref<128x128xbf16, #tpu.memory_space<vmem>>, %arg12: memref<1x128xf32, #tpu.memory_space<vmem>>, %arg13: memref<128x128xbf16, #tpu.memory_space<vmem>>, %arg14: memref<1x128xf32, #tpu.memory_space<vmem>>, %arg15: memref<1x128xf32, #tpu.memory_space<vmem>>, %arg16: memref<1x1xf32, #tpu.memory_space<vmem>>, %arg17: memref<8x1xf32, #tpu.memory_space<vmem>>, %arg18: memref<8x128xf32, #tpu.memory_space<vmem>>) attributes {dimension_semantics = [#tpu.dimension_semantics<parallel>], iteration_bounds = array<i64: 1>, scalar_prefetch = 0 : i64, scratch_operands = 1 : i64, tpu.core_type = #tpu.core_type<tc>, window_params = [{transform_indices = @transform_0, window_bounds = array<i64: 8, 128>}, {transform_indices = @transform_1, window_bounds = array<i64: 8, 128>}, {pipeline_mode = #tpu.pipeline_mode<synchronous>, transform_indices = @transform_2, window_bounds = array<i64: 128, 2304>}, {pipeline_mode = #tpu.pipeline_mode<synchronous>, transform_indices = @transform_3, window_bounds = array<i64: 128, 2304>}, {pipeline_mode = #tpu.pipeline_mode<synchronous>, transform_indices = @transform_4, window_bounds = array<i64: 1, 2304>}, {pipeline_mode = #tpu.pipeline_mode<synchronous>, transform_indices = @transform_5, window_bounds = array<i64: 2304, 128>}, {pipeline_mode = #tpu.pipeline_mode<synchronous>, transform_indices = @transform_6, window_bounds = array<i64: 1, 128>}, {pipeline_mode = #tpu.pipeline_mode<synchronous>, transform_indices = @transform_7, window_bounds = array<i64: 128, 128>}, {pipeline_mode = #tpu.pipeline_mode<synchronous>, transform_indices = @transform_8, window_bounds = array<i64: 128, 128>}, {pipeline_mode = #tpu.pipeline_mode<synchronous>, transform_indices = @transform_9, window_bounds = array<i64: 1, 128>}, {pipeline_mode = #tpu.pipeline_mode<synchronous>, transform_indices = @transform_10, window_bounds = array<i64: 128, 128>}, {pipeline_mode = #tpu.pipeline_mode<synchronous>, transform_indices = @transform_11, window_bounds = array<i64: 1, 128>}, {pipeline_mode = #tpu.pipeline_mode<synchronous>, transform_indices = @transform_12, window_bounds = array<i64: 128, 128>}, {pipeline_mode = #tpu.pipeline_mode<synchronous>, transform_indices = @transform_13, window_bounds = array<i64: 1, 128>}, {pipeline_mode = #tpu.pipeline_mode<synchronous>, transform_indices = @transform_14, window_bounds = array<i64: 1, 128>}, {pipeline_mode = #tpu.pipeline_mode<synchronous>, transform_indices = @transform_15, window_bounds = array<i64: 1, 1>}, {transform_indices = @transform_16, window_bounds = array<i64: 8, 1>}]} {
    %c0 = arith.constant 0 : index
    %c0_0 = arith.constant 0 : index
    %0 = vector.load %arg1[%c0, %c0_0] : memref<8x128xbf16, #tpu.memory_space<vmem>>, vector<8x128xbf16>
    %c0_1 = arith.constant 0 : index
    %c0_2 = arith.constant 0 : index
    %1 = vector.load %arg2[%c0_1, %c0_2] : memref<8x128xbf16, #tpu.memory_space<vmem>>, vector<8x128xbf16>
    %c0_3 = arith.constant 0 : index
    %c0_4 = arith.constant 0 : index
    %2 = vector.load %arg3[%c0_3, %c0_4] : memref<128x2304xbf16, #tpu.memory_space<vmem>>, vector<128x256xbf16>
    %cst = arith.constant dense<0.000000e+00> : vector<8x256xf32>
    %3 = tpu.matmul %0, %2, %cst {dimension_numbers = #tpu.dot_dimension_numbers<[1], [0], [0], [1], [0, 0, 1, 1], [], []>} : vector<8x128xbf16>, vector<128x256xbf16>, vector<8x256xf32> -> vector<8x256xf32>
    %c0_5 = arith.constant 0 : index
    %c0_6 = arith.constant 0 : index
    %4 = vector.load %arg4[%c0_5, %c0_6] : memref<128x2304xbf16, #tpu.memory_space<vmem>>, vector<128x256xbf16>
    %cst_7 = arith.constant dense<0.000000e+00> : vector<8x256xf32>
    %5 = tpu.matmul %0, %4, %cst_7 {dimension_numbers = #tpu.dot_dimension_numbers<[1], [0], [0], [1], [0, 0, 1, 1], [], []>} : vector<8x128xbf16>, vector<128x256xbf16>, vector<8x256xf32> -> vector<8x256xf32>
    %6 = arith.maximumf %3, %5 : vector<8x256xf32>
    %c0_8 = arith.constant 0 : index
    %c0_9 = arith.constant 0 : index
    %7 = vector.load %arg5[%c0_8, %c0_9] : memref<1x2304xf32, #tpu.memory_space<vmem>>, vector<1x256xf32>
    %8 = vector.broadcast %7 : vector<1x256xf32> to vector<8x256xf32>
    %9 = arith.addf %6, %8 : vector<8x256xf32>
    %cst_10 = arith.constant 0.000000e+00 : f32
    %10 = vector.broadcast %cst_10 : f32 to vector<8x256xf32>
    %11 = arith.maximumf %9, %10 : vector<8x256xf32>
    %12 = arith.truncf %11 : vector<8x256xf32> to vector<8x256xbf16>
    %c0_11 = arith.constant 0 : index
    %c0_12 = arith.constant 0 : index
    %13 = vector.load %arg6[%c0_11, %c0_12] : memref<2304x128xbf16, #tpu.memory_space<vmem>>, vector<256x128xbf16>
    %cst_13 = arith.constant dense<0.000000e+00> : vector<8x128xf32>
    %14 = tpu.matmul %12, %13, %cst_13 {dimension_numbers = #tpu.dot_dimension_numbers<[1], [0], [0], [1], [0, 0, 1, 1], [], []>} : vector<8x256xbf16>, vector<256x128xbf16>, vector<8x128xf32> -> vector<8x128xf32>
    %c0_14 = arith.constant 0 : index
    %c0_15 = arith.constant 0 : index
    %15 = vector.load %arg18[%c0_14, %c0_15] : memref<8x128xf32, #tpu.memory_space<vmem>>, vector<8x128xf32>
    tpu.vector_store %arg18[%c0_14, %c0_15], %14 {strides = array<i32>} : memref<8x128xf32, #tpu.memory_space<vmem>>, vector<8x128xf32>,
    %c0_16 = arith.constant 0 : index
    %c256 = arith.constant 256 : index
    %16 = vector.load %arg3[%c0_16, %c256] : memref<128x2304xbf16, #tpu.memory_space<vmem>>, vector<128x256xbf16>
    %cst_17 = arith.constant dense<0.000000e+00> : vector<8x256xf32>
    %17 = tpu.matmul %0, %16, %cst_17 {dimension_numbers = #tpu.dot_dimension_numbers<[1], [0], [0], [1], [0, 0, 1, 1], [], []>} : vector<8x128xbf16>, vector<128x256xbf16>, vector<8x256xf32> -> vector<8x256xf32>
    %c0_18 = arith.constant 0 : index
    %c256_19 = arith.constant 256 : index
    %18 = vector.load %arg4[%c0_18, %c256_19] : memref<128x2304xbf16, #tpu.memory_space<vmem>>, vector<128x256xbf16>
    %cst_20 = arith.constant dense<0.000000e+00> : vector<8x256xf32>
    %19 = tpu.matmul %0, %18, %cst_20 {dimension_numbers = #tpu.dot_dimension_numbers<[1], [0], [0], [1], [0, 0, 1, 1], [], []>} : vector<8x128xbf16>, vector<128x256xbf16>, vector<8x256xf32> -> vector<8x256xf32>
    %20 = arith.maximumf %17, %19 : vector<8x256xf32>
    %c0_21 = arith.constant 0 : index
    %c256_22 = arith.constant 256 : index
    %21 = vector.load %arg5[%c0_21, %c256_22] : memref<1x2304xf32, #tpu.memory_space<vmem>>, vector<1x256xf32>
    %22 = vector.broadcast %21 : vector<1x256xf32> to vector<8x256xf32>
    %23 = arith.addf %20, %22 : vector<8x256xf32>
    %cst_23 = arith.constant 0.000000e+00 : f32
    %24 = vector.broadcast %cst_23 : f32 to vector<8x256xf32>
    %25 = arith.maximumf %23, %24 : vector<8x256xf32>
    %26 = arith.truncf %25 : vector<8x256xf32> to vector<8x256xbf16>
    %c256_24 = arith.constant 256 : index
    %c0_25 = arith.constant 0 : index
    %27 = vector.load %arg6[%c256_24, %c0_25] : memref<2304x128xbf16, #tpu.memory_space<vmem>>, vector<256x128xbf16>
    %cst_26 = arith.constant dense<0.000000e+00> : vector<8x128xf32>
    %28 = tpu.matmul %26, %27, %cst_26 {dimension_numbers = #tpu.dot_dimension_numbers<[1], [0], [0], [1], [0, 0, 1, 1], [], []>} : vector<8x256xbf16>, vector<256x128xbf16>, vector<8x128xf32> -> vector<8x128xf32>
    %c0_27 = arith.constant 0 : index
    %c0_28 = arith.constant 0 : index
    %29 = vector.load %arg18[%c0_27, %c0_28] : memref<8x128xf32, #tpu.memory_space<vmem>>, vector<8x128xf32>
    %30 = arith.addf %29, %28 : vector<8x128xf32>
    %c0_29 = arith.constant 0 : index
    %c0_30 = arith.constant 0 : index
    %31 = vector.load %arg18[%c0_29, %c0_30] : memref<8x128xf32, #tpu.memory_space<vmem>>, vector<8x128xf32>
    tpu.vector_store %arg18[%c0_29, %c0_30], %30 {strides = array<i32>} : memref<8x128xf32, #tpu.memory_space<vmem>>, vector<8x128xf32>,
    %c0_31 = arith.constant 0 : index
    %c512 = arith.constant 512 : index
    %32 = vector.load %arg3[%c0_31, %c512] : memref<128x2304xbf16, #tpu.memory_space<vmem>>, vector<128x256xbf16>
    %cst_32 = arith.constant dense<0.000000e+00> : vector<8x256xf32>
    %33 = tpu.matmul %0, %32, %cst_32 {dimension_numbers = #tpu.dot_dimension_numbers<[1], [0], [0], [1], [0, 0, 1, 1], [], []>} : vector<8x128xbf16>, vector<128x256xbf16>, vector<8x256xf32> -> vector<8x256xf32>
    %c0_33 = arith.constant 0 : index
    %c512_34 = arith.constant 512 : index
    %34 = vector.load %arg4[%c0_33, %c512_34] : memref<128x2304xbf16, #tpu.memory_space<vmem>>, vector<128x256xbf16>
    %cst_35 = arith.constant dense<0.000000e+00> : vector<8x256xf32>
    %35 = tpu.matmul %0, %34, %cst_35 {dimension_numbers = #tpu.dot_dimension_numbers<[1], [0], [0], [1], [0, 0, 1, 1], [], []>} : vector<8x128xbf16>, vector<128x256xbf16>, vector<8x256xf32> -> vector<8x256xf32>
    %36 = arith.maximumf %33, %35 : vector<8x256xf32>
    %c0_36 = arith.constant 0 : index
    %c512_37 = arith.constant 512 : index
    %37 = vector.load %arg5[%c0_36, %c512_37] : memref<1x2304xf32, #tpu.memory_space<vmem>>, vector<1x256xf32>
    %38 = vector.broadcast %37 : vector<1x256xf32> to vector<8x256xf32>
    %39 = arith.addf %36, %38 : vector<8x256xf32>
    %cst_38 = arith.constant 0.000000e+00 : f32
    %40 = vector.broadcast %cst_38 : f32 to vector<8x256xf32>
    %41 = arith.maximumf %39, %40 : vector<8x256xf32>
    %42 = arith.truncf %41 : vector<8x256xf32> to vector<8x256xbf16>
    %c512_39 = arith.constant 512 : index
    %c0_40 = arith.constant 0 : index
    %43 = vector.load %arg6[%c512_39, %c0_40] : memref<2304x128xbf16, #tpu.memory_space<vmem>>, vector<256x128xbf16>
    %cst_41 = arith.constant dense<0.000000e+00> : vector<8x128xf32>
    %44 = tpu.matmul %42, %43, %cst_41 {dimension_numbers = #tpu.dot_dimension_numbers<[1], [0], [0], [1], [0, 0, 1, 1], [], []>} : vector<8x256xbf16>, vector<256x128xbf16>, vector<8x128xf32> -> vector<8x128xf32>
    %c0_42 = arith.constant 0 : index
    %c0_43 = arith.constant 0 : index
    %45 = vector.load %arg18[%c0_42, %c0_43] : memref<8x128xf32, #tpu.memory_space<vmem>>, vector<8x128xf32>
    %46 = arith.addf %45, %44 : vector<8x128xf32>
    %c0_44 = arith.constant 0 : index
    %c0_45 = arith.constant 0 : index
    %47 = vector.load %arg18[%c0_44, %c0_45] : memref<8x128xf32, #tpu.memory_space<vmem>>, vector<8x128xf32>
    tpu.vector_store %arg18[%c0_44, %c0_45], %46 {strides = array<i32>} : memref<8x128xf32, #tpu.memory_space<vmem>>, vector<8x128xf32>,
    %c0_46 = arith.constant 0 : index
    %c768 = arith.constant 768 : index
    %48 = vector.load %arg3[%c0_46, %c768] : memref<128x2304xbf16, #tpu.memory_space<vmem>>, vector<128x256xbf16>
    %cst_47 = arith.constant dense<0.000000e+00> : vector<8x256xf32>
    %49 = tpu.matmul %0, %48, %cst_47 {dimension_numbers = #tpu.dot_dimension_numbers<[1], [0], [0], [1], [0, 0, 1, 1], [], []>} : vector<8x128xbf16>, vector<128x256xbf16>, vector<8x256xf32> -> vector<8x256xf32>
    %c0_48 = arith.constant 0 : index
    %c768_49 = arith.constant 768 : index
    %50 = vector.load %arg4[%c0_48, %c768_49] : memref<128x2304xbf16, #tpu.memory_space<vmem>>, vector<128x256xbf16>
    %cst_50 = arith.constant dense<0.000000e+00> : vector<8x256xf32>
    %51 = tpu.matmul %0, %50, %cst_50 {dimension_numbers = #tpu.dot_dimension_numbers<[1], [0], [0], [1], [0, 0, 1, 1], [], []>} : vector<8x128xbf16>, vector<128x256xbf16>, vector<8x256xf32> -> vector<8x256xf32>
    %52 = arith.maximumf %49, %51 : vector<8x256xf32>
    %c0_51 = arith.constant 0 : index
    %c768_52 = arith.constant 768 : index
    %53 = vector.load %arg5[%c0_51, %c768_52] : memref<1x2304xf32, #tpu.memory_space<vmem>>, vector<1x256xf32>
    %54 = vector.broadcast %53 : vector<1x256xf32> to vector<8x256xf32>
    %55 = arith.addf %52, %54 : vector<8x256xf32>
    %cst_53 = arith.constant 0.000000e+00 : f32
    %56 = vector.broadcast %cst_53 : f32 to vector<8x256xf32>
    %57 = arith.maximumf %55, %56 : vector<8x256xf32>
    %58 = arith.truncf %57 : vector<8x256xf32> to vector<8x256xbf16>
    %c768_54 = arith.constant 768 : index
    %c0_55 = arith.constant 0 : index
    %59 = vector.load %arg6[%c768_54, %c0_55] : memref<2304x128xbf16, #tpu.memory_space<vmem>>, vector<256x128xbf16>
    %cst_56 = arith.constant dense<0.000000e+00> : vector<8x128xf32>
    %60 = tpu.matmul %58, %59, %cst_56 {dimension_numbers = #tpu.dot_dimension_numbers<[1], [0], [0], [1], [0, 0, 1, 1], [], []>} : vector<8x256xbf16>, vector<256x128xbf16>, vector<8x128xf32> -> vector<8x128xf32>
    %c0_57 = arith.constant 0 : index
    %c0_58 = arith.constant 0 : index
    %61 = vector.load %arg18[%c0_57, %c0_58] : memref<8x128xf32, #tpu.memory_space<vmem>>, vector<8x128xf32>
    %62 = arith.addf %61, %60 : vector<8x128xf32>
    %c0_59 = arith.constant 0 : index
    %c0_60 = arith.constant 0 : index
    %63 = vector.load %arg18[%c0_59, %c0_60] : memref<8x128xf32, #tpu.memory_space<vmem>>, vector<8x128xf32>
    tpu.vector_store %arg18[%c0_59, %c0_60], %62 {strides = array<i32>} : memref<8x128xf32, #tpu.memory_space<vmem>>, vector<8x128xf32>,
    %c0_61 = arith.constant 0 : index
    %c1024 = arith.constant 1024 : index
    %64 = vector.load %arg3[%c0_61, %c1024] : memref<128x2304xbf16, #tpu.memory_space<vmem>>, vector<128x256xbf16>
    %cst_62 = arith.constant dense<0.000000e+00> : vector<8x256xf32>
    %65 = tpu.matmul %0, %64, %cst_62 {dimension_numbers = #tpu.dot_dimension_numbers<[1], [0], [0], [1], [0, 0, 1, 1], [], []>} : vector<8x128xbf16>, vector<128x256xbf16>, vector<8x256xf32> -> vector<8x256xf32>
    %c0_63 = arith.constant 0 : index
    %c1024_64 = arith.constant 1024 : index
    %66 = vector.load %arg4[%c0_63, %c1024_64] : memref<128x2304xbf16, #tpu.memory_space<vmem>>, vector<128x256xbf16>
    %cst_65 = arith.constant dense<0.000000e+00> : vector<8x256xf32>
    %67 = tpu.matmul %0, %66, %cst_65 {dimension_numbers = #tpu.dot_dimension_numbers<[1], [0], [0], [1], [0, 0, 1, 1], [], []>} : vector<8x128xbf16>, vector<128x256xbf16>, vector<8x256xf32> -> vector<8x256xf32>
    %68 = arith.maximumf %65, %67 : vector<8x256xf32>
    %c0_66 = arith.constant 0 : index
    %c1024_67 = arith.constant 1024 : index
    %69 = vector.load %arg5[%c0_66, %c1024_67] : memref<1x2304xf32, #tpu.memory_space<vmem>>, vector<1x256xf32>
    %70 = vector.broadcast %69 : vector<1x256xf32> to vector<8x256xf32>
    %71 = arith.addf %68, %70 : vector<8x256xf32>
    %cst_68 = arith.constant 0.000000e+00 : f32
    %72 = vector.broadcast %cst_68 : f32 to vector<8x256xf32>
    %73 = arith.maximumf %71, %72 : vector<8x256xf32>
    %74 = arith.truncf %73 : vector<8x256xf32> to vector<8x256xbf16>
    %c1024_69 = arith.constant 1024 : index
    %c0_70 = arith.constant 0 : index
    %75 = vector.load %arg6[%c1024_69, %c0_70] : memref<2304x128xbf16, #tpu.memory_space<vmem>>, vector<256x128xbf16>
    %cst_71 = arith.constant dense<0.000000e+00> : vector<8x128xf32>
    %76 = tpu.matmul %74, %75, %cst_71 {dimension_numbers = #tpu.dot_dimension_numbers<[1], [0], [0], [1], [0, 0, 1, 1], [], []>} : vector<8x256xbf16>, vector<256x128xbf16>, vector<8x128xf32> -> vector<8x128xf32>
    %c0_72 = arith.constant 0 : index
    %c0_73 = arith.constant 0 : index
    %77 = vector.load %arg18[%c0_72, %c0_73] : memref<8x128xf32, #tpu.memory_space<vmem>>, vector<8x128xf32>
    %78 = arith.addf %77, %76 : vector<8x128xf32>
    %c0_74 = arith.constant 0 : index
    %c0_75 = arith.constant 0 : index
    %79 = vector.load %arg18[%c0_74, %c0_75] : memref<8x128xf32, #tpu.memory_space<vmem>>, vector<8x128xf32>
    tpu.vector_store %arg18[%c0_74, %c0_75], %78 {strides = array<i32>} : memref<8x128xf32, #tpu.memory_space<vmem>>, vector<8x128xf32>,
    %c0_76 = arith.constant 0 : index
    %c1280 = arith.constant 1280 : index
    %80 = vector.load %arg3[%c0_76, %c1280] : memref<128x2304xbf16, #tpu.memory_space<vmem>>, vector<128x256xbf16>
    %cst_77 = arith.constant dense<0.000000e+00> : vector<8x256xf32>
    %81 = tpu.matmul %0, %80, %cst_77 {dimension_numbers = #tpu.dot_dimension_numbers<[1], [0], [0], [1], [0, 0, 1, 1], [], []>} : vector<8x128xbf16>, vector<128x256xbf16>, vector<8x256xf32> -> vector<8x256xf32>
    %c0_78 = arith.constant 0 : index
    %c1280_79 = arith.constant 1280 : index
    %82 = vector.load %arg4[%c0_78, %c1280_79] : memref<128x2304xbf16, #tpu.memory_space<vmem>>, vector<128x256xbf16>
    %cst_80 = arith.constant dense<0.000000e+00> : vector<8x256xf32>
    %83 = tpu.matmul %0, %82, %cst_80 {dimension_numbers = #tpu.dot_dimension_numbers<[1], [0], [0], [1], [0, 0, 1, 1], [], []>} : vector<8x128xbf16>, vector<128x256xbf16>, vector<8x256xf32> -> vector<8x256xf32>
    %84 = arith.maximumf %81, %83 : vector<8x256xf32>
    %c0_81 = arith.constant 0 : index
    %c1280_82 = arith.constant 1280 : index
    %85 = vector.load %arg5[%c0_81, %c1280_82] : memref<1x2304xf32, #tpu.memory_space<vmem>>, vector<1x256xf32>
    %86 = vector.broadcast %85 : vector<1x256xf32> to vector<8x256xf32>
    %87 = arith.addf %84, %86 : vector<8x256xf32>
    %cst_83 = arith.constant 0.000000e+00 : f32
    %88 = vector.broadcast %cst_83 : f32 to vector<8x256xf32>
    %89 = arith.maximumf %87, %88 : vector<8x256xf32>
    %90 = arith.truncf %89 : vector<8x256xf32> to vector<8x256xbf16>
    %c1280_84 = arith.constant 1280 : index
    %c0_85 = arith.constant 0 : index
    %91 = vector.load %arg6[%c1280_84, %c0_85] : memref<2304x128xbf16, #tpu.memory_space<vmem>>, vector<256x128xbf16>
    %cst_86 = arith.constant dense<0.000000e+00> : vector<8x128xf32>
    %92 = tpu.matmul %90, %91, %cst_86 {dimension_numbers = #tpu.dot_dimension_numbers<[1], [0], [0], [1], [0, 0, 1, 1], [], []>} : vector<8x256xbf16>, vector<256x128xbf16>, vector<8x128xf32> -> vector<8x128xf32>
    %c0_87 = arith.constant 0 : index
    %c0_88 = arith.constant 0 : index
    %93 = vector.load %arg18[%c0_87, %c0_88] : memref<8x128xf32, #tpu.memory_space<vmem>>, vector<8x128xf32>
    %94 = arith.addf %93, %92 : vector<8x128xf32>
    %c0_89 = arith.constant 0 : index
    %c0_90 = arith.constant 0 : index
    %95 = vector.load %arg18[%c0_89, %c0_90] : memref<8x128xf32, #tpu.memory_space<vmem>>, vector<8x128xf32>
    tpu.vector_store %arg18[%c0_89, %c0_90], %94 {strides = array<i32>} : memref<8x128xf32, #tpu.memory_space<vmem>>, vector<8x128xf32>,
    %c0_91 = arith.constant 0 : index
    %c1536 = arith.constant 1536 : index
    %96 = vector.load %arg3[%c0_91, %c1536] : memref<128x2304xbf16, #tpu.memory_space<vmem>>, vector<128x256xbf16>
    %cst_92 = arith.constant dense<0.000000e+00> : vector<8x256xf32>
    %97 = tpu.matmul %0, %96, %cst_92 {dimension_numbers = #tpu.dot_dimension_numbers<[1], [0], [0], [1], [0, 0, 1, 1], [], []>} : vector<8x128xbf16>, vector<128x256xbf16>, vector<8x256xf32> -> vector<8x256xf32>
    %c0_93 = arith.constant 0 : index
    %c1536_94 = arith.constant 1536 : index
    %98 = vector.load %arg4[%c0_93, %c1536_94] : memref<128x2304xbf16, #tpu.memory_space<vmem>>, vector<128x256xbf16>
    %cst_95 = arith.constant dense<0.000000e+00> : vector<8x256xf32>
    %99 = tpu.matmul %0, %98, %cst_95 {dimension_numbers = #tpu.dot_dimension_numbers<[1], [0], [0], [1], [0, 0, 1, 1], [], []>} : vector<8x128xbf16>, vector<128x256xbf16>, vector<8x256xf32> -> vector<8x256xf32>
    %100 = arith.maximumf %97, %99 : vector<8x256xf32>
    %c0_96 = arith.constant 0 : index
    %c1536_97 = arith.constant 1536 : index
    %101 = vector.load %arg5[%c0_96, %c1536_97] : memref<1x2304xf32, #tpu.memory_space<vmem>>, vector<1x256xf32>
    %102 = vector.broadcast %101 : vector<1x256xf32> to vector<8x256xf32>
    %103 = arith.addf %100, %102 : vector<8x256xf32>
    %cst_98 = arith.constant 0.000000e+00 : f32
    %104 = vector.broadcast %cst_98 : f32 to vector<8x256xf32>
    %105 = arith.maximumf %103, %104 : vector<8x256xf32>
    %106 = arith.truncf %105 : vector<8x256xf32> to vector<8x256xbf16>
    %c1536_99 = arith.constant 1536 : index
    %c0_100 = arith.constant 0 : index
    %107 = vector.load %arg6[%c1536_99, %c0_100] : memref<2304x128xbf16, #tpu.memory_space<vmem>>, vector<256x128xbf16>
    %cst_101 = arith.constant dense<0.000000e+00> : vector<8x128xf32>
    %108 = tpu.matmul %106, %107, %cst_101 {dimension_numbers = #tpu.dot_dimension_numbers<[1], [0], [0], [1], [0, 0, 1, 1], [], []>} : vector<8x256xbf16>, vector<256x128xbf16>, vector<8x128xf32> -> vector<8x128xf32>
    %c0_102 = arith.constant 0 : index
    %c0_103 = arith.constant 0 : index
    %109 = vector.load %arg18[%c0_102, %c0_103] : memref<8x128xf32, #tpu.memory_space<vmem>>, vector<8x128xf32>
    %110 = arith.addf %109, %108 : vector<8x128xf32>
    %c0_104 = arith.constant 0 : index
    %c0_105 = arith.constant 0 : index
    %111 = vector.load %arg18[%c0_104, %c0_105] : memref<8x128xf32, #tpu.memory_space<vmem>>, vector<8x128xf32>
    tpu.vector_store %arg18[%c0_104, %c0_105], %110 {strides = array<i32>} : memref<8x128xf32, #tpu.memory_space<vmem>>, vector<8x128xf32>,
    %c0_106 = arith.constant 0 : index
    %c1792 = arith.constant 1792 : index
    %112 = vector.load %arg3[%c0_106, %c1792] : memref<128x2304xbf16, #tpu.memory_space<vmem>>, vector<128x256xbf16>
    %cst_107 = arith.constant dense<0.000000e+00> : vector<8x256xf32>
    %113 = tpu.matmul %0, %112, %cst_107 {dimension_numbers = #tpu.dot_dimension_numbers<[1], [0], [0], [1], [0, 0, 1, 1], [], []>} : vector<8x128xbf16>, vector<128x256xbf16>, vector<8x256xf32> -> vector<8x256xf32>
    %c0_108 = arith.constant 0 : index
    %c1792_109 = arith.constant 1792 : index
    %114 = vector.load %arg4[%c0_108, %c1792_109] : memref<128x2304xbf16, #tpu.memory_space<vmem>>, vector<128x256xbf16>
    %cst_110 = arith.constant dense<0.000000e+00> : vector<8x256xf32>
    %115 = tpu.matmul %0, %114, %cst_110 {dimension_numbers = #tpu.dot_dimension_numbers<[1], [0], [0], [1], [0, 0, 1, 1], [], []>} : vector<8x128xbf16>, vector<128x256xbf16>, vector<8x256xf32> -> vector<8x256xf32>
    %116 = arith.maximumf %113, %115 : vector<8x256xf32>
    %c0_111 = arith.constant 0 : index
    %c1792_112 = arith.constant 1792 : index
    %117 = vector.load %arg5[%c0_111, %c1792_112] : memref<1x2304xf32, #tpu.memory_space<vmem>>, vector<1x256xf32>
    %118 = vector.broadcast %117 : vector<1x256xf32> to vector<8x256xf32>
    %119 = arith.addf %116, %118 : vector<8x256xf32>
    %cst_113 = arith.constant 0.000000e+00 : f32
    %120 = vector.broadcast %cst_113 : f32 to vector<8x256xf32>
    %121 = arith.maximumf %119, %120 : vector<8x256xf32>
    %122 = arith.truncf %121 : vector<8x256xf32> to vector<8x256xbf16>
    %c1792_114 = arith.constant 1792 : index
    %c0_115 = arith.constant 0 : index
    %123 = vector.load %arg6[%c1792_114, %c0_115] : memref<2304x128xbf16, #tpu.memory_space<vmem>>, vector<256x128xbf16>
    %cst_116 = arith.constant dense<0.000000e+00> : vector<8x128xf32>
    %124 = tpu.matmul %122, %123, %cst_116 {dimension_numbers = #tpu.dot_dimension_numbers<[1], [0], [0], [1], [0, 0, 1, 1], [], []>} : vector<8x256xbf16>, vector<256x128xbf16>, vector<8x128xf32> -> vector<8x128xf32>
    %c0_117 = arith.constant 0 : index
    %c0_118 = arith.constant 0 : index
    %125 = vector.load %arg18[%c0_117, %c0_118] : memref<8x128xf32, #tpu.memory_space<vmem>>, vector<8x128xf32>
    %126 = arith.addf %125, %124 : vector<8x128xf32>
    %c0_119 = arith.constant 0 : index
    %c0_120 = arith.constant 0 : index
    %127 = vector.load %arg18[%c0_119, %c0_120] : memref<8x128xf32, #tpu.memory_space<vmem>>, vector<8x128xf32>
    tpu.vector_store %arg18[%c0_119, %c0_120], %126 {strides = array<i32>} : memref<8x128xf32, #tpu.memory_space<vmem>>, vector<8x128xf32>,
    %c0_121 = arith.constant 0 : index
    %c2048 = arith.constant 2048 : index
    %128 = vector.load %arg3[%c0_121, %c2048] : memref<128x2304xbf16, #tpu.memory_space<vmem>>, vector<128x256xbf16>
    %cst_122 = arith.constant dense<0.000000e+00> : vector<8x256xf32>
    %129 = tpu.matmul %0, %128, %cst_122 {dimension_numbers = #tpu.dot_dimension_numbers<[1], [0], [0], [1], [0, 0, 1, 1], [], []>} : vector<8x128xbf16>, vector<128x256xbf16>, vector<8x256xf32> -> vector<8x256xf32>
    %c0_123 = arith.constant 0 : index
    %c2048_124 = arith.constant 2048 : index
    %130 = vector.load %arg4[%c0_123, %c2048_124] : memref<128x2304xbf16, #tpu.memory_space<vmem>>, vector<128x256xbf16>
    %cst_125 = arith.constant dense<0.000000e+00> : vector<8x256xf32>
    %131 = tpu.matmul %0, %130, %cst_125 {dimension_numbers = #tpu.dot_dimension_numbers<[1], [0], [0], [1], [0, 0, 1, 1], [], []>} : vector<8x128xbf16>, vector<128x256xbf16>, vector<8x256xf32> -> vector<8x256xf32>
    %132 = arith.maximumf %129, %131 : vector<8x256xf32>
    %c0_126 = arith.constant 0 : index
    %c2048_127 = arith.constant 2048 : index
    %133 = vector.load %arg5[%c0_126, %c2048_127] : memref<1x2304xf32, #tpu.memory_space<vmem>>, vector<1x256xf32>
    %134 = vector.broadcast %133 : vector<1x256xf32> to vector<8x256xf32>
    %135 = arith.addf %132, %134 : vector<8x256xf32>
    %cst_128 = arith.constant 0.000000e+00 : f32
    %136 = vector.broadcast %cst_128 : f32 to vector<8x256xf32>
    %137 = arith.maximumf %135, %136 : vector<8x256xf32>
    %138 = arith.truncf %137 : vector<8x256xf32> to vector<8x256xbf16>
    %c2048_129 = arith.constant 2048 : index
    %c0_130 = arith.constant 0 : index
    %139 = vector.load %arg6[%c2048_129, %c0_130] : memref<2304x128xbf16, #tpu.memory_space<vmem>>, vector<256x128xbf16>
    %cst_131 = arith.constant dense<0.000000e+00> : vector<8x128xf32>
    %140 = tpu.matmul %138, %139, %cst_131 {dimension_numbers = #tpu.dot_dimension_numbers<[1], [0], [0], [1], [0, 0, 1, 1], [], []>} : vector<8x256xbf16>, vector<256x128xbf16>, vector<8x128xf32> -> vector<8x128xf32>
    %c0_132 = arith.constant 0 : index
    %c0_133 = arith.constant 0 : index
    %141 = vector.load %arg18[%c0_132, %c0_133] : memref<8x128xf32, #tpu.memory_space<vmem>>, vector<8x128xf32>
    %142 = arith.addf %141, %140 : vector<8x128xf32>
    %c0_134 = arith.constant 0 : index
    %c0_135 = arith.constant 0 : index
    %143 = vector.load %arg18[%c0_134, %c0_135] : memref<8x128xf32, #tpu.memory_space<vmem>>, vector<8x128xf32>
    tpu.vector_store %arg18[%c0_134, %c0_135], %142 {strides = array<i32>} : memref<8x128xf32, #tpu.memory_space<vmem>>, vector<8x128xf32>,
    %c0_136 = arith.constant 0 : index
    %c0_137 = arith.constant 0 : index
    %144 = vector.load %arg18[%c0_136, %c0_137] : memref<8x128xf32, #tpu.memory_space<vmem>>, vector<8x128xf32>
    %c0_138 = arith.constant 0 : index
    %c0_139 = arith.constant 0 : index
    %145 = vector.load %arg7[%c0_138, %c0_139] : memref<1x128xf32, #tpu.memory_space<vmem>>, vector<1x128xf32>
    %146 = vector.broadcast %145 : vector<1x128xf32> to vector<8x128xf32>
    %147 = arith.addf %144, %146 : vector<8x128xf32>
    %cst_140 = arith.constant 0.000000e+00 : f32
    %148 = vector.broadcast %cst_140 : f32 to vector<8x128xf32>
    %149 = arith.maximumf %147, %148 : vector<8x128xf32>
    %150 = arith.truncf %149 : vector<8x128xf32> to vector<8x128xbf16>
    %c0_141 = arith.constant 0 : index
    %c0_142 = arith.constant 0 : index
    %151 = vector.load %arg8[%c0_141, %c0_142] : memref<128x128xbf16, #tpu.memory_space<vmem>>, vector<128x128xbf16>
    %cst_143 = arith.constant dense<0.000000e+00> : vector<8x128xf32>
    %152 = tpu.matmul %150, %151, %cst_143 {dimension_numbers = #tpu.dot_dimension_numbers<[1], [0], [0], [1], [0, 0, 1, 1], [], []>} : vector<8x128xbf16>, vector<128x128xbf16>, vector<8x128xf32> -> vector<8x128xf32>
    %c0_144 = arith.constant 0 : index
    %c0_145 = arith.constant 0 : index
    %153 = vector.load %arg9[%c0_144, %c0_145] : memref<128x128xbf16, #tpu.memory_space<vmem>>, vector<128x128xbf16>
    %cst_146 = arith.constant dense<0.000000e+00> : vector<8x128xf32>
    %154 = tpu.matmul %1, %153, %cst_146 {dimension_numbers = #tpu.dot_dimension_numbers<[1], [0], [0], [1], [0, 0, 1, 1], [], []>} : vector<8x128xbf16>, vector<128x128xbf16>, vector<8x128xf32> -> vector<8x128xf32>
    %155 = arith.addf %152, %154 : vector<8x128xf32>
    %c0_147 = arith.constant 0 : index
    %c0_148 = arith.constant 0 : index
    %156 = vector.load %arg10[%c0_147, %c0_148] : memref<1x128xf32, #tpu.memory_space<vmem>>, vector<1x128xf32>
    %157 = vector.broadcast %156 : vector<1x128xf32> to vector<8x128xf32>
    %158 = arith.addf %155, %157 : vector<8x128xf32>
    %cst_149 = arith.constant 0.000000e+00 : f32
    %159 = vector.broadcast %cst_149 : f32 to vector<8x128xf32>
    %160 = arith.maximumf %158, %159 : vector<8x128xf32>
    %161 = arith.truncf %160 : vector<8x128xf32> to vector<8x128xbf16>
    %c0_150 = arith.constant 0 : index
    %c0_151 = arith.constant 0 : index
    %162 = vector.load %arg11[%c0_150, %c0_151] : memref<128x128xbf16, #tpu.memory_space<vmem>>, vector<128x128xbf16>
    %cst_152 = arith.constant dense<0.000000e+00> : vector<8x128xf32>
    %163 = tpu.matmul %161, %162, %cst_152 {dimension_numbers = #tpu.dot_dimension_numbers<[1], [0], [0], [1], [0, 0, 1, 1], [], []>} : vector<8x128xbf16>, vector<128x128xbf16>, vector<8x128xf32> -> vector<8x128xf32>
    %c0_153 = arith.constant 0 : index
    %c0_154 = arith.constant 0 : index
    %164 = vector.load %arg12[%c0_153, %c0_154] : memref<1x128xf32, #tpu.memory_space<vmem>>, vector<1x128xf32>
    %165 = vector.broadcast %164 : vector<1x128xf32> to vector<8x128xf32>
    %166 = arith.addf %163, %165 : vector<8x128xf32>
    %cst_155 = arith.constant 0.000000e+00 : f32
    %167 = vector.broadcast %cst_155 : f32 to vector<8x128xf32>
    %168 = arith.maximumf %166, %167 : vector<8x128xf32>
    %169 = arith.truncf %168 : vector<8x128xf32> to vector<8x128xbf16>
    %c0_156 = arith.constant 0 : index
    %c0_157 = arith.constant 0 : index
    %170 = vector.load %arg13[%c0_156, %c0_157] : memref<128x128xbf16, #tpu.memory_space<vmem>>, vector<128x128xbf16>
    %cst_158 = arith.constant dense<0.000000e+00> : vector<8x128xf32>
    %171 = tpu.matmul %169, %170, %cst_158 {dimension_numbers = #tpu.dot_dimension_numbers<[1], [0], [0], [1], [0, 0, 1, 1], [], []>} : vector<8x128xbf16>, vector<128x128xbf16>, vector<8x128xf32> -> vector<8x128xf32>
    %c0_159 = arith.constant 0 : index
    %c0_160 = arith.constant 0 : index
    %172 = vector.load %arg14[%c0_159, %c0_160] : memref<1x128xf32, #tpu.memory_space<vmem>>, vector<1x128xf32>
    %173 = vector.broadcast %172 : vector<1x128xf32> to vector<8x128xf32>
    %174 = arith.addf %171, %173 : vector<8x128xf32>
    %cst_161 = arith.constant 0.000000e+00 : f32
    %175 = vector.broadcast %cst_161 : f32 to vector<8x128xf32>
    %176 = arith.maximumf %174, %175 : vector<8x128xf32>
    %c0_162 = arith.constant 0 : index
    %c0_163 = arith.constant 0 : index
    %177 = vector.load %arg15[%c0_162, %c0_163] : memref<1x128xf32, #tpu.memory_space<vmem>>, vector<1x128xf32>
    %178 = vector.broadcast %177 : vector<1x128xf32> to vector<8x128xf32>
    %179 = arith.mulf %176, %178 : vector<8x128xf32>
    %cst_164 = arith.constant dense<0.000000e+00> : vector<8xf32>
    %180 = vector.multi_reduction <add>, %179, %cst_164 [1] : vector<8x128xf32> to vector<8xf32>
    %181 = vector.shape_cast %180 : vector<8xf32> to vector<8x1xf32>
    %c0_165 = arith.constant 0 : index
    %c0_166 = arith.constant 0 : index
    %182 = vector.load %arg16[%c0_165, %c0_166] : memref<1x1xf32, #tpu.memory_space<vmem>>, vector<1x1xf32>
    %183 = vector.broadcast %182 : vector<1x1xf32> to vector<8x1xf32>
    %184 = arith.addf %181, %183 : vector<8x1xf32>
    %185 = arith.negf %184 : vector<8x1xf32>
    %186 = math.exp %185 : vector<8x1xf32>
    %cst_167 = arith.constant 1.000000e+00 : f32
    %187 = vector.broadcast %cst_167 : f32 to vector<8x1xf32>
    %188 = arith.addf %187, %186 : vector<8x1xf32>
    %189 = arith.divf %187, %188 : vector<8x1xf32>
    %c0_168 = arith.constant 0 : index
    %c0_169 = arith.constant 0 : index
    %190 = vector.load %arg17[%c0_168, %c0_169] : memref<8x1xf32, #tpu.memory_space<vmem>>, vector<8x1xf32>
    tpu.vector_store %arg17[%c0_168, %c0_169], %189 {strides = array<i32>} : memref<8x1xf32, #tpu.memory_space<vmem>>, vector<8x1xf32>,
    return
  }
  func.func @transform_0(%arg0: i32) -> (i32, i32) {
    %c0_i32 = arith.constant 0 : i32
    %c0_i32_0 = arith.constant 0 : i32
    return %arg0, %c0_i32 : i32, i32
  }
  func.func @transform_1(%arg0: i32) -> (i32, i32) {
    %c0_i32 = arith.constant 0 : i32
    %c0_i32_0 = arith.constant 0 : i32
    return %arg0, %c0_i32 : i32, i32
  }
  func.func @transform_2(%arg0: i32) -> (i32, i32) {
    %c0_i32 = arith.constant 0 : i32
    %c0_i32_0 = arith.constant 0 : i32
    %c0_i32_1 = arith.constant 0 : i32
    return %c0_i32, %c0_i32_0 : i32, i32
  }
  func.func @transform_3(%arg0: i32) -> (i32, i32) {
    %c0_i32 = arith.constant 0 : i32
    %c0_i32_0 = arith.constant 0 : i32
    %c0_i32_1 = arith.constant 0 : i32
    return %c0_i32, %c0_i32_0 : i32, i32
  }
  func.func @transform_4(%arg0: i32) -> (i32, i32) {
    %c0_i32 = arith.constant 0 : i32
    %c0_i32_0 = arith.constant 0 : i32
    %c0_i32_1 = arith.constant 0 : i32
    return %c0_i32, %c0_i32_0 : i32, i32
  }
  func.func @transform_5(%arg0: i32) -> (i32, i32) {
    %c0_i32 = arith.constant 0 : i32
    %c0_i32_0 = arith.constant 0 : i32
    %c0_i32_1 = arith.constant 0 : i32
    return %c0_i32, %c0_i32_0 : i32, i32
  }
  func.func @transform_6(%arg0: i32) -> (i32, i32) {
    %c0_i32 = arith.constant 0 : i32
    %c0_i32_0 = arith.constant 0 : i32
    %c0_i32_1 = arith.constant 0 : i32
    return %c0_i32, %c0_i32_0 : i32, i32
  }
  func.func @transform_7(%arg0: i32) -> (i32, i32) {
    %c0_i32 = arith.constant 0 : i32
    %c0_i32_0 = arith.constant 0 : i32
    %c0_i32_1 = arith.constant 0 : i32
    return %c0_i32, %c0_i32_0 : i32, i32
  }
  func.func @transform_8(%arg0: i32) -> (i32, i32) {
    %c0_i32 = arith.constant 0 : i32
    %c0_i32_0 = arith.constant 0 : i32
    %c0_i32_1 = arith.constant 0 : i32
    return %c0_i32, %c0_i32_0 : i32, i32
  }
  func.func @transform_9(%arg0: i32) -> (i32, i32) {
    %c0_i32 = arith.constant 0 : i32
    %c0_i32_0 = arith.constant 0 : i32
    %c0_i32_1 = arith.constant 0 : i32
    return %c0_i32, %c0_i32_0 : i32, i32
  }
  func.func @transform_10(%arg0: i32) -> (i32, i32) {
    %c0_i32 = arith.constant 0 : i32
    %c0_i32_0 = arith.constant 0 : i32
    %c0_i32_1 = arith.constant 0 : i32
    return %c0_i32, %c0_i32_0 : i32, i32
  }
  func.func @transform_11(%arg0: i32) -> (i32, i32) {
    %c0_i32 = arith.constant 0 : i32
    %c0_i32_0 = arith.constant 0 : i32
    %c0_i32_1 = arith.constant 0 : i32
    return %c0_i32, %c0_i32_0 : i32, i32
  }
  func.func @transform_12(%arg0: i32) -> (i32, i32) {
    %c0_i32 = arith.constant 0 : i32
    %c0_i32_0 = arith.constant 0 : i32
    %c0_i32_1 = arith.constant 0 : i32
    return %c0_i32, %c0_i32_0 : i32, i32
  }
  func.func @transform_13(%arg0: i32) -> (i32, i32) {
    %c0_i32 = arith.constant 0 : i32
    %c0_i32_0 = arith.constant 0 : i32
    %c0_i32_1 = arith.constant 0 : i32
    return %c0_i32, %c0_i32_0 : i32, i32
  }
  func.func @transform_14(%arg0: i32) -> (i32, i32) {
    %c0_i32 = arith.constant 0 : i32
    %c0_i32_0 = arith.constant 0 : i32
    %c0_i32_1 = arith.constant 0 : i32
    return %c0_i32, %c0_i32_0 : i32, i32
  }
  func.func @transform_15(%arg0: i32) -> (i32, i32) {
    %c0_i32 = arith.constant 0 : i32
    %c0_i32_0 = arith.constant 0 : i32
    %c0_i32_1 = arith.constant 0 : i32
    return %c0_i32, %c0_i32_0 : i32, i32
  }
  func.func @transform_16(%arg0: i32) -> (i32, i32) {
    %c0_i32 = arith.constant 0 : i32
    %c0_i32_0 = arith.constant 0 : i32
    return %arg0, %c0_i32 : i32, i32
  }
}

</mosaic_0001>

<bundles_post_ra>
// kernel: tpu_custom_call.1
= control target key start
LH: loop header
LB: loop body
LE: loop exit
PB: predicated region body
PF: predicated region fallthrough
CT: control target
= control target key end

     0   :  { %s7192_s0 = inlined_call_operand.hbm [shape: bf16[8,128], index: 0, kind: input, shape index: {}]   ;;  %s7193_s1 = inlined_call_operand.hbm [shape: bf16[8,128], index: 1, kind: input, shape index: {}]   ;;  %s7194_s2 = inlined_call_operand.hbm [shape: bf16[128,2304], index: 2, kind: input, shape index: {}]   ;;  %s7195_s3 = inlined_call_operand.hbm [shape: bf16[128,2304], index: 3, kind: input, shape index: {}]   ;;  %s7196_s4 = inlined_call_operand.hbm [shape: f32[1,2304], index: 4, kind: input, shape index: {}]   ;;  %s7197_s5 = inlined_call_operand.hbm [shape: bf16[2304,128], index: 5, kind: input, shape index: {}]   ;;  %s7198_s6 = inlined_call_operand.vmem [shape: f32[1,128], index: 6, kind: input, shape index: {}]   ;;  %s7199_s7 = inlined_call_operand.hbm [shape: bf16[128,128], index: 7, kind: input, shape index: {}]   ;;  %s7200_s8 = inlined_call_operand.hbm [shape: bf16[128,128], index: 8, kind: input, shape index: {}]   ;;  %s7201_s9 = inlined_call_operand.vmem [shape: f32[1,128], index: 9, kind: input, shape index: {}]   ;;  %s7202_s10 = inlined_call_operand.hbm [shape: bf16[128,128], index: 10, kind: input, shape index: {}]   ;;  %s7203_s11 = inlined_call_operand.vmem [shape: f32[1,128], index: 11, kind: input, shape index: {}]   ;;  %s7204_s12 = inlined_call_operand.hbm [shape: bf16[128,128], index: 12, kind: input, shape index: {}]   ;;  %s7205_s13 = inlined_call_operand.vmem [shape: f32[1,128], index: 13, kind: input, shape index: {}]   ;;  %s7206_s14 = inlined_call_operand.vmem [shape: f32[1,128], index: 14, kind: input, shape index: {}]   ;;  %s7207_s15 = inlined_call_operand.<no memory space> [shape: f32[1,1], index: 15, kind: input, shape index: {}]   ;;  %s7208_s16 = inlined_call_operand.vmem [shape: f32[8,1], index: 16, kind: output, shape index: {}]  }
   0x1   :  { %7209 = sst [smem:[#allocation26_spill]] %s7192_s0  ;;  %v21_v0 = vstv %s7207_s15 }
   0x2   :  { %22 = vst [vmem:[#allocation3] sm:$0x1] %v21_v0 }
   0x3   :  { %23 = vsyncpa [#allocation5], 0 }
   0x4   :  { %24 = vsyncpa [#allocation7], 0 }
   0x5   :  { %25 = vsyncpa [#allocation10], 0 }
   0x6   :  { %26 = vsyncpa [#allocation13], 0 }
   0x7   :  { %27 = vsyncpa [#allocation16], 0  ;;  %s45_s25 = sshll.u32 %s7193_s1, 4  ;;  %s46_s25 = int_to_ptr.hbm [resolvable:$true] %s45_s25 }
   0x8   :  { %28 = vsyncpa [#allocation19], 0  ;;  %s6916_s26 = smov [#allocation6]   ;;  %s68_s15 = sshll.u32 %s7195_s3, 4  ;;  %s69_s15 = int_to_ptr.hbm [resolvable:$true] %s68_s15 }
   0x9   :  { %s47_s27 = sshll.u32 %s6916_s26, 4  ;;  %s6917_s30 = smov [#allocation9]   ;;  %s48_s27 = int_to_ptr.vmem [resolvable:$true] %s47_s27 }
   0xa   :  { %50 = dma.hbm_to_vmem [thread:$0]  %s46_s25, 64, %s48_s27, [#allocation7]  }
   0xb   :  { %s70_s0 = sshll.u32 %s6917_s30, 4  ;;  %s92_s19 = sshll.u32 %s7197_s5, 4  ;;  %s71_s0 = int_to_ptr.vmem [resolvable:$true] %s70_s0  ;;  %s93_s19 = int_to_ptr.hbm [resolvable:$true] %s92_s19 }
   0xc   :  { %s6918_s1 = smov 1152   ;;  %s6919_s20 = smov 72  }
   0xd   :  { %76 = dma.hbm_to_vmem [thread:$0]  %s69_s15, 18432, %s71_s0, [#allocation10], %s6918_s1, %s6918_s1, %s6919_s20  }
   0xe   :  { %s6920_s21 = smov [#allocation12]   ;;  %s120_s24 = sshll.u32 %s7200_s8, 4  ;;  %s121_s24 = int_to_ptr.hbm [resolvable:$true] %s120_s24 }
   0xf   :  { %s94_s22 = sshll.u32 %s6920_s21, 4  ;;  %s6921_s25 = smov 64   ;;  %s95_s22 = int_to_ptr.vmem [resolvable:$true] %s94_s22 }
  0x10   :  { %s6922_s26 = smov 4   ;;  %s6923_s5 = smov [#allocation15]  }
  0x11   :  { %100 = dma.hbm_to_vmem [thread:$0]  %s93_s19, 18432, %s95_s22, [#allocation13], %s6921_s25, %s6921_s25, %s6922_s26  }
  0x12   :  { %s122_s27 = sshll.u32 %s6923_s5, 4  ;;  %s7210_s30 = sld [smem:[#allocation26_spill]]  ;;  %s123_s27 = int_to_ptr.vmem [resolvable:$true] %s122_s27 }
  0x13   :  { %128 = dma.hbm_to_vmem [thread:$0]  %s121_s24, 1024, %s123_s27, [#allocation16], %s6921_s25, %s6921_s25, %s6922_s26  }
  0x14   :  { %s55_s17 = sshll.u32 %s7194_s2, 4  ;;  %s6924_s18 = smov [#allocation4]   ;;  %s56_s17 = int_to_ptr.hbm [resolvable:$true] %s55_s17 }
  0x15   :  { %s36_s21 = sshll.u32 %s6924_s18, 4  ;;  %s6925_s19 = smov [#allocation8]   ;;  %s37_s21 = int_to_ptr.vmem [resolvable:$true] %s36_s21 }
  0x16   :  { %s57_s22 = sshll.u32 %s6925_s19, 4  ;;  %s82_s5 = sshll.u32 %s7196_s4, 4  ;;  %s58_s22 = int_to_ptr.vmem [resolvable:$true] %s57_s22  ;;  %s83_s5 = int_to_ptr.hbm [resolvable:$true] %s82_s5 }
  0x17   :  { %63 = dma.hbm_to_vmem [thread:$0]  %s56_s17, 18432, %s58_s22, [#allocation7], %s6918_s1, %s6918_s1, %s6919_s20  }
  0x18   :  { %s34_s15 = sshll.u32 %s7210_s30, 4  ;;  %s107_s2 = sshll.u32 %s7199_s7, 4  ;;  %s35_s15 = int_to_ptr.hbm [resolvable:$true] %s34_s15  ;;  %s108_s2 = int_to_ptr.hbm [resolvable:$true] %s107_s2 }
  0x19   :  { %39 = dma.hbm_to_vmem [thread:$0]  %s35_s15, 64, %s37_s21, [#allocation5]  }
  0x1a   :  { %s6926_s28 = smov [#allocation11]   ;;  %s6927_s30 = smov [#allocation14]  }
  0x1b   :  { %s84_s29 = sshll.u32 %s6926_s28, 4  ;;  %s109_s15 = sshll.u32 %s6927_s30, 4  ;;  %s85_s29 = int_to_ptr.vmem [resolvable:$true] %s84_s29  ;;  %s110_s15 = int_to_ptr.vmem [resolvable:$true] %s109_s15 }
  0x1c   :  { %87 = dma.hbm_to_vmem [thread:$0]  %s83_s5, 288, %s85_s29, [#allocation10]  }
  0x1d   :  { %s135_s4 = sshll.u32 %s7202_s10, 4  ;;  %s150_s7 = sshll.u32 %s7204_s12, 4  ;;  %s136_s4 = int_to_ptr.hbm [resolvable:$true] %s135_s4  ;;  %s151_s7 = int_to_ptr.hbm [resolvable:$true] %s150_s7 }
  0x1e   :  { %115 = dma.hbm_to_vmem [thread:$0]  %s108_s2, 1024, %s110_s15, [#allocation13], %s6921_s25, %s6921_s25, %s6922_s26  }
  0x1f   :  { %s6928_s17 = smov [#allocation17]   ;;  %s6929_s21 = smov [#allocation18]  }
  0x20   :  { %s137_s18 = sshll.u32 %s6928_s17, 4  ;;  %s152_s10 = sshll.u32 %s6929_s21, 4  ;;  %s138_s18 = int_to_ptr.vmem [resolvable:$true] %s137_s18  ;;  %s153_s10 = int_to_ptr.vmem [resolvable:$true] %s152_s10 }
  0x21   :  { %143 = dma.hbm_to_vmem [thread:$0]  %s136_s4, 1024, %s138_s18, [#allocation16], %s6921_s25, %s6921_s25, %s6922_s26  }
  0x22   :  { %158 = dma.hbm_to_vmem [thread:$0]  %s151_s7, 1024, %s153_s10, [#allocation19], %s6921_s25, %s6921_s25, %s6922_s26  }
  0x23   :  { %6904 = dma.done.wait [#allocation5], 64  }
  0x24   :  { %6905 = vsyncadd [#allocation5], 4294967232 }
  0x25   :  { %6906 = dma.done.wait [#allocation7], 18496  }
  0x26   :  { %6907 = vsyncadd [#allocation7], 4294948800 }
  0x27   :  { %6908 = dma.done.wait [#allocation10], 18720  }
  0x28   :  { %6909 = vsyncadd [#allocation10], 4294948576 }
  0x29   :  { %6910 = dma.done.wait [#allocation13], 19456  }
  0x2a   :  { %6911 = vsyncadd [#allocation13], 4294947840 }
  0x2b   :  { %6912 = dma.done.wait [#allocation16], 2048  }
  0x2c   :  { %6913 = vsyncadd [#allocation16], 4294965248 }
  0x2d   :  { %6914 = dma.done.wait [#allocation19], 1024  }
  0x2e   :  { %6915 = vsyncadd [#allocation19], 4294966272  ;;  %v4375_v1 = vld [vmem:[#allocation8 + $0x3f0] sm:$0xf]  ;;  %v6189_v2 = vld [vmem:[#allocation8 + $0x434] sm:$0xf0] }
  0x2f   :  { %v6188_v3 = vld [vmem:[#allocation8 + $0x3f4] sm:$0xf]  ;;  %v4376_v4 = vor.u32 %v6189_v2, %v4375_v1  ;;  %v4377_v5 = vld [vmem:[#allocation8 + $0x438] sm:$0xf0]  ;;  %v4439_v6 = vld [vmem:[#allocation9 + $0x3f0] sm:$0xf] }
  0x30   :  { %v6205_v7 = vld [vmem:[#allocation9 + $0x434] sm:$0xf0]  ;;  %v4380_v8 = vor.u32 %v6188_v3, %v4377_v5  ;;  %v6204_v10 = vld [vmem:[#allocation9 + $0x3f4] sm:$0xf]  ;;  %v4441_v11 = vld [vmem:[#allocation9 + $0x438] sm:$0xf0] }
  0x31   :  { %v4440_v9 = vor.u32 %v6205_v7, %v4439_v6  ;;  %v4367_v12 = vld [vmem:[#allocation8 + $0x360] sm:$0xf]  ;;  %303 = vmatpush.bf16.msra.mxu0 %v4376_v4  ;;  %v4444_v13 = vor.u32 %v6204_v10, %v4441_v11  ;;  %v6187_v14 = vld [vmem:[#allocation8 + $0x3a4] sm:$0xf0]  ;;  %v6186_v15 = vld [vmem:[#allocation8 + $0x364] sm:$0xf] }
  0x32   :  { %v4369_v16 = vld [vmem:[#allocation8 + $0x3a8] sm:$0xf0]  ;;  %316 = vmatpush.bf16.msra.mxu1 %v4380_v8  ;;  %v4368_v17 = vor.u32 %v6187_v14, %v4367_v12  ;;  %v4431_v19 = vld [vmem:[#allocation9 + $0x360] sm:$0xf]  ;;  %v6203_v20 = vld [vmem:[#allocation9 + $0x3a4] sm:$0xf0] }
  0x33   :  { %425 = vmatpush.bf16.msra.mxu2 %v4440_v9  ;;  %v4372_v18 = vor.u32 %v6186_v15, %v4369_v16  ;;  %v6202_v21 = vld [vmem:[#allocation9 + $0x364] sm:$0xf]  ;;  %438 = vmatpush.bf16.msra.mxu3 %v4444_v13  ;;  %v4432_v22 = vor.u32 %v6203_v20, %v4431_v19  ;;  %v4433_v23 = vld [vmem:[#allocation9 + $0x3a8] sm:$0xf0]  ;;  %v4359_v24 = vld [vmem:[#allocation8 + $0x2d0] sm:$0xf] }
  0x34   :  { %v6185_v25 = vld [vmem:[#allocation8 + $0x314] sm:$0xf0]  ;;  %v4436_v26 = vor.u32 %v6202_v21, %v4433_v23  ;;  %v6184_v27 = vld [vmem:[#allocation8 + $0x2d4] sm:$0xf]  ;;  %v4361_v28 = vld [vmem:[#allocation8 + $0x318] sm:$0xf0] }
  0x35   :  { %v4423_v29 = vld [vmem:[#allocation9 + $0x2d0] sm:$0xf]  ;;  %304 = vmatpush.bf16.msra.mxu0 %v4368_v17  ;;  %v4360_v30 = vor.u32 %v6185_v25, %v4359_v24  ;;  %v6201_v31 = vld [vmem:[#allocation9 + $0x314] sm:$0xf0]  ;;  %v6200_v32 = vld [vmem:[#allocation9 + $0x2d4] sm:$0xf]  ;;  %v4364_v34 = vor.u32 %v6184_v27, %v4361_v28 }
  0x36   :  { %v4425_v33 = vld [vmem:[#allocation9 + $0x318] sm:$0xf0]  ;;  %317 = vmatpush.bf16.msra.mxu1 %v4372_v18  ;;  %v4424_v35 = vor.u32 %v6201_v31, %v4423_v29  ;;  %v4351_v36 = vld [vmem:[#allocation8 + $0x240] sm:$0xf]  ;;  %v6183_v37 = vld [vmem:[#allocation8 + $0x284] sm:$0xf0] }
  0x37   :  { %426 = vmatpush.bf16.msra.mxu2 %v4432_v22  ;;  %v6182_v38 = vld [vmem:[#allocation8 + $0x244] sm:$0xf]  ;;  %439 = vmatpush.bf16.msra.mxu3 %v4436_v26  ;;  %v4428_v39 = vor.u32 %v6200_v32, %v4425_v33  ;;  %v4353_v40 = vld [vmem:[#allocation8 + $0x288] sm:$0xf0]  ;;  %v4415_v41 = vld [vmem:[#allocation9 + $0x240] sm:$0xf]  ;;  %v4352_v45 = vor.u32 %v6183_v37, %v4351_v36 }
  0x38   :  { %v6199_v42 = vld [vmem:[#allocation9 + $0x284] sm:$0xf0]  ;;  %v6198_v43 = vld [vmem:[#allocation9 + $0x244] sm:$0xf]  ;;  %v4417_v44 = vld [vmem:[#allocation9 + $0x288] sm:$0xf0]  ;;  %v4356_v46 = vor.u32 %v6182_v38, %v4353_v40 }
  0x39   :  { %305 = vmatpush.bf16.msra.mxu0 %v4360_v30  ;;  %v4416_v47 = vor.u32 %v6199_v42, %v4415_v41  ;;  %v4343_v48 = vld [vmem:[#allocation8 + $0x1b0] sm:$0xf]  ;;  %v6181_v49 = vld [vmem:[#allocation8 + $0x1f4] sm:$0xf0]  ;;  %v6180_v50 = vld [vmem:[#allocation8 + $0x1b4] sm:$0xf]  ;;  %v4420_v51 = vor.u32 %v6198_v43, %v4417_v44 }
  0x3a   :  { %318 = vmatpush.bf16.msra.mxu1 %v4364_v34  ;;  %v4345_v52 = vld [vmem:[#allocation8 + $0x1f8] sm:$0xf0]  ;;  %v4407_v53 = vld [vmem:[#allocation9 + $0x1b0] sm:$0xf]  ;;  %v6197_v54 = vld [vmem:[#allocation9 + $0x1f4] sm:$0xf0]  ;;  %v4344_v57 = vor.u32 %v6181_v49, %v4343_v48 }
  0x3b   :  { %427 = vmatpush.bf16.msra.mxu2 %v4424_v35  ;;  %440 = vmatpush.bf16.msra.mxu3 %v4428_v39  ;;  %v6196_v55 = vld [vmem:[#allocation9 + $0x1b4] sm:$0xf]  ;;  %v4409_v56 = vld [vmem:[#allocation9 + $0x1f8] sm:$0xf0]  ;;  %v4348_v58 = vor.u32 %v6180_v50, %v4345_v52  ;;  %v4408_v59 = vor.u32 %v6197_v54, %v4407_v53  ;;  %v4335_v60 = vld [vmem:[#allocation8 + $0x120] sm:$0xf] }
  0x3c   :  { %v6179_v61 = vld [vmem:[#allocation8 + $0x164] sm:$0xf0]  ;;  %v6178_v62 = vld [vmem:[#allocation8 + $0x124] sm:$0xf]  ;;  %v4412_v63 = vor.u32 %v6196_v55, %v4409_v56  ;;  %v4337_v0 = vld [vmem:[#allocation8 + $0x168] sm:$0xf0] }
  0x3d   :  { %306 = vmatpush.bf16.msra.mxu0 %v4352_v45  ;;  %v4399_v1 = vld [vmem:[#allocation9 + $0x120] sm:$0xf]  ;;  %v6195_v2 = vld [vmem:[#allocation9 + $0x164] sm:$0xf0]  ;;  %v6194_v3 = vld [vmem:[#allocation9 + $0x124] sm:$0xf]  ;;  %v4336_v5 = vor.u32 %v6179_v61, %v4335_v60  ;;  %v4340_v6 = vor.u32 %v6178_v62, %v4337_v0 }
  0x3e   :  { %319 = vmatpush.bf16.msra.mxu1 %v4356_v46  ;;  %v4401_v4 = vld [vmem:[#allocation9 + $0x168] sm:$0xf0]  ;;  %v4400_v7 = vor.u32 %v6195_v2, %v4399_v1  ;;  %v4327_v8 = vld [vmem:[#allocation8 + $0x90] sm:$0xf]  ;;  %v6177_v9 = vld [vmem:[#allocation8 + $0xd4] sm:$0xf0] }
  0x3f   :  { %428 = vmatpush.bf16.msra.mxu2 %v4416_v47  ;;  %441 = vmatpush.bf16.msra.mxu3 %v4420_v51  ;;  %v6176_v10 = vld [vmem:[#allocation8 + $0x94] sm:$0xf]  ;;  %v4404_v11 = vor.u32 %v6194_v3, %v4401_v4  ;;  %v4329_v12 = vld [vmem:[#allocation8 + $0xd8] sm:$0xf0]  ;;  %v4391_v13 = vld [vmem:[#allocation9 + $0x90] sm:$0xf]  ;;  %v4328_v17 = vor.u32 %v6177_v9, %v4327_v8 }
  0x40   :  { %v6193_v14 = vld [vmem:[#allocation9 + $0xd4] sm:$0xf0]  ;;  %v6192_v15 = vld [vmem:[#allocation9 + $0x94] sm:$0xf]  ;;  %v4393_v16 = vld [vmem:[#allocation9 + $0xd8] sm:$0xf0]  ;;  %v4332_v18 = vor.u32 %v6176_v10, %v4329_v12 }
  0x41   :  { %307 = vmatpush.bf16.msra.mxu0 %v4344_v57  ;;  %v4392_v19 = vor.u32 %v6193_v14, %v4391_v13  ;;  %v4319_v20 = vld [vmem:[#allocation8] sm:$0xf]  ;;  %v6175_v21 = vld [vmem:[#allocation8 + $0x44] sm:$0xf0]  ;;  %v6174_v22 = vld [vmem:[#allocation8 + $0x4] sm:$0xf]  ;;  %v4396_v23 = vor.u32 %v6192_v15, %v4393_v16 }
  0x42   :  { %320 = vmatpush.bf16.msra.mxu1 %v4348_v58  ;;  %v4321_v24 = vld [vmem:[#allocation8 + $0x48] sm:$0xf0]  ;;  %v4383_v25 = vld [vmem:[#allocation9] sm:$0xf]  ;;  %v6191_v26 = vld [vmem:[#allocation9 + $0x44] sm:$0xf0]  ;;  %v4320_v29 = vor.u32 %v6175_v21, %v4319_v20 }
  0x43   :  { %429 = vmatpush.bf16.msra.mxu2 %v4408_v59  ;;  %442 = vmatpush.bf16.msra.mxu3 %v4412_v63  ;;  %v6190_v27 = vld [vmem:[#allocation9 + $0x4] sm:$0xf]  ;;  %v4385_v28 = vld [vmem:[#allocation9 + $0x48] sm:$0xf0]  ;;  %v4324_v30 = vor.u32 %v6174_v22, %v4321_v24  ;;  %v4384_v31 = vor.u32 %v6191_v26, %v4383_v25  ;;  %v4567_v34 = vld [vmem:[#allocation8 + $0x3f8] sm:$0xf] }
  0x44   :  { %v4388_v32 = vor.u32 %v6190_v27, %v4385_v28  ;;  %v6213_v33 = vld [vmem:[#allocation12 + $0x38] sm:$0xff]  ;;  %v6237_v35 = vld [vmem:[#allocation8 + $0x43c] sm:$0xf0]  ;;  %v6236_v37 = vld [vmem:[#allocation8 + $0x3fc] sm:$0xf]  ;;  %vm4305_vm3 = vcmask 7168  }
  0x45   :  { %308 = vmatpush.bf16.msra.mxu0 %v4336_v5  ;;  %v6221_v36 = vld [vmem:[#allocation12 + $0x78] sm:$0xff]  ;;  %v4569_v38 = vld [vmem:[#allocation8 + $0x440] sm:$0xf0]  ;;  %v7069_v39 = vld [vmem:[#allocation4] sm:$0xf]  ;;  %v4568_v43 = vor.u32 %v6237_v35, %v4567_v34 }
  0x46   :  { %321 = vmatpush.bf16.msra.mxu1 %v4340_v6  ;;  %v6212_v40 = vld [vmem:[#allocation12 + $0x30] sm:$0xff]  ;;  %v6235_v44 = vld [vmem:[#allocation8 + $0x3ac] sm:$0xf0]  ;;  %v4572_v45 = vor.u32 %v6236_v37, %v4569_v38  ;;  %v6234_v46 = vld [vmem:[#allocation8 + $0x36c] sm:$0xf] }
  0x47   :  { %430 = vmatpush.bf16.msra.mxu2 %v4400_v7  ;;  %443 = vmatpush.bf16.msra.mxu3 %v4404_v11  ;;  %v4559_v41 = vld [vmem:[#allocation8 + $0x368] sm:$0xf]  ;;  %v4561_v47 = vld [vmem:[#allocation8 + $0x3b0] sm:$0xf0]  ;;  %v6211_v49 = vld [vmem:[#allocation12 + $0x28] sm:$0xff] }
  0x48   :  { %v6220_v42 = vld [vmem:[#allocation12 + $0x70] sm:$0xff]  ;;  %v4560_v48 = vor.u32 %v6235_v44, %v4559_v41  ;;  %v4564_v50 = vor.u32 %v6234_v46, %v4561_v47  ;;  %v4551_v51 = vld [vmem:[#allocation8 + $0x2d8] sm:$0xf]  ;;  %v6232_v54 = vld [vmem:[#allocation8 + $0x2dc] sm:$0xf] }
  0x49   :  { %309 = vmatpush.bf16.msra.mxu0 %v4328_v17  ;;  %v6233_v52 = vld [vmem:[#allocation8 + $0x31c] sm:$0xf0]  ;;  %v4553_v55 = vld [vmem:[#allocation8 + $0x320] sm:$0xf0]  ;;  %v6210_v57 = vld [vmem:[#allocation12 + $0x20] sm:$0xff] }
  0x4a   :  { %322 = vmatpush.bf16.msra.mxu1 %v4332_v18  ;;  %v6219_v53 = vld [vmem:[#allocation12 + $0x68] sm:$0xff]  ;;  %v4552_v56 = vor.u32 %v6233_v52, %v4551_v51  ;;  %v4556_v58 = vor.u32 %v6232_v54, %v4553_v55  ;;  %v4543_v59 = vld [vmem:[#allocation8 + $0x248] sm:$0xf]  ;;  %v6231_v60 = vld [vmem:[#allocation8 + $0x28c] sm:$0xf0] }
  0x4b   :  { %431 = vmatpush.bf16.msra.mxu2 %v4392_v19  ;;  %444 = vmatpush.bf16.msra.mxu3 %v4396_v23  ;;  %v6218_v61 = vld [vmem:[#allocation12 + $0x60] sm:$0xff]  ;;  %v6230_v62 = vld [vmem:[#allocation8 + $0x24c] sm:$0xf]  ;;  %v4544_v0 = vor.u32 %v6231_v60, %v4543_v59  ;;  %v6208_v4 = vld [vmem:[#allocation12 + $0x10] sm:$0xff] }
  0x4c   :  { %v4545_v63 = vld [vmem:[#allocation8 + $0x290] sm:$0xf0]  ;;  %v6209_v1 = vld [vmem:[#allocation12 + $0x18] sm:$0xff]  ;;  %v6216_v5 = vld [vmem:[#allocation12 + $0x50] sm:$0xff] }
  0x4d   :  { %310 = vmatpush.bf16.msra.mxu0 %v4320_v29  ;;  %v4548_v2 = vor.u32 %v6230_v62, %v4545_v63  ;;  %v6217_v3 = vld [vmem:[#allocation12 + $0x58] sm:$0xff]  ;;  %v6207_v6 = vld [vmem:[#allocation12 + $0x8] sm:$0xff]  ;;  %v6206_v8 = vld [vmem:[#allocation12] sm:$0xff] }
  0x4e   :  { %323 = vmatpush.bf16.msra.mxu1 %v4324_v30  ;;  %v6215_v7 = vld [vmem:[#allocation12 + $0x48] sm:$0xff]  ;;  %v6214_v9 = vld [vmem:[#allocation12 + $0x40] sm:$0xff]  ;;  %v4633_v14 = vld [vmem:[#allocation9 + $0x440] sm:$0xf0] }
  0x4f   :  { %432 = vmatpush.bf16.msra.mxu2 %v4384_v31  ;;  %445 = vmatpush.bf16.msra.mxu3 %v4388_v32  ;;  %v4631_v10 = vld [vmem:[#allocation9 + $0x3f8] sm:$0xf]  ;;  %v6253_v11 = vld [vmem:[#allocation9 + $0x43c] sm:$0xf0]  ;;  %v6252_v12 = vld [vmem:[#allocation9 + $0x3fc] sm:$0xf] }
  0x50   :  { %311 = vmatmul.bf16.vlgmr.msra.gmra.mxu0 %v7069_v39  ;;  %v4632_v13 = vor.u32 %v6253_v11, %v4631_v10  ;;  %v4636_v15 = vor.u32 %v6252_v12, %v4633_v14  ;;  %v4535_v16 = vld [vmem:[#allocation8 + $0x1b8] sm:$0xf]  ;;  %v6229_v17 = vld [vmem:[#allocation8 + $0x1fc] sm:$0xf0]  ;;  %v6228_v18 = vld [vmem:[#allocation8 + $0x1bc] sm:$0xf] }
  0x51   :  { %593 = vmatpush.bf16.msrb.mxu0 %v6213_v33  ;;  %324 = vmatmul.bf16.vlgmr.msra.gmra.mxu1 %v7069_v39  ;;  %v4536_v19 = vor.u32 %v6229_v17, %v4535_v16  ;;  %v4537_v20 = vld [vmem:[#allocation8 + $0x200] sm:$0xf0]  ;;  %v4623_v21 = vld [vmem:[#allocation9 + $0x368] sm:$0xf]  ;;  %v6251_v22 = vld [vmem:[#allocation9 + $0x3ac] sm:$0xf0] }
  0x52   :  { %606 = vmatpush.bf16.msrb.mxu1 %v6221_v36  ;;  %433 = vmatmul.bf16.vlgmr.msra.gmra.mxu2 %v7069_v39  ;;  %v4540_v23 = vor.u32 %v6228_v18, %v4537_v20  ;;  %v4624_v24 = vor.u32 %v6251_v22, %v4623_v21  ;;  %v6250_v25 = vld [vmem:[#allocation9 + $0x36c] sm:$0xf]  ;;  %v4625_v26 = vld [vmem:[#allocation9 + $0x3b0] sm:$0xf0]  ;;  %v4527_v28 = vld [vmem:[#allocation8 + $0x128] sm:$0xf] }
  0x53   :  { %446 = vmatmul.bf16.vlgmr.msra.gmra.mxu3 %v7069_v39  ;;  %716 = vmatpush.bf16.msrb.mxu2 %v4568_v43  ;;  %v4628_v27 = vor.u32 %v6250_v25, %v4625_v26  ;;  %v6227_v29 = vld [vmem:[#allocation8 + $0x16c] sm:$0xf0]  ;;  %v6226_v30 = vld [vmem:[#allocation8 + $0x12c] sm:$0xf]  ;;  %v4529_v32 = vld [vmem:[#allocation8 + $0x170] sm:$0xf0] }
  0x54   :  { %729 = vmatpush.bf16.msrb.mxu3 %v4572_v45  ;;  %v4528_v31 = vor.u32 %v6227_v29, %v4527_v28  ;;  %v4532_v33 = vor.u32 %v6226_v30, %v4529_v32  ;;  %v4615_v34 = vld [vmem:[#allocation9 + $0x2d8] sm:$0xf]  ;;  %v6249_v35 = vld [vmem:[#allocation9 + $0x31c] sm:$0xf0]  ;;  %v6248_v36 = vld [vmem:[#allocation9 + $0x2dc] sm:$0xf] }
  0x55   :  { %594 = vmatpush.bf16.msrb.mxu0 %v6212_v40  ;;  %v4616_v37 = vor.u32 %v6249_v35, %v4615_v34  ;;  %v4617_v38 = vld [vmem:[#allocation9 + $0x320] sm:$0xf0]  ;;  %v4519_v41 = vld [vmem:[#allocation8 + $0x98] sm:$0xf]  ;;  %v6224_v44 = vld [vmem:[#allocation8 + $0x9c] sm:$0xf] }
  0x56   :  { %607 = vmatpush.bf16.msrb.mxu1 %v6220_v42  ;;  %v4620_v40 = vor.u32 %v6248_v36, %v4617_v38  ;;  %v6225_v42 = vld [vmem:[#allocation8 + $0xdc] sm:$0xf0]  ;;  %v4521_v45 = vld [vmem:[#allocation8 + $0xe0] sm:$0xf0]  ;;  %v4607_v47 = vld [vmem:[#allocation9 + $0x248] sm:$0xf] }
  0x57   :  { %717 = vmatpush.bf16.msrb.mxu2 %v4560_v48  ;;  %v4520_v43 = vor.u32 %v6225_v42, %v4519_v41  ;;  %v4524_v46 = vor.u32 %v6224_v44, %v4521_v45  ;;  %v6247_v48 = vld [vmem:[#allocation9 + $0x28c] sm:$0xf0]  ;;  %v4609_v51 = vld [vmem:[#allocation9 + $0x290] sm:$0xf0]  ;;  %v6222_v55 = vld [vmem:[#allocation8 + $0xc] sm:$0xf] }
  0x58   :  { %730 = vmatpush.bf16.msrb.mxu3 %v4564_v50  ;;  %v4608_v50 = vor.u32 %v6247_v48, %v4607_v47  ;;  %v6223_v54 = vld [vmem:[#allocation8 + $0x4c] sm:$0xf0]  ;;  %v4599_v59 = vld [vmem:[#allocation9 + $0x1b8] sm:$0xf]  ;;  %v6245_v60 = vld [vmem:[#allocation9 + $0x1fc] sm:$0xf0] }
  0x59   :  { %595 = vmatpush.bf16.msrb.mxu0 %v6211_v49  ;;  %v6246_v49 = vld [vmem:[#allocation9 + $0x24c] sm:$0xf]  ;;  %v4600_v62 = vor.u32 %v6245_v60, %v4599_v59  ;;  %v4601_v63 = vld [vmem:[#allocation9 + $0x200] sm:$0xf0]  ;;  %v6239_v14 = vld [vmem:[#allocation9 + $0x4c] sm:$0xf0] }
  0x5a   :  { %608 = vmatpush.bf16.msrb.mxu1 %v6219_v53  ;;  %v4612_v52 = vor.u32 %v6246_v49, %v4609_v51  ;;  %v4511_v53 = vld [vmem:[#allocation8 + $0x8] sm:$0xf]  ;;  %v4585_v10 = vld [vmem:[#allocation9 + $0xe0] sm:$0xf0]  ;;  %v4577_v16 = vld [vmem:[#allocation9 + $0x50] sm:$0xf0] }
  0x5b   :  { %718 = vmatpush.bf16.msrb.mxu2 %v4552_v56  ;;  %v4512_v56 = vor.u32 %v6223_v54, %v4511_v53  ;;  %v6261_v21 = vld [vmem:[#allocation12 + $0xb8] sm:$0xff]  ;;  %v6268_v25 = vld [vmem:[#allocation12 + $0xf0] sm:$0xff]  ;;  %v6259_v29 = vld [vmem:[#allocation12 + $0xa8] sm:$0xff] }
  0x5c   :  { %731 = vmatpush.bf16.msrb.mxu3 %v4556_v58  ;;  %v6269_v22 = vld [vmem:[#allocation12 + $0xf8] sm:$0xff]  ;;  %v6267_v30 = vld [vmem:[#allocation12 + $0xe8] sm:$0xff]  ;;  %v6258_v38 = vld [vmem:[#allocation12 + $0xa0] sm:$0xff] }
  0x5d   :  { %596 = vmatpush.bf16.msrb.mxu0 %v6210_v57  ;;  %v4513_v57 = vld [vmem:[#allocation8 + $0x50] sm:$0xf0]  ;;  %v6265_v47 = vld [vmem:[#allocation12 + $0xd8] sm:$0xff]  ;;  %v6256_v49 = vld [vmem:[#allocation12 + $0x90] sm:$0xff] }
  0x5e   :  { %609 = vmatpush.bf16.msrb.mxu1 %v6218_v61  ;;  %v4516_v58 = vor.u32 %v6222_v55, %v4513_v57  ;;  %v6244_v61 = vld [vmem:[#allocation9 + $0x1bc] sm:$0xf]  ;;  %v4759_v53 = vld [vmem:[#allocation8 + $0x400] sm:$0xf]  ;;  %v6285_v54 = vld [vmem:[#allocation8 + $0x444] sm:$0xf0] }
  0x5f   :  { %719 = vmatpush.bf16.msrb.mxu2 %v4544_v0  ;;  %v4604_v0 = vor.u32 %v6244_v61, %v4601_v63  ;;  %v6255_v51 = vld [vmem:[#allocation12 + $0x88] sm:$0xff]  ;;  %v6284_v55 = vld [vmem:[#allocation8 + $0x404] sm:$0xf]  ;;  %v4761_v57 = vld [vmem:[#allocation8 + $0x448] sm:$0xf0] }
  0x60   :  { %732 = vmatpush.bf16.msrb.mxu3 %v4548_v2  ;;  %v6243_v2 = vld [vmem:[#allocation9 + $0x16c] sm:$0xf0]  ;;  %v4823_v61 = vld [vmem:[#allocation9 + $0x400] sm:$0xf]  ;;  %v6301_v63 = vld [vmem:[#allocation9 + $0x444] sm:$0xf0] }
  0x61   :  { %597 = vmatpush.bf16.msrb.mxu0 %v6209_v1  ;;  %v4591_v1 = vld [vmem:[#allocation9 + $0x128] sm:$0xf]  ;;  %v6254_v59 = vld [vmem:[#allocation12 + $0x80] sm:$0xff] }
  0x62   :  { %610 = vmatpush.bf16.msrb.mxu1 %v6217_v3  ;;  %v6242_v3 = vld [vmem:[#allocation9 + $0x12c] sm:$0xf]  ;;  %v6262_v60 = vld [vmem:[#allocation12 + $0xc0] sm:$0xff] }
  0x63   :  { %720 = vmatpush.bf16.msrb.mxu2 %v4536_v19 }
  0x64   :  { %733 = vmatpush.bf16.msrb.mxu3 %v4540_v23  ;;  %v453_v23 = vld [vmem:[#allocation11] sm:$0x3] }
  0x65   :  { %598 = vmatpush.bf16.msrb.mxu0 %v6208_v4  ;;  %v4592_v4 = vor.u32 %v6243_v2, %v4591_v1  ;;  %v455_v26 = vperm.slane %v453_v23, 0  ;;  %v456_v28 = vperm.slane %v453_v23, 1  ;;  %v4825_v1 = vld [vmem:[#allocation9 + $0x448] sm:$0xf0]  ;;  %v4807_v23 = vld [vmem:[#allocation9 + $0x2e0] sm:$0xf] }
  0x66   :  { %611 = vmatpush.bf16.msrb.mxu1 %v6216_v5  ;;  %v4593_v5 = vld [vmem:[#allocation9 + $0x170] sm:$0xf0] }
  0x67   :  { %721 = vmatpush.bf16.msrb.mxu2 %v4528_v31 }
  0x68   :  { %734 = vmatpush.bf16.msrb.mxu3 %v4532_v33 }
  0x69   :  { %599 = vmatpush.bf16.msrb.mxu0 %v6207_v6  ;;  %v4596_v6 = vor.u32 %v6242_v3, %v4593_v5  ;;  %v4824_v3 = vor.u32 %v6301_v63, %v4823_v61  ;;  %v4751_v5 = vld [vmem:[#allocation8 + $0x370] sm:$0xf]  ;;  %v6291_v63 = vld [vmem:[#allocation9 + $0x174] sm:$0xf0] }
  0x6a   :  { %612 = vmatpush.bf16.msrb.mxu1 %v6215_v7  ;;  %v4583_v7 = vld [vmem:[#allocation9 + $0x98] sm:$0xf]  ;;  %v4783_v61 = vld [vmem:[#allocation9 + $0x130] sm:$0xf] }
  0x6b   :  { %722 = vmatpush.bf16.msrb.mxu2 %v4520_v43 }
  0x6c   :  { %735 = vmatpush.bf16.msrb.mxu3 %v4524_v46  ;;  %v6257_v46 = vld [vmem:[#allocation12 + $0x98] sm:$0xff] }
  0x6d   :  { %600 = vmatpush.bf16.msrb.mxu0 %v6206_v8  ;;  %v6241_v8 = vld [vmem:[#allocation9 + $0xdc] sm:$0xf0] }
  0x6e   :  { %613 = vmatpush.bf16.msrb.mxu1 %v6214_v9  ;;  %v6240_v9 = vld [vmem:[#allocation9 + $0x9c] sm:$0xf]  ;;  %v4584_v11 = vor.u32 %v6241_v8, %v4583_v7  ;;  %v6282_v7 = vld [vmem:[#allocation8 + $0x374] sm:$0xf] }
  0x6f   :  { %723 = vmatpush.bf16.msrb.mxu2 %v4512_v56  ;;  %v4588_v12 = vor.u32 %v6240_v9, %v4585_v10  ;;  %v4760_v56 = vor.u32 %v6285_v54, %v4759_v53  ;;  %v4753_v9 = vld [vmem:[#allocation8 + $0x3b8] sm:$0xf0]  ;;  %v4815_v10 = vld [vmem:[#allocation9 + $0x370] sm:$0xf]  ;;  %v4793_v54 = vld [vmem:[#allocation9 + $0x208] sm:$0xf0] }
  0x70   :  { %736 = vmatpush.bf16.msrb.mxu3 %v4516_v58  ;;  %v4764_v58 = vor.u32 %v6284_v55, %v4761_v57  ;;  %v6275_v57 = vld [vmem:[#allocation8 + $0x174] sm:$0xf0] }
  0x71   :  { %838 = vmatpush.bf16.msra.mxu0 %v4632_v13  ;;  %v4575_v13 = vld [vmem:[#allocation9 + $0x8] sm:$0xf] }
  0x72   :  { %851 = vmatpush.bf16.msra.mxu1 %v4636_v15  ;;  %724 = vmatmul.bf16.vlgmr.msrb.gmra.mxu2 %v7069_v39  ;;  %v6238_v15 = vld [vmem:[#allocation9 + $0xc] sm:$0xf]  ;;  %v4576_v17 = vor.u32 %v6239_v14, %v4575_v13  ;;  %v6298_v14 = vld [vmem:[#allocation9 + $0x374] sm:$0xf] }
  0x73   :  { %737 = vmatmul.bf16.vlgmr.msrb.gmra.mxu3 %v7069_v39  ;;  %v4580_v18 = vor.u32 %v6238_v15, %v4577_v16  ;;  %1006 = vmatpush.bf16.msra.mxu2 %v6261_v21  ;;  %v4817_v15 = vld [vmem:[#allocation9 + $0x3b8] sm:$0xf0]  ;;  %v4745_v21 = vld [vmem:[#allocation8 + $0x328] sm:$0xf0] }
  0x74   :  { %1019 = vmatpush.bf16.msra.mxu3 %v6269_v22  ;;  %v4820_v16 = vor.u32 %v6298_v14, %v4817_v15  ;;  %v6288_v14 = vld [vmem:[#allocation9 + $0xa4] sm:$0xf]  ;;  %v4777_v15 = vld [vmem:[#allocation9 + $0xe8] sm:$0xf0] }
  0x75   :  { %839 = vmatpush.bf16.msra.mxu0 %v4624_v24  ;;  %v6260_v24 = vld [vmem:[#allocation12 + $0xb0] sm:$0xff] }
  0x76   :  { %852 = vmatpush.bf16.msra.mxu1 %v4628_v27 }
  0x77   :  { %1007 = vmatpush.bf16.msra.mxu2 %v6260_v24  ;;  %v6297_v24 = vld [vmem:[#allocation9 + $0x324] sm:$0xf0] }
  0x78   :  { %1020 = vmatpush.bf16.msra.mxu3 %v6268_v25  ;;  %v6296_v25 = vld [vmem:[#allocation9 + $0x2e4] sm:$0xf] }
  0x79   :  { %840 = vmatpush.bf16.msra.mxu0 %v4616_v37 }
  0x7a   :  { %853 = vmatpush.bf16.msra.mxu1 %v4620_v40  ;;  %v6266_v40 = vld [vmem:[#allocation12 + $0xe0] sm:$0xff] }
  0x7b   :  { %1008 = vmatpush.bf16.msra.mxu2 %v6259_v29 }
  0x7c   :  { %1021 = vmatpush.bf16.msra.mxu3 %v6267_v30 }
  0x7d   :  { %841 = vmatpush.bf16.msra.mxu0 %v4608_v50  ;;  %v6264_v50 = vld [vmem:[#allocation12 + $0xd0] sm:$0xff] }
  0x7e   :  { %854 = vmatpush.bf16.msra.mxu1 %v4612_v52  ;;  %v6263_v52 = vld [vmem:[#allocation12 + $0xc8] sm:$0xff] }
  0x7f   :  { %1009 = vmatpush.bf16.msra.mxu2 %v6258_v38  ;;  %v6295_v38 = vld [vmem:[#allocation9 + $0x294] sm:$0xf0] }
  0x80   :  { %1022 = vmatpush.bf16.msra.mxu3 %v6266_v40  ;;  %v6294_v40 = vld [vmem:[#allocation9 + $0x254] sm:$0xf] }
  0x81   :  { %842 = vmatpush.bf16.msra.mxu0 %v4600_v62 }
  0x82   :  { %855 = vmatpush.bf16.msra.mxu1 %v4604_v0  ;;  %v6300_v0 = vld [vmem:[#allocation9 + $0x404] sm:$0xf] }
  0x83   :  { %1010 = vmatpush.bf16.msra.mxu2 %v6257_v46  ;;  %v6276_v46 = vld [vmem:[#allocation8 + $0x1c4] sm:$0xf] }
  0x84   :  { %1023 = vmatpush.bf16.msra.mxu3 %v6265_v47 }
  0x85   :  { %843 = vmatpush.bf16.msra.mxu0 %v4592_v4  ;;  %v4828_v4 = vor.u32 %v6300_v0, %v4825_v1  ;;  %v4784_v1 = vor.u32 %v6291_v63, %v4783_v61 }
  0x86   :  { %856 = vmatpush.bf16.msra.mxu1 %v4596_v6  ;;  %v6283_v6 = vld [vmem:[#allocation8 + $0x3b4] sm:$0xf0] }
  0x87   :  { %1011 = vmatpush.bf16.msra.mxu2 %v6256_v49  ;;  %v4752_v8 = vor.u32 %v6283_v6, %v4751_v5  ;;  %v4711_v5 = vld [vmem:[#allocation8 + $0xa0] sm:$0xf] }
  0x88   :  { %1024 = vmatpush.bf16.msra.mxu3 %v6264_v50  ;;  %v4791_v50 = vld [vmem:[#allocation9 + $0x1c0] sm:$0xf] }
  0x89   :  { %844 = vmatpush.bf16.msra.mxu0 %v4584_v11  ;;  %v6299_v11 = vld [vmem:[#allocation9 + $0x3b4] sm:$0xf0] }
  0x8a   :  { %857 = vmatpush.bf16.msra.mxu1 %v4588_v12  ;;  %v4756_v12 = vor.u32 %v6282_v7, %v4753_v9  ;;  %v4816_v13 = vor.u32 %v6299_v11, %v4815_v10  ;;  %v6273_v7 = vld [vmem:[#allocation8 + $0xe4] sm:$0xf0]  ;;  %v4713_v9 = vld [vmem:[#allocation8 + $0xe8] sm:$0xf0] }
  0x8b   :  { %1012 = vmatpush.bf16.msra.mxu2 %v6255_v51  ;;  %v6293_v51 = vld [vmem:[#allocation9 + $0x204] sm:$0xf0]  ;;  %v4712_v10 = vor.u32 %v6273_v7, %v4711_v5  ;;  %v6330_v5 = vld [vmem:[#allocation8 + $0x37c] sm:$0xf]  ;;  %v4945_v7 = vld [vmem:[#allocation8 + $0x3c0] sm:$0xf0] }
  0x8c   :  { %1025 = vmatpush.bf16.msra.mxu3 %v6263_v52  ;;  %v6292_v52 = vld [vmem:[#allocation9 + $0x1c4] sm:$0xf]  ;;  %v4792_v53 = vor.u32 %v6293_v51, %v4791_v50  ;;  %v6306_v50 = vld [vmem:[#allocation12 + $0x120] sm:$0xff]  ;;  %v4951_v51 = vld [vmem:[#allocation8 + $0x408] sm:$0xf] }
  0x8d   :  { %845 = vmatpush.bf16.msra.mxu0 %v4576_v17  ;;  %v4743_v17 = vld [vmem:[#allocation8 + $0x2e0] sm:$0xf]  ;;  %v4796_v55 = vor.u32 %v6292_v52, %v4793_v54  ;;  %v6333_v52 = vld [vmem:[#allocation8 + $0x44c] sm:$0xf0] }
  0x8e   :  { %858 = vmatpush.bf16.msra.mxu1 %v4580_v18  ;;  %v6281_v18 = vld [vmem:[#allocation8 + $0x324] sm:$0xf0]  ;;  %v6314_v54 = vld [vmem:[#allocation12 + $0x160] sm:$0xff] }
  0x8f   :  { %1013 = vmatpush.bf16.msra.mxu2 %v6254_v59 }
  0x90   :  { %1026 = vmatpush.bf16.msra.mxu3 %v6262_v60  ;;  %v4721_v60 = vld [vmem:[#allocation8 + $0x178] sm:$0xf0] }
  0x93   :  { %1253 = vmatpush.bf16.msrb.mxu2 %v4824_v3  ;;  %v6290_v3 = vld [vmem:[#allocation9 + $0x134] sm:$0xf] }
  0x94   :  { %1266 = vmatpush.bf16.msrb.mxu3 %v4828_v4  ;;  %v4785_v4 = vld [vmem:[#allocation9 + $0x178] sm:$0xf0] }
  0x95   :  { %v4788_v6 = vor.u32 %v6290_v3, %v4785_v4  ;;  %v4943_v3 = vld [vmem:[#allocation8 + $0x378] sm:$0xf]  ;;  %v6331_v4 = vld [vmem:[#allocation8 + $0x3bc] sm:$0xf0] }
  0x97   :  { %1254 = vmatpush.bf16.msrb.mxu2 %v4816_v13  ;;  %v6289_v13 = vld [vmem:[#allocation9 + $0xe4] sm:$0xf0] }
  0x98   :  { %1267 = vmatpush.bf16.msrb.mxu3 %v4820_v16  ;;  %v4703_v16 = vld [vmem:[#allocation8 + $0x10] sm:$0xf] }
  0xcd   :  { %v312_v19 = vpop.f32.mrf.mxu0 }
  0xce   :  { %v325_v20 = vpop.f32.mrf.mxu1 }
  0xd5   :  { %v434_v27 = vpop.f32.mrf.mxu2  ;;  %v314_v33 = vpop.f32.mrf.mxu0 }
  0xd6   :  { %v451_v31 = vmax.f32 %v312_v19, %v434_v27  ;;  %v447_v32 = vpop.f32.mrf.mxu3  ;;  %v327_v35 = vpop.f32.mrf.mxu1  ;;  %v6280_v19 = vld [vmem:[#allocation8 + $0x2e4] sm:$0xf]  ;;  %v4808_v27 = vor.u32 %v6297_v24, %v4807_v23  ;;  %v4767_v23 = vld [vmem:[#allocation9 + $0x10] sm:$0xf] }
  0xd7   :  { %v452_v34 = vmax.f32 %v325_v20, %v447_v32  ;;  %v4744_v20 = vor.u32 %v6281_v18, %v4743_v17  ;;  %v4748_v22 = vor.u32 %v6280_v19, %v4745_v21  ;;  %v6279_v32 = vld [vmem:[#allocation8 + $0x294] sm:$0xf0]  ;;  %v4737_v35 = vld [vmem:[#allocation8 + $0x298] sm:$0xf0]  ;;  %v6270_v21 = vld [vmem:[#allocation8 + $0x14] sm:$0xf] }
  0xd8   :  { %v459_v36 = vadd.f32 %v455_v26, %v451_v31  ;;  %v4735_v31 = vld [vmem:[#allocation8 + $0x250] sm:$0xf]  ;;  %1255 = vmatpush.bf16.msrb.mxu2 %v4808_v27  ;;  %v6271_v17 = vld [vmem:[#allocation8 + $0x54] sm:$0xf0]  ;;  %v6286_v27 = vld [vmem:[#allocation9 + $0x14] sm:$0xf] }
  0xd9   :  { %v460_v37 = vadd.f32 %v456_v28, %v452_v34  ;;  %v4809_v28 = vld [vmem:[#allocation9 + $0x328] sm:$0xf0]  ;;  %v4736_v33 = vor.u32 %v6279_v32, %v4735_v31  ;;  %v6278_v34 = vld [vmem:[#allocation8 + $0x254] sm:$0xf] }
  0xda   :  { %v461_v41 = vmax.f32 %v459_v36, 0.0  ;;  %v4812_v30 = vor.u32 %v6296_v25, %v4809_v28  ;;  %v4740_v36 = vor.u32 %v6278_v34, %v4737_v35  ;;  %v4704_v25 = vor.u32 %v6271_v17, %v4703_v16  ;;  %v4769_v28 = vld [vmem:[#allocation9 + $0x58] sm:$0xf0]  ;;  %v6309_v35 = vld [vmem:[#allocation12 + $0x138] sm:$0xff] }
  0xdb   :  { %v462_v42 = vmax.f32 %v460_v37, 0.0  ;;  %v4799_v37 = vld [vmem:[#allocation9 + $0x250] sm:$0xf]  ;;  %v4772_v32 = vor.u32 %v6286_v27, %v4769_v28  ;;  %v6303_v17 = vld [vmem:[#allocation12 + $0x108] sm:$0xff]  ;;  %v6348_v28 = vld [vmem:[#allocation9 + $0x40c] sm:$0xf] }
  0xdc   :  { %v463_v43 = vpack.c.bf16 %v461_v41, %v461_v41  ;;  %1268 = vmatpush.bf16.msrb.mxu3 %v4812_v30  ;;  %v4800_v41 = vor.u32 %v6295_v38, %v4799_v37  ;;  %v866_v37 = vld [vmem:[#allocation11 + $0x2] sm:$0x3]  ;;  %v6349_v27 = vld [vmem:[#allocation9 + $0x44c] sm:$0xf0] }
  0xdd   :  { %v464_v44 = vpack.c.bf16 %v462_v42, %v462_v42  ;;  %v436_v45 = vpop.f32.mrf.mxu2  ;;  %v4801_v42 = vld [vmem:[#allocation9 + $0x298] sm:$0xf0]  ;;  %v6308_v38 = vld [vmem:[#allocation12 + $0x130] sm:$0xff] }
  0xde   :  { %v449_v48 = vpop.f32.mrf.mxu3  ;;  %601 = vmatmul.bf16.vlgmr.msrb.gmra.mxu0 %v463_v43  ;;  %v4804_v43 = vor.u32 %v6294_v40, %v4801_v42  ;;  %v6277_v45 = vld [vmem:[#allocation8 + $0x204] sm:$0xf0]  ;;  %1256 = vmatpush.bf16.msrb.mxu2 %v4800_v41  ;;  %v868_v41 = vperm.slane %v866_v37, 0 }
  0xdf   :  { %614 = vmatmul.bf16.vlgmr.msrb.gmra.mxu1 %v464_v44  ;;  %1131 = vmatpush.bf16.msrb.mxu0 %v4760_v56  ;;  %v4727_v44 = vld [vmem:[#allocation8 + $0x1c0] sm:$0xf]  ;;  %v4729_v48 = vld [vmem:[#allocation8 + $0x208] sm:$0xf0]  ;;  %v4719_v56 = vld [vmem:[#allocation8 + $0x130] sm:$0xf] }
  0xe0   :  { %1144 = vmatpush.bf16.msrb.mxu1 %v4764_v58  ;;  %v4728_v47 = vor.u32 %v6277_v45, %v4727_v44  ;;  %1269 = vmatpush.bf16.msrb.mxu3 %v4804_v43  ;;  %v4732_v49 = vor.u32 %v6276_v46, %v4729_v48  ;;  %v6274_v58 = vld [vmem:[#allocation8 + $0x134] sm:$0xf]  ;;  %v4720_v59 = vor.u32 %v6275_v57, %v4719_v56  ;;  %v6316_v40 = vld [vmem:[#allocation12 + $0x170] sm:$0xff]  ;;  %v869_v43 = vperm.slane %v866_v37, 1  ;;  %v6307_v44 = vld [vmem:[#allocation12 + $0x128] sm:$0xff] }
  0xe1   :  { %v4724_v0 = vor.u32 %v6274_v58, %v4721_v60  ;;  %v6315_v45 = vld [vmem:[#allocation12 + $0x168] sm:$0xff]  ;;  %v4953_v56 = vld [vmem:[#allocation8 + $0x450] sm:$0xf0]  ;;  %v6324_v37 = vld [vmem:[#allocation8 + $0x1cc] sm:$0xf] }
  0xe2   :  { %1257 = vmatpush.bf16.msrb.mxu2 %v4792_v53 }
  0xe3   :  { %1132 = vmatpush.bf16.msrb.mxu0 %v4752_v8  ;;  %v6272_v8 = vld [vmem:[#allocation8 + $0xa4] sm:$0xf] }
  0xe4   :  { %1145 = vmatpush.bf16.msrb.mxu1 %v4756_v12  ;;  %1270 = vmatpush.bf16.msrb.mxu3 %v4796_v55  ;;  %v4716_v11 = vor.u32 %v6272_v8, %v4713_v9  ;;  %v4775_v12 = vld [vmem:[#allocation9 + $0xa0] sm:$0xf]  ;;  %v6332_v55 = vld [vmem:[#allocation8 + $0x40c] sm:$0xf]  ;;  %v4948_v8 = vor.u32 %v6330_v5, %v4945_v7 }
  0xe5   :  { %v4776_v19 = vor.u32 %v6289_v13, %v4775_v12  ;;  %v4956_v61 = vor.u32 %v6332_v55, %v4953_v56  ;;  %v6304_v9 = vld [vmem:[#allocation12 + $0x110] sm:$0xff]  ;;  %v6329_v12 = vld [vmem:[#allocation8 + $0x32c] sm:$0xf0]  ;;  %v6328_v13 = vld [vmem:[#allocation8 + $0x2ec] sm:$0xf] }
  0xe6   :  { %1258 = vmatpush.bf16.msrb.mxu2 %v4784_v1  ;;  %v6345_v55 = vld [vmem:[#allocation9 + $0x32c] sm:$0xf0]  ;;  %v6344_v56 = vld [vmem:[#allocation9 + $0x2ec] sm:$0xf]  ;;  %v6343_v5 = vld [vmem:[#allocation9 + $0x29c] sm:$0xf0] }
  0xe7   :  { %1133 = vmatpush.bf16.msrb.mxu0 %v4744_v20  ;;  %v4780_v20 = vor.u32 %v6288_v14, %v4777_v15  ;;  %v4937_v15 = vld [vmem:[#allocation8 + $0x330] sm:$0xf0] }
  0xe8   :  { %1146 = vmatpush.bf16.msrb.mxu1 %v4748_v22  ;;  %1271 = vmatpush.bf16.msrb.mxu3 %v4788_v6  ;;  %v4705_v22 = vld [vmem:[#allocation8 + $0x58] sm:$0xf0]  ;;  %v4944_v6 = vor.u32 %v6331_v4, %v4943_v3  ;;  %v4940_v16 = vor.u32 %v6328_v13, %v4937_v15  ;;  %v4991_v4 = vld [vmem:[#allocation9 + $0x258] sm:$0xf] }
  0xe9   :  { %v4708_v30 = vor.u32 %v6270_v21, %v4705_v22  ;;  %v4929_v22 = vld [vmem:[#allocation8 + $0x2a0] sm:$0xf0]  ;;  %v4992_v7 = vor.u32 %v6343_v5, %v4991_v4 }
  0xea   :  { %1259 = vmatpush.bf16.msrb.mxu2 %v4776_v19  ;;  %v6327_v19 = vld [vmem:[#allocation8 + $0x29c] sm:$0xf0] }
  0xeb   :  { %1134 = vmatpush.bf16.msrb.mxu0 %v4736_v33 }
  0xec   :  { %1147 = vmatpush.bf16.msrb.mxu1 %v4740_v36  ;;  %1272 = vmatpush.bf16.msrb.mxu3 %v4780_v20  ;;  %v6317_v36 = vld [vmem:[#allocation12 + $0x178] sm:$0xff]  ;;  %v6326_v20 = vld [vmem:[#allocation8 + $0x25c] sm:$0xf] }
  0xee   :  { %846 = vmatmul.bf16.vlgmr.msra.gmra.mxu0 %v7069_v39 }
  0xef   :  { %859 = vmatmul.bf16.vlgmr.msra.gmra.mxu1 %v7069_v39  ;;  %1135 = vmatpush.bf16.msrb.mxu0 %v4728_v47 }
  0xf0   :  { %1148 = vmatpush.bf16.msrb.mxu1 %v4732_v49  ;;  %1273 = vmatpush.bf16.msrb.mxu3 %v4772_v32 }
  0xf3   :  { %1136 = vmatpush.bf16.msrb.mxu0 %v4720_v59  ;;  %v4952_v59 = vor.u32 %v6333_v52, %v4951_v51  ;;  %v4913_v52 = vld [vmem:[#allocation8 + $0x180] sm:$0xf0] }
  0xf4   :  { %1149 = vmatpush.bf16.msrb.mxu1 %v4724_v0  ;;  %v6313_v0 = vld [vmem:[#allocation12 + $0x158] sm:$0xff] }
  0xf5   :  { %v7079_v62 = vpop.f32.mrf.mxu2 }
  0xf6   :  { %v7081_v2 = vpop.f32.mrf.mxu3 }
  0xf7   :  { %1137 = vmatpush.bf16.msrb.mxu0 %v4712_v10  ;;  %v6312_v10 = vld [vmem:[#allocation12 + $0x150] sm:$0xff] }
  0xf8   :  { %1150 = vmatpush.bf16.msrb.mxu1 %v4716_v11  ;;  %v4935_v11 = vld [vmem:[#allocation8 + $0x2e8] sm:$0xf] }
  0xf9   :  { %v4936_v14 = vor.u32 %v6329_v12, %v4935_v11  ;;  %v6319_v11 = vld [vmem:[#allocation8 + $0x5c] sm:$0xf0]  ;;  %v6318_v12 = vld [vmem:[#allocation8 + $0x1c] sm:$0xf] }
  0xfb   :  { %1138 = vmatpush.bf16.msrb.mxu0 %v4704_v25  ;;  %v6310_v25 = vld [vmem:[#allocation12 + $0x140] sm:$0xff] }
  0xfc   :  { %1151 = vmatpush.bf16.msrb.mxu1 %v4708_v30  ;;  %v5017_v30 = vld [vmem:[#allocation9 + $0x450] sm:$0xf0] }
  0xfd   :  { %v727_v26 = vpop.f32.mrf.mxu2 }
  0xfe   :  { %v740_v29 = vpop.f32.mrf.mxu3  ;;  %v6287_v26 = vld [vmem:[#allocation9 + $0x54] sm:$0xf0]  ;;  %1139 = vmatmul.bf16.vlgmr.msrb.gmra.mxu0 %v7069_v39 }
  0xff   :  { %v4768_v31 = vor.u32 %v6287_v26, %v4767_v23  ;;  %1152 = vmatmul.bf16.vlgmr.msrb.gmra.mxu1 %v7069_v39  ;;  %1421 = vmatpush.bf16.msra.mxu0 %v6309_v35  ;;  %v4932_v23 = vor.u32 %v6326_v20, %v4929_v22  ;;  %v5015_v26 = vld [vmem:[#allocation9 + $0x408] sm:$0xf]  ;;  %v6339_v22 = vld [vmem:[#allocation9 + $0x17c] sm:$0xf0] }
 0x100   :  { %1434 = vmatpush.bf16.msra.mxu1 %v6317_v36  ;;  %v4919_v35 = vld [vmem:[#allocation8 + $0x1c8] sm:$0xf]  ;;  %v6325_v36 = vld [vmem:[#allocation8 + $0x20c] sm:$0xf0] }
 0x101   :  { %1260 = vmatpush.bf16.msrb.mxu2 %v4768_v31 }
 0x103   :  { %1422 = vmatpush.bf16.msra.mxu0 %v6308_v38  ;;  %v4920_v38 = vor.u32 %v6325_v36, %v4919_v35 }
 0x104   :  { %1435 = vmatpush.bf16.msra.mxu1 %v6316_v40  ;;  %v4921_v40 = vld [vmem:[#allocation8 + $0x210] sm:$0xf0] }
 0x107   :  { %1423 = vmatpush.bf16.msra.mxu0 %v6307_v44 }
 0x108   :  { %1436 = vmatpush.bf16.msra.mxu1 %v6315_v45  ;;  %v6346_v45 = vld [vmem:[#allocation9 + $0x37c] sm:$0xf] }
 0x10b   :  { %1424 = vmatpush.bf16.msra.mxu0 %v6306_v50  ;;  %v6322_v50 = vld [vmem:[#allocation8 + $0x13c] sm:$0xf] }
 0x10c   :  { %1437 = vmatpush.bf16.msra.mxu1 %v6314_v54  ;;  %v4999_v54 = vld [vmem:[#allocation9 + $0x2e8] sm:$0xf] }
 0x110   :  { %1438 = vmatpush.bf16.msra.mxu1 %v6313_v0  ;;  %v6320_v0 = vld [vmem:[#allocation8 + $0xac] sm:$0xf] }
 0x114   :  { %1439 = vmatpush.bf16.msra.mxu1 %v6312_v10  ;;  %v4895_v10 = vld [vmem:[#allocation8 + $0x18] sm:$0xf] }
 0x115   :  { %v4896_v13 = vor.u32 %v6319_v11, %v4895_v10  ;;  %v6351_v10 = vld [vmem:[#allocation12 + $0x188] sm:$0xff] }
 0x116   :  { %v6359_v11 = vld [vmem:[#allocation12 + $0x1c8] sm:$0xff] }
 0x15b   :  { %v602_v18 = vpop.f32.mrf.mxu0 }
 0x15c   :  { %v615_v24 = vpop.f32.mrf.mxu1 }
 0x15d   :  { %v7083_v29 = vadd.f32 %v615_v24, %v602_v18  ;;  %v4927_v18 = vld [vmem:[#allocation8 + $0x258] sm:$0xf] }
 0x15e   :  { %v4928_v21 = vor.u32 %v6327_v19, %v4927_v18  ;;  %v6302_v24 = vld [vmem:[#allocation12 + $0x100] sm:$0xff] }
 0x15f   :  { %v4985_v19 = vld [vmem:[#allocation9 + $0x210] sm:$0xf0] }
 0x163   :  { %v604_v33 = vpop.f32.mrf.mxu0 }
 0x164   :  { %v617_v34 = vpop.f32.mrf.mxu1  ;;  %v5016_v33 = vor.u32 %v6349_v27, %v5015_v26  ;;  %v4967_v27 = vld [vmem:[#allocation9 + $0xa8] sm:$0xf] }
 0x165   :  { %v5020_v34 = vor.u32 %v6348_v28, %v5017_v30  ;;  %v7095_v28 = vld [vmem:[#allocation4] sm:$0xf]  ;;  %v6337_v30 = vld [vmem:[#allocation9 + $0xec] sm:$0xf0] }
 0x166   :  { %v4968_v36 = vor.u32 %v6337_v30, %v4967_v27  ;;  %v5135_v27 = vld [vmem:[#allocation8 + $0x380] sm:$0xf]  ;;  %v6379_v30 = vld [vmem:[#allocation8 + $0x3c4] sm:$0xf0] }
 0x16b   :  { %v847_v42 = vpop.f32.mrf.mxu0 }
 0x16c   :  { %v864_v46 = vmax.f32 %v7079_v62, %v847_v42  ;;  %v860_v47 = vpop.f32.mrf.mxu1  ;;  %v6347_v42 = vld [vmem:[#allocation9 + $0x3bc] sm:$0xf0] }
 0x16d   :  { %v865_v48 = vmax.f32 %v7081_v2, %v860_v47  ;;  %v6305_v2 = vld [vmem:[#allocation12 + $0x118] sm:$0xff] }
 0x16e   :  { %v872_v49 = vadd.f32 %v868_v41, %v864_v46  ;;  %1425 = vmatpush.bf16.msra.mxu0 %v6305_v2  ;;  %v5007_v41 = vld [vmem:[#allocation9 + $0x378] sm:$0xf]  ;;  %v5009_v46 = vld [vmem:[#allocation9 + $0x3c0] sm:$0xf0] }
 0x16f   :  { %v873_v53 = vadd.f32 %v869_v43, %v865_v48  ;;  %v4924_v43 = vor.u32 %v6324_v37, %v4921_v40  ;;  %v5008_v44 = vor.u32 %v6347_v42, %v5007_v41  ;;  %v5012_v47 = vor.u32 %v6346_v45, %v5009_v46  ;;  %v4911_v48 = vld [vmem:[#allocation8 + $0x138] sm:$0xf]  ;;  %v6335_v41 = vld [vmem:[#allocation9 + $0x5c] sm:$0xf0]  ;;  %v6334_v42 = vld [vmem:[#allocation9 + $0x1c] sm:$0xf] }
 0x170   :  { %v874_v57 = vmax.f32 %v872_v49, 0.0  ;;  %v6323_v49 = vld [vmem:[#allocation8 + $0x17c] sm:$0xf0] }
 0x171   :  { %v875_v58 = vmax.f32 %v873_v53, 0.0  ;;  %v4912_v51 = vor.u32 %v6323_v49, %v4911_v48  ;;  %v4916_v53 = vor.u32 %v6322_v50, %v4913_v52  ;;  %v6357_v50 = vld [vmem:[#allocation12 + $0x1b8] sm:$0xff]  ;;  %v1281_v52 = vld [vmem:[#allocation11 + $0x4] sm:$0x3] }
 0x172   :  { %v876_v60 = vpack.c.bf16 %v874_v57, %v874_v57  ;;  %1426 = vmatpush.bf16.msra.mxu0 %v6304_v9  ;;  %v5000_v57 = vor.u32 %v6345_v55, %v4999_v54  ;;  %v6364_v54 = vld [vmem:[#allocation12 + $0x1f0] sm:$0xff]  ;;  %v1283_v55 = vperm.slane %v1281_v52, 0 }
 0x173   :  { %v877_v63 = vpack.c.bf16 %v875_v58, %v875_v58  ;;  %v849_v62 = vpop.f32.mrf.mxu0  ;;  %v5001_v58 = vld [vmem:[#allocation9 + $0x330] sm:$0xf0] }
 0x174   :  { %v862_v1 = vpop.f32.mrf.mxu1  ;;  %1014 = vmatmul.bf16.vlgmr.msra.gmra.mxu2 %v876_v60  ;;  %v6321_v62 = vld [vmem:[#allocation8 + $0xec] sm:$0xf0] }
 0x175   :  { %1027 = vmatmul.bf16.vlgmr.msra.gmra.mxu3 %v877_v63  ;;  %1546 = vmatpush.bf16.msra.mxu2 %v4952_v59  ;;  %v4903_v63 = vld [vmem:[#allocation8 + $0xa8] sm:$0xf]  ;;  %v4905_v1 = vld [vmem:[#allocation8 + $0xf0] sm:$0xf0] }
 0x176   :  { %1559 = vmatpush.bf16.msra.mxu3 %v4956_v61  ;;  %1427 = vmatpush.bf16.msra.mxu0 %v6303_v17  ;;  %v5004_v61 = vor.u32 %v6344_v56, %v5001_v58  ;;  %v4904_v2 = vor.u32 %v6321_v62, %v4903_v63  ;;  %v4908_v3 = vor.u32 %v6320_v0, %v4905_v1  ;;  %v6341_v17 = vld [vmem:[#allocation9 + $0x20c] sm:$0xf0]  ;;  %v6363_v58 = vld [vmem:[#allocation12 + $0x1e8] sm:$0xff] }
 0x177   :  { %v6362_v0 = vld [vmem:[#allocation12 + $0x1e0] sm:$0xff] }
 0x179   :  { %1547 = vmatpush.bf16.msra.mxu2 %v4944_v6  ;;  %v6342_v6 = vld [vmem:[#allocation9 + $0x25c] sm:$0xf] }
 0x17a   :  { %1560 = vmatpush.bf16.msra.mxu3 %v4948_v8  ;;  %1428 = vmatpush.bf16.msra.mxu0 %v6302_v24  ;;  %v4993_v8 = vld [vmem:[#allocation9 + $0x2a0] sm:$0xf0] }
 0x17b   :  { %v7091_v31 = vpop.f32.mrf.mxu0  ;;  %v4996_v9 = vor.u32 %v6342_v6, %v4993_v8  ;;  %v4977_v24 = vld [vmem:[#allocation9 + $0x180] sm:$0xf0]  ;;  %v6361_v8 = vld [vmem:[#allocation12 + $0x1d8] sm:$0xff] }
 0x17c   :  { %v7093_v32 = vpop.f32.mrf.mxu1 }
 0x17d   :  { %1548 = vmatpush.bf16.msra.mxu2 %v4936_v14  ;;  %v4897_v14 = vld [vmem:[#allocation8 + $0x60] sm:$0xf0] }
 0x17e   :  { %1561 = vmatpush.bf16.msra.mxu3 %v4940_v16  ;;  %1668 = vmatpush.bf16.msrb.mxu0 %v5016_v33  ;;  %v4900_v15 = vor.u32 %v6318_v12, %v4897_v14  ;;  %v4983_v16 = vld [vmem:[#allocation9 + $0x1c8] sm:$0xf]  ;;  %v6336_v33 = vld [vmem:[#allocation9 + $0xac] sm:$0xf]  ;;  %v5143_v12 = vld [vmem:[#allocation8 + $0x410] sm:$0xf] }
 0x17f   :  { %v4984_v18 = vor.u32 %v6341_v17, %v4983_v16  ;;  %v6380_v14 = vld [vmem:[#allocation8 + $0x414] sm:$0xf]  ;;  %v5145_v16 = vld [vmem:[#allocation8 + $0x458] sm:$0xf0] }
 0x180   :  { %v5148_v17 = vor.u32 %v6380_v14, %v5145_v16  ;;  %v5177_v14 = vld [vmem:[#allocation9 + $0x218] sm:$0xf0]  ;;  %v5103_v16 = vld [vmem:[#allocation8 + $0x140] sm:$0xf] }
 0x181   :  { %1549 = vmatpush.bf16.msra.mxu2 %v4928_v21  ;;  %v4975_v21 = vld [vmem:[#allocation9 + $0x138] sm:$0xf] }
 0x182   :  { %1562 = vmatpush.bf16.msra.mxu3 %v4932_v23  ;;  %1669 = vmatpush.bf16.msrb.mxu0 %v5008_v44  ;;  %v6338_v23 = vld [vmem:[#allocation9 + $0x13c] sm:$0xf] }
 0x183   :  { %v1142_v59 = vpop.f32.mrf.mxu0  ;;  %v4980_v26 = vor.u32 %v6338_v23, %v4977_v24 }
 0x184   :  { %1261 = vmatmul.bf16.vlgmr.msrb.gmra.mxu2 %v7069_v39  ;;  %v1155_v60 = vpop.f32.mrf.mxu1 }
 0x185   :  { %1274 = vmatmul.bf16.vlgmr.msrb.gmra.mxu3 %v7069_v39  ;;  %v6311_v39 = vld [vmem:[#allocation12 + $0x148] sm:$0xff]  ;;  %1550 = vmatpush.bf16.msra.mxu2 %v4920_v38 }
 0x186   :  { %1440 = vmatpush.bf16.msra.mxu1 %v6311_v39  ;;  %1563 = vmatpush.bf16.msra.mxu3 %v4924_v43  ;;  %v6340_v39 = vld [vmem:[#allocation9 + $0x1cc] sm:$0xf]  ;;  %v4959_v38 = vld [vmem:[#allocation9 + $0x18] sm:$0xf]  ;;  %v4961_v43 = vld [vmem:[#allocation9 + $0x60] sm:$0xf0] }
 0x187   :  { %1670 = vmatpush.bf16.msrb.mxu0 %v5000_v57  ;;  %v4988_v20 = vor.u32 %v6340_v39, %v4985_v19  ;;  %v4960_v46 = vor.u32 %v6335_v41, %v4959_v38  ;;  %v1284_v57 = vperm.slane %v1281_v52, 1  ;;  %v6350_v39 = vld [vmem:[#allocation12 + $0x180] sm:$0xff]  ;;  %v6394_v41 = vld [vmem:[#allocation9 + $0x384] sm:$0xf] }
 0x188   :  { %v5207_v19 = vld [vmem:[#allocation9 + $0x410] sm:$0xf]  ;;  %v6393_v52 = vld [vmem:[#allocation9 + $0x334] sm:$0xf0] }
 0x189   :  { %1551 = vmatpush.bf16.msra.mxu2 %v4912_v51  ;;  %v6365_v51 = vld [vmem:[#allocation12 + $0x1f8] sm:$0xff] }
 0x18a   :  { %1441 = vmatpush.bf16.msra.mxu1 %v6310_v25  ;;  %1564 = vmatpush.bf16.msra.mxu3 %v4916_v53  ;;  %v4976_v25 = vor.u32 %v6339_v22, %v4975_v21  ;;  %v6356_v53 = vld [vmem:[#allocation12 + $0x1b0] sm:$0xff]  ;;  %v6396_v21 = vld [vmem:[#allocation9 + $0x414] sm:$0xf]  ;;  %v5209_v22 = vld [vmem:[#allocation9 + $0x458] sm:$0xf0] }
 0x18b   :  { %1671 = vmatpush.bf16.msrb.mxu0 %v4992_v7  ;;  %v6353_v7 = vld [vmem:[#allocation12 + $0x198] sm:$0xff] }
 0x18d   :  { %1552 = vmatpush.bf16.msra.mxu2 %v4904_v2  ;;  %v6354_v2 = vld [vmem:[#allocation12 + $0x1a0] sm:$0xff] }
 0x18e   :  { %1681 = vmatpush.bf16.msrb.mxu1 %v5020_v34  ;;  %1565 = vmatpush.bf16.msra.mxu3 %v4908_v3  ;;  %v4969_v34 = vld [vmem:[#allocation9 + $0xf0] sm:$0xf0] }
 0x18f   :  { %1672 = vmatpush.bf16.msrb.mxu0 %v4984_v18  ;;  %v4972_v37 = vor.u32 %v6336_v33, %v4969_v34  ;;  %v6358_v18 = vld [vmem:[#allocation12 + $0x1c0] sm:$0xff]  ;;  %v6378_v33 = vld [vmem:[#allocation8 + $0x384] sm:$0xf]  ;;  %v5136_v34 = vor.u32 %v6379_v30, %v5135_v27  ;;  %v5169_v27 = vld [vmem:[#allocation9 + $0x188] sm:$0xf0] }
 0x190   :  { %v5095_v30 = vld [vmem:[#allocation8 + $0xb0] sm:$0xf] }
 0x191   :  { %1553 = vmatpush.bf16.msra.mxu2 %v4896_v13  ;;  %v6381_v13 = vld [vmem:[#allocation8 + $0x454] sm:$0xf0] }
 0x192   :  { %1682 = vmatpush.bf16.msrb.mxu1 %v5012_v47  ;;  %1566 = vmatpush.bf16.msra.mxu3 %v4900_v15  ;;  %v4964_v47 = vor.u32 %v6334_v42, %v4961_v43  ;;  %v5144_v15 = vor.u32 %v6381_v13, %v5143_v12  ;;  %v5201_v42 = vld [vmem:[#allocation9 + $0x3c8] sm:$0xf0]  ;;  %v6388_v12 = vld [vmem:[#allocation9 + $0x1d4] sm:$0xf] }
 0x193   :  { %1673 = vmatpush.bf16.msrb.mxu0 %v4976_v25  ;;  %v5204_v43 = vor.u32 %v6394_v41, %v5201_v42  ;;  %v6385_v41 = vld [vmem:[#allocation9 + $0xf4] sm:$0xf0]  ;;  %v6384_v42 = vld [vmem:[#allocation9 + $0xb4] sm:$0xf] }
 0x194   :  { %1554 = vmatmul.bf16.vlgmr.msra.gmra.mxu2 %v7095_v28 }
 0x195   :  { %1567 = vmatmul.bf16.vlgmr.msra.gmra.mxu3 %v7095_v28  ;;  %1836 = vmatpush.bf16.msrb.mxu2 %v6357_v50 }
 0x196   :  { %1683 = vmatpush.bf16.msrb.mxu1 %v5004_v61  ;;  %1849 = vmatpush.bf16.msrb.mxu3 %v6365_v51  ;;  %v5191_v51 = vld [vmem:[#allocation9 + $0x2f0] sm:$0xf] }
 0x197   :  { %1674 = vmatpush.bf16.msrb.mxu0 %v4968_v36  ;;  %v5199_v36 = vld [vmem:[#allocation9 + $0x380] sm:$0xf] }
 0x199   :  { %1837 = vmatpush.bf16.msrb.mxu2 %v6356_v53  ;;  %v6392_v53 = vld [vmem:[#allocation9 + $0x2f4] sm:$0xf] }
 0x19a   :  { %1684 = vmatpush.bf16.msrb.mxu1 %v4996_v9  ;;  %1850 = vmatpush.bf16.msrb.mxu3 %v6364_v54  ;;  %v5192_v54 = vor.u32 %v6393_v52, %v5191_v51  ;;  %v5089_v51 = vld [vmem:[#allocation8 + $0x68] sm:$0xf0]  ;;  %v5151_v52 = vld [vmem:[#allocation9 + $0x20] sm:$0xf] }
 0x19b   :  { %1675 = vmatpush.bf16.msrb.mxu0 %v4960_v46  ;;  %v6377_v46 = vld [vmem:[#allocation8 + $0x334] sm:$0xf0] }
 0x19e   :  { %1685 = vmatpush.bf16.msrb.mxu1 %v4988_v20  ;;  %1851 = vmatpush.bf16.msrb.mxu3 %v6363_v58  ;;  %v6397_v20 = vld [vmem:[#allocation9 + $0x454] sm:$0xf0]  ;;  %v5119_v58 = vld [vmem:[#allocation8 + $0x260] sm:$0xf] }
 0x19f   :  { %v5208_v25 = vor.u32 %v6397_v20, %v5207_v19  ;;  %v5105_v19 = vld [vmem:[#allocation8 + $0x188] sm:$0xf0]  ;;  %v5167_v20 = vld [vmem:[#allocation9 + $0x140] sm:$0xf] }
 0x1a2   :  { %1686 = vmatpush.bf16.msrb.mxu1 %v4980_v26  ;;  %1852 = vmatpush.bf16.msrb.mxu3 %v6362_v0  ;;  %v5212_v26 = vor.u32 %v6396_v21, %v5209_v22  ;;  %v6391_v0 = vld [vmem:[#allocation9 + $0x2a4] sm:$0xf0] }
 0x1a3   :  { %v6387_v21 = vld [vmem:[#allocation9 + $0x184] sm:$0xf0] }
 0x1a6   :  { %1687 = vmatpush.bf16.msrb.mxu1 %v4972_v37  ;;  %1853 = vmatpush.bf16.msrb.mxu3 %v6361_v8  ;;  %v6395_v37 = vld [vmem:[#allocation9 + $0x3c4] sm:$0xf0]  ;;  %v6372_v8 = vld [vmem:[#allocation8 + $0x1d4] sm:$0xf] }
 0x1aa   :  { %1688 = vmatpush.bf16.msrb.mxu1 %v4964_v47  ;;  %v6376_v47 = vld [vmem:[#allocation8 + $0x2f4] sm:$0xf] }
 0x1f7   :  { %v1015_v35 = vpop.f32.mrf.mxu2 }
 0x1f8   :  { %v1028_v40 = vpop.f32.mrf.mxu3 }
 0x1f9   :  { %v1029_v44 = vadd.f32 %v1028_v40, %v1015_v35  ;;  %v5137_v35 = vld [vmem:[#allocation8 + $0x3c8] sm:$0xf0]  ;;  %v5200_v40 = vor.u32 %v6395_v37, %v5199_v36  ;;  %v5097_v36 = vld [vmem:[#allocation8 + $0xf8] sm:$0xf0] }
 0x1fa   :  { %v5140_v38 = vor.u32 %v6378_v33, %v5137_v35  ;;  %v6368_v35 = vld [vmem:[#allocation8 + $0xb4] sm:$0xf] }
 0x1fb   :  { %v7100_v45 = vadd.f32 %v1029_v44, %v7083_v29  ;;  %v6355_v29 = vld [vmem:[#allocation12 + $0x1a8] sm:$0xff]  ;;  %v5127_v44 = vld [vmem:[#allocation8 + $0x2f0] sm:$0xf] }
 0x1fc   :  { %1838 = vmatpush.bf16.msrb.mxu2 %v6355_v29 }
 0x1ff   :  { %v1017_v48 = vpop.f32.mrf.mxu2 }
 0x200   :  { %v1030_v49 = vpop.f32.mrf.mxu3  ;;  %1839 = vmatpush.bf16.msrb.mxu2 %v6354_v2  ;;  %v5128_v48 = vor.u32 %v6377_v46, %v5127_v44  ;;  %v5183_v2 = vld [vmem:[#allocation9 + $0x260] sm:$0xf]  ;;  %v6367_v46 = vld [vmem:[#allocation8 + $0x64] sm:$0xf0] }
 0x201   :  { %v5129_v49 = vld [vmem:[#allocation8 + $0x338] sm:$0xf0]  ;;  %v5087_v44 = vld [vmem:[#allocation8 + $0x20] sm:$0xf] }
 0x202   :  { %v5132_v50 = vor.u32 %v6376_v47, %v5129_v49 }
 0x204   :  { %1840 = vmatpush.bf16.msrb.mxu2 %v6353_v7  ;;  %v6373_v7 = vld [vmem:[#allocation8 + $0x214] sm:$0xf0] }
 0x207   :  { %v1262_v56 = vpop.f32.mrf.mxu2 }
 0x208   :  { %v1279_v59 = vmax.f32 %v7091_v31, %v1262_v56  ;;  %v1275_v60 = vpop.f32.mrf.mxu3  ;;  %v6352_v31 = vld [vmem:[#allocation12 + $0x190] sm:$0xff] }
 0x209   :  { %v1280_v61 = vmax.f32 %v7093_v32, %v1275_v60  ;;  %v6360_v32 = vld [vmem:[#allocation12 + $0x1d0] sm:$0xff]  ;;  %1841 = vmatpush.bf16.msrb.mxu2 %v6352_v31  ;;  %v5113_v31 = vld [vmem:[#allocation8 + $0x218] sm:$0xf0] }
 0x20a   :  { %v1287_v63 = vadd.f32 %v1283_v55, %v1279_v59  ;;  %1854 = vmatpush.bf16.msrb.mxu3 %v6360_v32  ;;  %v5193_v55 = vld [vmem:[#allocation9 + $0x338] sm:$0xf0]  ;;  %v6375_v59 = vld [vmem:[#allocation8 + $0x2a4] sm:$0xf0]  ;;  %v5116_v32 = vor.u32 %v6372_v8, %v5113_v31 }
 0x20b   :  { %v1288_v62 = vadd.f32 %v1284_v57, %v1280_v61  ;;  %v5196_v29 = vor.u32 %v6392_v53, %v5193_v55  ;;  %v5120_v60 = vor.u32 %v6375_v59, %v5119_v58  ;;  %v6374_v61 = vld [vmem:[#allocation8 + $0x264] sm:$0xf]  ;;  %v6383_v55 = vld [vmem:[#allocation9 + $0x64] sm:$0xf0]  ;;  %v6411_v8 = vld [vmem:[#allocation12 + $0x268] sm:$0xff] }
 0x20c   :  { %v1289_v1 = vmax.f32 %v1287_v63, 0.0  ;;  %v5121_v63 = vld [vmem:[#allocation8 + $0x2a8] sm:$0xf0] }
 0x20d   :  { %v1290_v3 = vmax.f32 %v1288_v62, 0.0  ;;  %1842 = vmatpush.bf16.msrb.mxu2 %v6351_v10  ;;  %v5124_v62 = vor.u32 %v6374_v61, %v5121_v63  ;;  %v5175_v10 = vld [vmem:[#allocation9 + $0x1d0] sm:$0xf] }
 0x20e   :  { %v1291_v4 = vpack.c.bf16 %v1289_v1, %v1289_v1  ;;  %1855 = vmatpush.bf16.msrb.mxu3 %v6359_v11  ;;  %v6390_v1 = vld [vmem:[#allocation9 + $0x264] sm:$0xf]  ;;  %v6389_v11 = vld [vmem:[#allocation9 + $0x214] sm:$0xf0] }
 0x20f   :  { %v1292_v5 = vpack.c.bf16 %v1290_v3, %v1290_v3  ;;  %v1264_v6 = vpop.f32.mrf.mxu2  ;;  %v5184_v3 = vor.u32 %v6391_v0, %v5183_v2  ;;  %v5176_v13 = vor.u32 %v6389_v11, %v5175_v10  ;;  %v6405_v2 = vld [vmem:[#allocation12 + $0x238] sm:$0xff]  ;;  %v6402_v11 = vld [vmem:[#allocation12 + $0x220] sm:$0xff] }
 0x210   :  { %v1277_v9 = vpop.f32.mrf.mxu3  ;;  %1429 = vmatmul.bf16.vlgmr.msra.gmra.mxu0 %v1291_v4  ;;  %v5185_v4 = vld [vmem:[#allocation9 + $0x2a8] sm:$0xf0]  ;;  %v5111_v6 = vld [vmem:[#allocation8 + $0x1d0] sm:$0xf] }
 0x211   :  { %1442 = vmatmul.bf16.vlgmr.msra.gmra.mxu1 %v1292_v5  ;;  %1961 = vmatpush.bf16.msra.mxu0 %v5144_v15  ;;  %v5188_v5 = vor.u32 %v6390_v1, %v5185_v4  ;;  %v5112_v9 = vor.u32 %v6373_v7, %v5111_v6  ;;  %v5180_v15 = vor.u32 %v6388_v12, %v5177_v14  ;;  %v6413_v0 = vld [vmem:[#allocation12 + $0x278] sm:$0xff]  ;;  %v1696_v1 = vld [vmem:[#allocation11 + $0x6] sm:$0x3]  ;;  %v6403_v7 = vld [vmem:[#allocation12 + $0x228] sm:$0xff] }
 0x212   :  { %1974 = vmatpush.bf16.msra.mxu1 %v5148_v17  ;;  %1843 = vmatpush.bf16.msrb.mxu2 %v6350_v39  ;;  %v6371_v17 = vld [vmem:[#allocation8 + $0x184] sm:$0xf0]  ;;  %v6370_v39 = vld [vmem:[#allocation8 + $0x144] sm:$0xf]  ;;  %v1698_v4 = vperm.slane %v1696_v1, 0  ;;  %v1699_v6 = vperm.slane %v1696_v1, 1 }
 0x213   :  { %1856 = vmatpush.bf16.msrb.mxu3 %v6358_v18  ;;  %v5104_v18 = vor.u32 %v6371_v17, %v5103_v16  ;;  %v5108_v22 = vor.u32 %v6370_v39, %v5105_v19  ;;  %v5335_v12 = vld [vmem:[#allocation8 + $0x418] sm:$0xf]  ;;  %v6428_v16 = vld [vmem:[#allocation8 + $0x41c] sm:$0xf]  ;;  %v5337_v17 = vld [vmem:[#allocation8 + $0x460] sm:$0xf0] }
 0x214   :  { %v6421_v1 = vld [vmem:[#allocation8 + $0x21c] sm:$0xf0] }
 0x215   :  { %1962 = vmatpush.bf16.msra.mxu0 %v5136_v34  ;;  %v6369_v34 = vld [vmem:[#allocation8 + $0xf4] sm:$0xf0] }
 0x216   :  { %2083 = vmatpush.bf16.msra.mxu2 %v5208_v25  ;;  %1975 = vmatpush.bf16.msra.mxu1 %v5140_v38  ;;  %v5168_v25 = vor.u32 %v6387_v21, %v5167_v20  ;;  %v5096_v37 = vor.u32 %v6369_v34, %v5095_v30  ;;  %v5100_v38 = vor.u32 %v6368_v35, %v5097_v36  ;;  %v6427_v30 = vld [vmem:[#allocation8 + $0x3cc] sm:$0xf0]  ;;  %v5329_v35 = vld [vmem:[#allocation8 + $0x3d0] sm:$0xf0] }
 0x217   :  { %v7106_v23 = vpop.f32.mrf.mxu2  ;;  %2096 = vmatpush.bf16.msra.mxu3 %v5212_v26  ;;  %v6386_v26 = vld [vmem:[#allocation9 + $0x144] sm:$0xf]  ;;  %v5340_v21 = vor.u32 %v6428_v16, %v5337_v17  ;;  %v5383_v16 = vld [vmem:[#allocation9 + $0x2f8] sm:$0xf]  ;;  %v6441_v17 = vld [vmem:[#allocation9 + $0x33c] sm:$0xf0] }
 0x218   :  { %v7108_v24 = vpop.f32.mrf.mxu3  ;;  %v5172_v33 = vor.u32 %v6386_v26, %v5169_v27  ;;  %v5327_v27 = vld [vmem:[#allocation8 + $0x388] sm:$0xf] }
 0x219   :  { %1963 = vmatpush.bf16.msra.mxu0 %v5128_v48  ;;  %v5328_v34 = vor.u32 %v6427_v30, %v5327_v27  ;;  %v5289_v27 = vld [vmem:[#allocation8 + $0x100] sm:$0xf0] }
 0x21a   :  { %2084 = vmatpush.bf16.msra.mxu2 %v5200_v40  ;;  %1976 = vmatpush.bf16.msra.mxu1 %v5132_v50  ;;  %v5159_v40 = vld [vmem:[#allocation9 + $0xb0] sm:$0xf]  ;;  %v6366_v50 = vld [vmem:[#allocation8 + $0x24] sm:$0xf] }
 0x21b   :  { %2097 = vmatpush.bf16.msra.mxu3 %v5204_v43  ;;  %v5161_v43 = vld [vmem:[#allocation9 + $0xf8] sm:$0xf0]  ;;  %v5160_v48 = vor.u32 %v6385_v41, %v5159_v40  ;;  %v5092_v58 = vor.u32 %v6366_v50, %v5089_v51  ;;  %v5319_v40 = vld [vmem:[#allocation8 + $0x2f8] sm:$0xf]  ;;  %v6425_v41 = vld [vmem:[#allocation8 + $0x33c] sm:$0xf0] }
 0x21c   :  { %v5164_v49 = vor.u32 %v6384_v42, %v5161_v43  ;;  %v6424_v42 = vld [vmem:[#allocation8 + $0x2fc] sm:$0xf]  ;;  %v5320_v43 = vor.u32 %v6425_v41, %v5319_v40  ;;  %v6423_v50 = vld [vmem:[#allocation8 + $0x2ac] sm:$0xf0]  ;;  %v6422_v51 = vld [vmem:[#allocation8 + $0x26c] sm:$0xf] }
 0x21d   :  { %1964 = vmatpush.bf16.msra.mxu0 %v5120_v60  ;;  %v5152_v60 = vor.u32 %v6383_v55, %v5151_v52  ;;  %v6398_v55 = vld [vmem:[#allocation12 + $0x200] sm:$0xff]  ;;  %v5279_v40 = vld [vmem:[#allocation8 + $0x28] sm:$0xf] }
 0x21e   :  { %2085 = vmatpush.bf16.msra.mxu2 %v5192_v54  ;;  %1977 = vmatpush.bf16.msra.mxu1 %v5124_v62  ;;  %v5088_v54 = vor.u32 %v6367_v46, %v5087_v44  ;;  %v5321_v44 = vld [vmem:[#allocation8 + $0x340] sm:$0xf0]  ;;  %v6415_v41 = vld [vmem:[#allocation8 + $0x6c] sm:$0xf0] }
 0x21f   :  { %v1557_v56 = vpop.f32.mrf.mxu2  ;;  %2098 = vmatpush.bf16.msra.mxu3 %v5196_v29  ;;  %v5324_v46 = vor.u32 %v6424_v42, %v5321_v44  ;;  %v6414_v42 = vld [vmem:[#allocation8 + $0x2c] sm:$0xf]  ;;  %v5281_v44 = vld [vmem:[#allocation8 + $0x70] sm:$0xf0] }
 0x220   :  { %1676 = vmatmul.bf16.vlgmr.msrb.gmra.mxu0 %v7095_v28  ;;  %v1570_v57 = vpop.f32.mrf.mxu3  ;;  %v6382_v56 = vld [vmem:[#allocation9 + $0x24] sm:$0xf] }
 0x221   :  { %1689 = vmatmul.bf16.vlgmr.msrb.gmra.mxu1 %v7095_v28  ;;  %1965 = vmatpush.bf16.msra.mxu0 %v5112_v9  ;;  %v5153_v57 = vld [vmem:[#allocation9 + $0x68] sm:$0xf0] }
 0x222   :  { %2086 = vmatpush.bf16.msra.mxu2 %v5184_v3  ;;  %1978 = vmatpush.bf16.msra.mxu1 %v5116_v32  ;;  %v5156_v61 = vor.u32 %v6382_v56, %v5153_v57  ;;  %v6412_v3 = vld [vmem:[#allocation12 + $0x270] sm:$0xff]  ;;  %v6406_v56 = vld [vmem:[#allocation12 + $0x240] sm:$0xff] }
 0x223   :  { %2099 = vmatpush.bf16.msra.mxu3 %v5188_v5  ;;  %v5399_v57 = vld [vmem:[#allocation9 + $0x418] sm:$0xf] }
 0x225   :  { %1966 = vmatpush.bf16.msra.mxu0 %v5104_v18 }
 0x226   :  { %2087 = vmatpush.bf16.msra.mxu2 %v5176_v13  ;;  %1979 = vmatpush.bf16.msra.mxu1 %v5108_v22  ;;  %v6429_v13 = vld [vmem:[#allocation8 + $0x45c] sm:$0xf0] }
 0x227   :  { %2100 = vmatpush.bf16.msra.mxu3 %v5180_v15  ;;  %v6410_v15 = vld [vmem:[#allocation12 + $0x260] sm:$0xff]  ;;  %v5336_v19 = vor.u32 %v6429_v13, %v5335_v12  ;;  %v6418_v12 = vld [vmem:[#allocation8 + $0x14c] sm:$0xf] }
 0x229   :  { %1967 = vmatpush.bf16.msra.mxu0 %v5096_v37  ;;  %v6400_v37 = vld [vmem:[#allocation12 + $0x210] sm:$0xff] }
 0x22a   :  { %2088 = vmatpush.bf16.msra.mxu2 %v5168_v25  ;;  %1980 = vmatpush.bf16.msra.mxu1 %v5100_v38  ;;  %v6409_v25 = vld [vmem:[#allocation12 + $0x258] sm:$0xff]  ;;  %v6408_v38 = vld [vmem:[#allocation12 + $0x250] sm:$0xff] }
 0x22b   :  { %2101 = vmatpush.bf16.msra.mxu3 %v5172_v33  ;;  %v6426_v33 = vld [vmem:[#allocation8 + $0x38c] sm:$0xf] }
 0x22c   :  { %v5332_v36 = vor.u32 %v6426_v33, %v5329_v35  ;;  %v5375_v33 = vld [vmem:[#allocation9 + $0x268] sm:$0xf]  ;;  %v6438_v35 = vld [vmem:[#allocation9 + $0x26c] sm:$0xf] }
 0x22d   :  { %1968 = vmatpush.bf16.msra.mxu0 %v5088_v54 }
 0x22e   :  { %2089 = vmatpush.bf16.msra.mxu2 %v5160_v48  ;;  %1981 = vmatpush.bf16.msra.mxu1 %v5092_v58  ;;  %v6407_v48 = vld [vmem:[#allocation12 + $0x248] sm:$0xff] }
 0x22f   :  { %2102 = vmatpush.bf16.msra.mxu3 %v5164_v49  ;;  %v5311_v49 = vld [vmem:[#allocation8 + $0x268] sm:$0xf]  ;;  %v6444_v58 = vld [vmem:[#allocation9 + $0x41c] sm:$0xf] }
 0x230   :  { %1969 = vmatmul.bf16.vlgmr.msra.gmra.mxu0 %v7095_v28  ;;  %v5312_v52 = vor.u32 %v6423_v50, %v5311_v49  ;;  %v6436_v49 = vld [vmem:[#allocation9 + $0x1dc] sm:$0xf] }
 0x231   :  { %1982 = vmatmul.bf16.vlgmr.msra.gmra.mxu1 %v7095_v28  ;;  %2251 = vmatpush.bf16.msrb.mxu0 %v6405_v2 }
 0x232   :  { %2090 = vmatpush.bf16.msra.mxu2 %v5152_v60  ;;  %2264 = vmatpush.bf16.msrb.mxu1 %v6413_v0  ;;  %v5401_v60 = vld [vmem:[#allocation9 + $0x460] sm:$0xf0]  ;;  %v5303_v0 = vld [vmem:[#allocation8 + $0x1d8] sm:$0xf] }
 0x233   :  { %2103 = vmatpush.bf16.msra.mxu3 %v5156_v61  ;;  %v5404_v2 = vor.u32 %v6444_v58, %v5401_v60  ;;  %v5351_v58 = vld [vmem:[#allocation9 + $0xb8] sm:$0xf]  ;;  %v6433_v60 = vld [vmem:[#allocation9 + $0xfc] sm:$0xf0] }
 0x236   :  { %2265 = vmatpush.bf16.msrb.mxu1 %v6412_v3  ;;  %v5304_v3 = vor.u32 %v6421_v1, %v5303_v0  ;;  %v5352_v1 = vor.u32 %v6433_v60, %v5351_v58  ;;  %v6475_v58 = vld [vmem:[#allocation8 + $0x3d4] sm:$0xf0]  ;;  %v6474_v60 = vld [vmem:[#allocation8 + $0x394] sm:$0xf] }
 0x23a   :  { %2266 = vmatpush.bf16.msrb.mxu1 %v6411_v8 }
 0x23e   :  { %2267 = vmatpush.bf16.msrb.mxu1 %v6410_v15 }
 0x242   :  { %2268 = vmatpush.bf16.msrb.mxu1 %v6409_v25 }
 0x246   :  { %2269 = vmatpush.bf16.msrb.mxu1 %v6408_v38 }
 0x24a   :  { %2270 = vmatpush.bf16.msrb.mxu1 %v6407_v48  ;;  %v6437_v48 = vld [vmem:[#allocation9 + $0x21c] sm:$0xf0] }
 0x24e   :  { %2271 = vmatpush.bf16.msrb.mxu1 %v6406_v56  ;;  %v5361_v56 = vld [vmem:[#allocation9 + $0x190] sm:$0xf0] }
 0x252   :  { %2511 = vmatpush.bf16.msra.mxu1 %v5404_v2  ;;  %v5353_v2 = vld [vmem:[#allocation9 + $0x100] sm:$0xf0] }
 0x28d   :  { %v1430_v47 = vpop.f32.mrf.mxu0 }
 0x28e   :  { %v1443_v53 = vpop.f32.mrf.mxu1 }
 0x28f   :  { %v1444_v29 = vadd.f32 %v1443_v53, %v1430_v47  ;;  %v6399_v47 = vld [vmem:[#allocation12 + $0x208] sm:$0xff]  ;;  %v5313_v53 = vld [vmem:[#allocation8 + $0x2b0] sm:$0xf0] }
 0x290   :  { %v5316_v54 = vor.u32 %v6422_v51, %v5313_v53  ;;  %v5369_v51 = vld [vmem:[#allocation9 + $0x220] sm:$0xf0]  ;;  %v5359_v53 = vld [vmem:[#allocation9 + $0x148] sm:$0xf] }
 0x291   :  { %v7111_v59 = vadd.f32 %v1444_v29, %v7100_v45  ;;  %v6404_v45 = vld [vmem:[#allocation12 + $0x230] sm:$0xff] }
 0x292   :  { %2252 = vmatpush.bf16.msrb.mxu0 %v6404_v45  ;;  %v6445_v29 = vld [vmem:[#allocation9 + $0x45c] sm:$0xf0]  ;;  %v6420_v45 = vld [vmem:[#allocation8 + $0x1dc] sm:$0xf] }
 0x295   :  { %v1432_v63 = vpop.f32.mrf.mxu0 }
 0x296   :  { %v1445_v62 = vpop.f32.mrf.mxu1  ;;  %2253 = vmatpush.bf16.msrb.mxu0 %v6403_v7 }
 0x297   :  { %v5400_v62 = vor.u32 %v6445_v29, %v5399_v57 }
 0x29a   :  { %2254 = vmatpush.bf16.msrb.mxu0 %v6402_v11  ;;  %v6419_v11 = vld [vmem:[#allocation8 + $0x18c] sm:$0xf0] }
 0x29d   :  { %v1677_v5 = vpop.f32.mrf.mxu0 }
 0x29e   :  { %v1694_v9 = vmax.f32 %v7106_v23, %v1677_v5  ;;  %v1690_v31 = vpop.f32.mrf.mxu1  ;;  %v5391_v5 = vld [vmem:[#allocation9 + $0x388] sm:$0xf] }
 0x29f   :  { %v1695_v32 = vmax.f32 %v7108_v24, %v1690_v31  ;;  %v6401_v24 = vld [vmem:[#allocation12 + $0x218] sm:$0xff]  ;;  %v5393_v31 = vld [vmem:[#allocation9 + $0x3d0] sm:$0xf0] }
 0x2a0   :  { %v1702_v10 = vadd.f32 %v1698_v4, %v1694_v9  ;;  %2255 = vmatpush.bf16.msrb.mxu0 %v6401_v24  ;;  %v5305_v4 = vld [vmem:[#allocation8 + $0x220] sm:$0xf0]  ;;  %v6442_v9 = vld [vmem:[#allocation9 + $0x38c] sm:$0xf]  ;;  %v6417_v24 = vld [vmem:[#allocation8 + $0xfc] sm:$0xf0] }
 0x2a1   :  { %v1703_v14 = vadd.f32 %v1699_v6, %v1695_v32  ;;  %v6443_v6 = vld [vmem:[#allocation9 + $0x3cc] sm:$0xf0]  ;;  %v5308_v7 = vor.u32 %v6420_v45, %v5305_v4  ;;  %v5396_v32 = vor.u32 %v6442_v9, %v5393_v31 }
 0x2a2   :  { %v1704_v39 = vmax.f32 %v1702_v10, 0.0  ;;  %v5392_v8 = vor.u32 %v6443_v6, %v5391_v5  ;;  %v5295_v10 = vld [vmem:[#allocation8 + $0x148] sm:$0xf]  ;;  %v6431_v5 = vld [vmem:[#allocation9 + $0x6c] sm:$0xf0] }
 0x2a3   :  { %v1705_v18 = vmax.f32 %v1703_v14, 0.0  ;;  %v5296_v13 = vor.u32 %v6419_v11, %v5295_v10  ;;  %v5297_v14 = vld [vmem:[#allocation8 + $0x190] sm:$0xf0]  ;;  %2512 = vmatpush.bf16.msra.mxu1 %v5396_v32  ;;  %v6430_v6 = vld [vmem:[#allocation9 + $0x2c] sm:$0xf] }
 0x2a4   :  { %v1706_v20 = vpack.c.bf16 %v1704_v39, %v1704_v39  ;;  %2256 = vmatpush.bf16.msrb.mxu0 %v6400_v37  ;;  %v5300_v15 = vor.u32 %v6418_v12, %v5297_v14  ;;  %v6440_v39 = vld [vmem:[#allocation9 + $0x2fc] sm:$0xf]  ;;  %v5377_v37 = vld [vmem:[#allocation9 + $0x2b0] sm:$0xf0]  ;;  %v6453_v12 = vld [vmem:[#allocation12 + $0x2b8] sm:$0xff] }
 0x2a5   :  { %v1707_v22 = vpack.c.bf16 %v1705_v18, %v1705_v18  ;;  %v1679_v23 = vpop.f32.mrf.mxu0  ;;  %v5384_v18 = vor.u32 %v6441_v17, %v5383_v16  ;;  %v5380_v38 = vor.u32 %v6438_v35, %v5377_v37  ;;  %v2111_v14 = vld [vmem:[#allocation11 + $0x8] sm:$0x3]  ;;  %v6457_v37 = vld [vmem:[#allocation12 + $0x2d8] sm:$0xff] }
 0x2a6   :  { %v1692_v26 = vpop.f32.mrf.mxu1  ;;  %1844 = vmatmul.bf16.vlgmr.msrb.gmra.mxu2 %v1706_v20  ;;  %v5287_v23 = vld [vmem:[#allocation8 + $0xb8] sm:$0xf]  ;;  %v6460_v16 = vld [vmem:[#allocation12 + $0x2f0] sm:$0xff]  ;;  %v2113_v17 = vperm.slane %v2111_v14, 0 }
 0x2a7   :  { %1857 = vmatmul.bf16.vlgmr.msrb.gmra.mxu3 %v1707_v22  ;;  %2376 = vmatpush.bf16.msrb.mxu2 %v5336_v19  ;;  %v5385_v19 = vld [vmem:[#allocation9 + $0x340] sm:$0xf0]  ;;  %v5288_v25 = vor.u32 %v6417_v24, %v5287_v23  ;;  %v6416_v26 = vld [vmem:[#allocation8 + $0xbc] sm:$0xf] }
 0x2a8   :  { %2389 = vmatpush.bf16.msrb.mxu3 %v5340_v21  ;;  %2257 = vmatpush.bf16.msrb.mxu0 %v6399_v47  ;;  %v5388_v22 = vor.u32 %v6440_v39, %v5385_v19  ;;  %v5292_v30 = vor.u32 %v6416_v26, %v5289_v27  ;;  %v5367_v47 = vld [vmem:[#allocation9 + $0x1d8] sm:$0xf] }
 0x2a9   :  { %v5368_v50 = vor.u32 %v6437_v48, %v5367_v47  ;;  %v6459_v19 = vld [vmem:[#allocation12 + $0x2e8] sm:$0xff]  ;;  %v6458_v26 = vld [vmem:[#allocation12 + $0x2e0] sm:$0xff]  ;;  %v5529_v47 = vld [vmem:[#allocation8 + $0x468] sm:$0xf0] }
 0x2aa   :  { %2513 = vmatpush.bf16.msra.mxu1 %v5388_v22 }
 0x2ab   :  { %2377 = vmatpush.bf16.msrb.mxu2 %v5328_v34  ;;  %v6439_v34 = vld [vmem:[#allocation9 + $0x2ac] sm:$0xf0] }
 0x2ac   :  { %2390 = vmatpush.bf16.msrb.mxu3 %v5332_v36  ;;  %2258 = vmatpush.bf16.msrb.mxu0 %v6398_v55  ;;  %v5376_v36 = vor.u32 %v6439_v34, %v5375_v33  ;;  %v6434_v55 = vld [vmem:[#allocation9 + $0x14c] sm:$0xf] }
 0x2ad   :  { %v7119_v61 = vpop.f32.mrf.mxu0  ;;  %v5364_v29 = vor.u32 %v6434_v55, %v5361_v56 }
 0x2ae   :  { %v7121_v63 = vpop.f32.mrf.mxu1  ;;  %2514 = vmatpush.bf16.msra.mxu1 %v5380_v38 }
 0x2af   :  { %2378 = vmatpush.bf16.msrb.mxu2 %v5320_v43  ;;  %v5280_v43 = vor.u32 %v6415_v41, %v5279_v40  ;;  %v6447_v40 = vld [vmem:[#allocation12 + $0x288] sm:$0xff] }
 0x2b0   :  { %2391 = vmatpush.bf16.msrb.mxu3 %v5324_v46  ;;  %2498 = vmatpush.bf16.msra.mxu0 %v5400_v62  ;;  %v5284_v46 = vor.u32 %v6414_v42, %v5281_v44  ;;  %v6432_v62 = vld [vmem:[#allocation9 + $0xbc] sm:$0xf]  ;;  %v5527_v42 = vld [vmem:[#allocation8 + $0x420] sm:$0xf]  ;;  %v6476_v44 = vld [vmem:[#allocation8 + $0x424] sm:$0xf] }
 0x2b1   :  { %v5356_v45 = vor.u32 %v6432_v62, %v5353_v2  ;;  %v6455_v41 = vld [vmem:[#allocation12 + $0x2c8] sm:$0xff]  ;;  %v5532_v48 = vor.u32 %v6476_v44, %v5529_v47 }
 0x2b2   :  { %v5521_v2 = vld [vmem:[#allocation8 + $0x3d8] sm:$0xf0]  ;;  %v6467_v47 = vld [vmem:[#allocation8 + $0x194] sm:$0xf0] }
 0x2b3   :  { %2379 = vmatpush.bf16.msrb.mxu2 %v5312_v52  ;;  %v5372_v52 = vor.u32 %v6436_v49, %v5369_v51  ;;  %v6446_v49 = vld [vmem:[#allocation12 + $0x280] sm:$0xff]  ;;  %v5591_v51 = vld [vmem:[#allocation9 + $0x420] sm:$0xf] }
 0x2b4   :  { %2392 = vmatpush.bf16.msrb.mxu3 %v5316_v54  ;;  %2499 = vmatpush.bf16.msra.mxu0 %v5392_v8  ;;  %v6435_v54 = vld [vmem:[#allocation9 + $0x18c] sm:$0xf0] }
 0x2b5   :  { %v1972_v20 = vpop.f32.mrf.mxu0  ;;  %2515 = vmatpush.bf16.msra.mxu1 %v5372_v52  ;;  %v5360_v57 = vor.u32 %v6435_v54, %v5359_v53  ;;  %v6493_v52 = vld [vmem:[#allocation9 + $0x464] sm:$0xf0]  ;;  %v5593_v53 = vld [vmem:[#allocation9 + $0x468] sm:$0xf0] }
 0x2b6   :  { %2091 = vmatmul.bf16.vlgmr.msra.gmra.mxu2 %v7095_v28  ;;  %v1985_v21 = vpop.f32.mrf.mxu1  ;;  %v5592_v56 = vor.u32 %v6493_v52, %v5591_v51  ;;  %v5551_v51 = vld [vmem:[#allocation9 + $0x150] sm:$0xf]  ;;  %v6483_v52 = vld [vmem:[#allocation9 + $0x194] sm:$0xf0] }
 0x2b7   :  { %2104 = vmatmul.bf16.vlgmr.msra.gmra.mxu3 %v7095_v28  ;;  %2380 = vmatpush.bf16.msrb.mxu2 %v5304_v3  ;;  %v5343_v3 = vld [vmem:[#allocation9 + $0x28] sm:$0xf] }
 0x2b8   :  { %2393 = vmatpush.bf16.msrb.mxu3 %v5308_v7  ;;  %2500 = vmatpush.bf16.msra.mxu0 %v5384_v18  ;;  %v5345_v7 = vld [vmem:[#allocation9 + $0x70] sm:$0xf0]  ;;  %v5344_v31 = vor.u32 %v6431_v5, %v5343_v3  ;;  %v2114_v18 = vperm.slane %v2111_v14, 1  ;;  %v5585_v5 = vld [vmem:[#allocation9 + $0x3d8] sm:$0xf0] }
 0x2b9   :  { %2516 = vmatpush.bf16.msra.mxu1 %v5364_v29  ;;  %v5348_v32 = vor.u32 %v6430_v6, %v5345_v7  ;;  %v5519_v29 = vld [vmem:[#allocation8 + $0x390] sm:$0xf]  ;;  %v5511_v7 = vld [vmem:[#allocation8 + $0x300] sm:$0xf]  ;;  %v6488_v14 = vld [vmem:[#allocation9 + $0x304] sm:$0xf] }
 0x2ba   :  { %v5520_v62 = vor.u32 %v6475_v58, %v5519_v29  ;;  %v5479_v29 = vld [vmem:[#allocation8 + $0xc0] sm:$0xf] }
 0x2bb   :  { %2381 = vmatpush.bf16.msrb.mxu2 %v5296_v13  ;;  %v6461_v13 = vld [vmem:[#allocation12 + $0x2f8] sm:$0xff] }
 0x2bc   :  { %2394 = vmatpush.bf16.msrb.mxu3 %v5300_v15  ;;  %2501 = vmatpush.bf16.msra.mxu0 %v5376_v36  ;;  %v6452_v15 = vld [vmem:[#allocation12 + $0x2b0] sm:$0xff]  ;;  %v6449_v36 = vld [vmem:[#allocation12 + $0x298] sm:$0xff] }
 0x2bd   :  { %2517 = vmatpush.bf16.msra.mxu1 %v5356_v45  ;;  %v5524_v45 = vor.u32 %v6474_v60, %v5521_v2  ;;  %v6465_v60 = vld [vmem:[#allocation8 + $0x104] sm:$0xf0]  ;;  %v5481_v2 = vld [vmem:[#allocation8 + $0x108] sm:$0xf0] }
 0x2bf   :  { %2382 = vmatpush.bf16.msrb.mxu2 %v5288_v25  ;;  %v6450_v25 = vld [vmem:[#allocation12 + $0x2a0] sm:$0xff] }
 0x2c0   :  { %2395 = vmatpush.bf16.msrb.mxu3 %v5292_v30  ;;  %2502 = vmatpush.bf16.msra.mxu0 %v5368_v50  ;;  %v6454_v50 = vld [vmem:[#allocation12 + $0x2c0] sm:$0xff] }
 0x2c1   :  { %2518 = vmatpush.bf16.msra.mxu1 %v5348_v32 }
 0x2c3   :  { %2383 = vmatpush.bf16.msrb.mxu2 %v5280_v43  ;;  %v6477_v43 = vld [vmem:[#allocation8 + $0x464] sm:$0xf0] }
 0x2c4   :  { %2396 = vmatpush.bf16.msrb.mxu3 %v5284_v46  ;;  %2503 = vmatpush.bf16.msra.mxu0 %v5360_v57  ;;  %v5528_v46 = vor.u32 %v6477_v43, %v5527_v42  ;;  %v5561_v43 = vld [vmem:[#allocation9 + $0x228] sm:$0xf0] }
 0x2c6   :  { %2384 = vmatmul.bf16.vlgmr.msrb.gmra.mxu2 %v7095_v28 }
 0x2c7   :  { %2397 = vmatmul.bf16.vlgmr.msrb.gmra.mxu3 %v7095_v28  ;;  %2666 = vmatpush.bf16.msra.mxu2 %v6453_v12  ;;  %v5575_v12 = vld [vmem:[#allocation9 + $0x300] sm:$0xf] }
 0x2c8   :  { %2504 = vmatpush.bf16.msra.mxu0 %v5352_v1  ;;  %2679 = vmatpush.bf16.msra.mxu3 %v6461_v13  ;;  %v6491_v1 = vld [vmem:[#allocation9 + $0x3d4] sm:$0xf0]  ;;  %v6489_v13 = vld [vmem:[#allocation9 + $0x344] sm:$0xf0] }
 0x2cb   :  { %2667 = vmatpush.bf16.msra.mxu2 %v6452_v15  ;;  %v5576_v15 = vor.u32 %v6489_v13, %v5575_v12  ;;  %v5535_v12 = vld [vmem:[#allocation9 + $0x30] sm:$0xf] }
 0x2cc   :  { %2505 = vmatpush.bf16.msra.mxu0 %v5344_v31  ;;  %2680 = vmatpush.bf16.msra.mxu3 %v6460_v16  ;;  %v6472_v31 = vld [vmem:[#allocation8 + $0x304] sm:$0xf]  ;;  %v5577_v16 = vld [vmem:[#allocation9 + $0x348] sm:$0xf0] }
 0x2d0   :  { %2681 = vmatpush.bf16.msra.mxu3 %v6459_v19  ;;  %v6471_v19 = vld [vmem:[#allocation8 + $0x2b4] sm:$0xf0] }
 0x2d4   :  { %2682 = vmatpush.bf16.msra.mxu3 %v6458_v26  ;;  %v6486_v26 = vld [vmem:[#allocation9 + $0x274] sm:$0xf] }
 0x2d8   :  { %2683 = vmatpush.bf16.msra.mxu3 %v6457_v37 }
 0x329   :  { %v1845_v0 = vpop.f32.mrf.mxu2 }
 0x32a   :  { %v1858_v4 = vpop.f32.mrf.mxu3 }
 0x32b   :  { %v1859_v8 = vadd.f32 %v1858_v4, %v1845_v0  ;;  %v5583_v0 = vld [vmem:[#allocation9 + $0x390] sm:$0xf]  ;;  %v6490_v4 = vld [vmem:[#allocation9 + $0x394] sm:$0xf] }
 0x32c   :  { %v5584_v3 = vor.u32 %v6491_v1, %v5583_v0  ;;  %v5588_v6 = vor.u32 %v6490_v4, %v5585_v5  ;;  %v5480_v0 = vor.u32 %v6465_v60, %v5479_v29  ;;  %v6480_v4 = vld [vmem:[#allocation9 + $0xc4] sm:$0xf]  ;;  %v5545_v5 = vld [vmem:[#allocation9 + $0x108] sm:$0xf0]  ;;  %v6523_v29 = vld [vmem:[#allocation8 + $0x3dc] sm:$0xf0] }
 0x32d   :  { %v7126_v9 = vadd.f32 %v1859_v8, %v7111_v59  ;;  %v6451_v59 = vld [vmem:[#allocation12 + $0x2a8] sm:$0xff]  ;;  %v6473_v8 = vld [vmem:[#allocation8 + $0x344] sm:$0xf0] }
 0x32e   :  { %2668 = vmatpush.bf16.msra.mxu2 %v6451_v59  ;;  %v5512_v32 = vor.u32 %v6473_v8, %v5511_v7  ;;  %v5503_v59 = vld [vmem:[#allocation8 + $0x270] sm:$0xf]  ;;  %v6463_v7 = vld [vmem:[#allocation8 + $0x74] sm:$0xf0] }
 0x331   :  { %v1847_v10 = vpop.f32.mrf.mxu2 }
 0x332   :  { %v1860_v11 = vpop.f32.mrf.mxu3  ;;  %2669 = vmatpush.bf16.msra.mxu2 %v6450_v25  ;;  %v5513_v10 = vld [vmem:[#allocation8 + $0x348] sm:$0xf0]  ;;  %v6487_v25 = vld [vmem:[#allocation9 + $0x2b4] sm:$0xf0] }
 0x333   :  { %v5516_v11 = vor.u32 %v6472_v31, %v5513_v10  ;;  %v6462_v10 = vld [vmem:[#allocation8 + $0x34] sm:$0xf] }
 0x336   :  { %2670 = vmatpush.bf16.msra.mxu2 %v6449_v36  ;;  %v6468_v36 = vld [vmem:[#allocation8 + $0x1e4] sm:$0xf] }
 0x339   :  { %v2092_v39 = vpop.f32.mrf.mxu2 }
 0x33a   :  { %v2109_v20 = vmax.f32 %v7119_v61, %v2092_v39  ;;  %v2105_v21 = vpop.f32.mrf.mxu3  ;;  %v6448_v61 = vld [vmem:[#allocation12 + $0x290] sm:$0xff] }
 0x33b   :  { %v2110_v22 = vmax.f32 %v7121_v63, %v2105_v21  ;;  %v6456_v63 = vld [vmem:[#allocation12 + $0x2d0] sm:$0xff]  ;;  %2671 = vmatpush.bf16.msra.mxu2 %v6448_v61  ;;  %v6470_v21 = vld [vmem:[#allocation8 + $0x274] sm:$0xf] }
 0x33c   :  { %v2117_v23 = vadd.f32 %v2113_v17, %v2109_v20  ;;  %2684 = vmatpush.bf16.msra.mxu3 %v6456_v63  ;;  %v5504_v20 = vor.u32 %v6471_v19, %v5503_v59  ;;  %v5559_v63 = vld [vmem:[#allocation9 + $0x1e0] sm:$0xf] }
 0x33d   :  { %v2118_v24 = vadd.f32 %v2114_v18, %v2110_v22  ;;  %v5580_v18 = vor.u32 %v6488_v14, %v5577_v16  ;;  %v5505_v22 = vld [vmem:[#allocation8 + $0x2b8] sm:$0xf0]  ;;  %v6478_v16 = vld [vmem:[#allocation9 + $0x34] sm:$0xf] }
 0x33e   :  { %v2119_v27 = vmax.f32 %v2117_v23, 0.0  ;;  %v5508_v23 = vor.u32 %v6470_v21, %v5505_v22 }
 0x33f   :  { %v2120_v30 = vmax.f32 %v2118_v24, 0.0  ;;  %2672 = vmatpush.bf16.msra.mxu2 %v6447_v40  ;;  %v5567_v24 = vld [vmem:[#allocation9 + $0x270] sm:$0xf]  ;;  %v6485_v40 = vld [vmem:[#allocation9 + $0x224] sm:$0xf0] }
 0x340   :  { %v2121_v33 = vpack.c.bf16 %v2119_v27, %v2119_v27  ;;  %2685 = vmatpush.bf16.msra.mxu3 %v6455_v41  ;;  %v5568_v27 = vor.u32 %v6487_v25, %v5567_v24  ;;  %v6484_v41 = vld [vmem:[#allocation9 + $0x1e4] sm:$0xf]  ;;  %v5560_v42 = vor.u32 %v6485_v40, %v5559_v63  ;;  %v6501_v24 = vld [vmem:[#allocation12 + $0x338] sm:$0xff]  ;;  %v6498_v40 = vld [vmem:[#allocation12 + $0x320] sm:$0xff] }
 0x341   :  { %v2122_v34 = vpack.c.bf16 %v2120_v30, %v2120_v30  ;;  %v2094_v35 = vpop.f32.mrf.mxu2  ;;  %v5569_v30 = vld [vmem:[#allocation9 + $0x2b8] sm:$0xf0]  ;;  %v5564_v44 = vor.u32 %v6484_v41, %v5561_v43  ;;  %v6509_v25 = vld [vmem:[#allocation12 + $0x378] sm:$0xff] }
 0x342   :  { %v2107_v38 = vpop.f32.mrf.mxu3  ;;  %2259 = vmatmul.bf16.vlgmr.msrb.gmra.mxu0 %v2121_v33  ;;  %v5572_v33 = vor.u32 %v6486_v26, %v5569_v30  ;;  %v6469_v35 = vld [vmem:[#allocation8 + $0x224] sm:$0xf0] }
 0x343   :  { %2272 = vmatmul.bf16.vlgmr.msrb.gmra.mxu1 %v2122_v34  ;;  %2791 = vmatpush.bf16.msrb.mxu0 %v5528_v46  ;;  %v5495_v34 = vld [vmem:[#allocation8 + $0x1e0] sm:$0xf]  ;;  %v5497_v38 = vld [vmem:[#allocation8 + $0x228] sm:$0xf0]  ;;  %v5487_v46 = vld [vmem:[#allocation8 + $0x150] sm:$0xf] }
 0x344   :  { %2804 = vmatpush.bf16.msrb.mxu1 %v5532_v48  ;;  %2673 = vmatpush.bf16.msra.mxu2 %v6446_v49  ;;  %v5496_v37 = vor.u32 %v6469_v35, %v5495_v34  ;;  %v5500_v61 = vor.u32 %v6468_v36, %v5497_v38  ;;  %v6466_v48 = vld [vmem:[#allocation8 + $0x154] sm:$0xf]  ;;  %v5488_v49 = vor.u32 %v6467_v47, %v5487_v46  ;;  %v6500_v26 = vld [vmem:[#allocation12 + $0x330] sm:$0xff]  ;;  %v6499_v35 = vld [vmem:[#allocation12 + $0x328] sm:$0xff] }
 0x345   :  { %2686 = vmatpush.bf16.msra.mxu3 %v6454_v50  ;;  %v5489_v50 = vld [vmem:[#allocation8 + $0x198] sm:$0xf0]  ;;  %v5719_v41 = vld [vmem:[#allocation8 + $0x428] sm:$0xf]  ;;  %v6524_v46 = vld [vmem:[#allocation8 + $0x42c] sm:$0xf] }
 0x346   :  { %v6507_v36 = vld [vmem:[#allocation12 + $0x368] sm:$0xff]  ;;  %v5721_v47 = vld [vmem:[#allocation8 + $0x470] sm:$0xf0] }
 0x347   :  { %2792 = vmatpush.bf16.msrb.mxu0 %v5520_v62  ;;  %v6464_v62 = vld [vmem:[#allocation8 + $0xc4] sm:$0xf] }
 0x348   :  { %2913 = vmatpush.bf16.msrb.mxu2 %v5592_v56  ;;  %2805 = vmatpush.bf16.msrb.mxu1 %v5524_v45  ;;  %v6482_v56 = vld [vmem:[#allocation9 + $0x154] sm:$0xf]  ;;  %v5484_v1 = vor.u32 %v6464_v62, %v5481_v2  ;;  %v5543_v45 = vld [vmem:[#allocation9 + $0xc0] sm:$0xf]  ;;  %v5713_v62 = vld [vmem:[#allocation8 + $0x3e0] sm:$0xf0] }
 0x349   :  { %v7132_v54 = vpop.f32.mrf.mxu2 }
 0x34a   :  { %v7134_v55 = vpop.f32.mrf.mxu3 }
 0x34b   :  { %2793 = vmatpush.bf16.msrb.mxu0 %v5512_v32  ;;  %v5548_v32 = vor.u32 %v6480_v4, %v5545_v5  ;;  %v6520_v4 = vld [vmem:[#allocation8 + $0x30c] sm:$0xf] }
 0x34c   :  { %2914 = vmatpush.bf16.msrb.mxu2 %v5584_v3  ;;  %2806 = vmatpush.bf16.msrb.mxu1 %v5516_v11  ;;  %v6481_v3 = vld [vmem:[#allocation9 + $0x104] sm:$0xf0]  ;;  %v5473_v11 = vld [vmem:[#allocation8 + $0x78] sm:$0xf0] }
 0x34d   :  { %v5544_v31 = vor.u32 %v6481_v3, %v5543_v45  ;;  %v5703_v45 = vld [vmem:[#allocation8 + $0x308] sm:$0xf]  ;;  %v6521_v3 = vld [vmem:[#allocation8 + $0x34c] sm:$0xf0] }
 0x34e   :  { %v5704_v5 = vor.u32 %v6521_v3, %v5703_v45  ;;  %v5663_v45 = vld [vmem:[#allocation8 + $0x38] sm:$0xf]  ;;  %v6511_v3 = vld [vmem:[#allocation8 + $0x7c] sm:$0xf0] }
 0x34f   :  { %2794 = vmatpush.bf16.msrb.mxu0 %v5504_v20 }
 0x350   :  { %2915 = vmatpush.bf16.msrb.mxu2 %v5576_v15  ;;  %2807 = vmatpush.bf16.msrb.mxu1 %v5508_v23  ;;  %v6479_v15 = vld [vmem:[#allocation9 + $0x74] sm:$0xf0] }
 0x351   :  { %v2387_v17 = vpop.f32.mrf.mxu2  ;;  %v5536_v19 = vor.u32 %v6479_v15, %v5535_v12  ;;  %v7139_v23 = vld [vmem:[#allocation4] sm:$0xf] }
 0x352   :  { %2506 = vmatmul.bf16.vlgmr.msra.gmra.mxu0 %v7095_v28  ;;  %v2400_v39 = vpop.f32.mrf.mxu3  ;;  %v5537_v17 = vld [vmem:[#allocation9 + $0x78] sm:$0xf0]  ;;  %v6494_v15 = vld [vmem:[#allocation12 + $0x300] sm:$0xff] }
 0x353   :  { %2519 = vmatmul.bf16.vlgmr.msra.gmra.mxu1 %v7095_v28  ;;  %v6492_v28 = vld [vmem:[#allocation9 + $0x424] sm:$0xf]  ;;  %2795 = vmatpush.bf16.msrb.mxu0 %v5496_v37  ;;  %v5540_v20 = vor.u32 %v6478_v16, %v5537_v17  ;;  %v6502_v16 = vld [vmem:[#allocation12 + $0x340] sm:$0xff]  ;;  %v5783_v17 = vld [vmem:[#allocation9 + $0x428] sm:$0xf] }
 0x354   :  { %v5596_v57 = vor.u32 %v6492_v28, %v5593_v53  ;;  %2916 = vmatpush.bf16.msrb.mxu2 %v5568_v27  ;;  %2808 = vmatpush.bf16.msrb.mxu1 %v5500_v61  ;;  %v5492_v28 = vor.u32 %v6466_v48, %v5489_v50  ;;  %v5552_v53 = vor.u32 %v6483_v52, %v5551_v51  ;;  %v6508_v27 = vld [vmem:[#allocation12 + $0x370] sm:$0xff] }
 0x355   :  { %v5724_v52 = vor.u32 %v6524_v46, %v5721_v47  ;;  %v5767_v46 = vld [vmem:[#allocation9 + $0x308] sm:$0xf]  ;;  %v6537_v47 = vld [vmem:[#allocation9 + $0x34c] sm:$0xf0] }
 0x356   :  { %2926 = vmatpush.bf16.msrb.mxu3 %v5596_v57  ;;  %v5553_v57 = vld [vmem:[#allocation9 + $0x198] sm:$0xf0] }
 0x357   :  { %2796 = vmatpush.bf16.msrb.mxu0 %v5488_v49  ;;  %v5556_v58 = vor.u32 %v6482_v56, %v5553_v57  ;;  %v5711_v57 = vld [vmem:[#allocation8 + $0x398] sm:$0xf] }
 0x358   :  { %2917 = vmatpush.bf16.msrb.mxu2 %v5560_v42  ;;  %2809 = vmatpush.bf16.msrb.mxu1 %v5492_v28  ;;  %v6525_v42 = vld [vmem:[#allocation8 + $0x46c] sm:$0xf0]  ;;  %v5712_v60 = vor.u32 %v6523_v29, %v5711_v57  ;;  %v5673_v57 = vld [vmem:[#allocation8 + $0x110] sm:$0xf0] }
 0x359   :  { %v5720_v50 = vor.u32 %v6525_v42, %v5719_v41  ;;  %v6514_v41 = vld [vmem:[#allocation8 + $0x15c] sm:$0xf] }
 0x35a   :  { %2927 = vmatpush.bf16.msrb.mxu3 %v5588_v6  ;;  %v5471_v6 = vld [vmem:[#allocation8 + $0x30] sm:$0xf] }
 0x35b   :  { %2797 = vmatpush.bf16.msrb.mxu0 %v5480_v0  ;;  %v5472_v14 = vor.u32 %v6463_v7, %v5471_v6  ;;  %v6496_v0 = vld [vmem:[#allocation12 + $0x310] sm:$0xff]  ;;  %v5705_v6 = vld [vmem:[#allocation8 + $0x350] sm:$0xf0] }
 0x35c   :  { %2918 = vmatpush.bf16.msrb.mxu2 %v5552_v53  ;;  %2810 = vmatpush.bf16.msrb.mxu1 %v5484_v1  ;;  %v6505_v53 = vld [vmem:[#allocation12 + $0x358] sm:$0xff]  ;;  %v6504_v1 = vld [vmem:[#allocation12 + $0x350] sm:$0xff]  ;;  %v5708_v7 = vor.u32 %v6520_v4, %v5705_v6  ;;  %v6510_v4 = vld [vmem:[#allocation8 + $0x3c] sm:$0xf] }
 0x35d   :  { %v5665_v6 = vld [vmem:[#allocation8 + $0x80] sm:$0xf0] }
 0x35e   :  { %2928 = vmatpush.bf16.msrb.mxu3 %v5580_v18  ;;  %v5476_v18 = vor.u32 %v6462_v10, %v5473_v11  ;;  %v6519_v10 = vld [vmem:[#allocation8 + $0x2bc] sm:$0xf0]  ;;  %v6518_v11 = vld [vmem:[#allocation8 + $0x27c] sm:$0xf] }
 0x35f   :  { %2798 = vmatpush.bf16.msrb.mxu0 %v5472_v14 }
 0x360   :  { %2919 = vmatpush.bf16.msrb.mxu2 %v5544_v31  ;;  %2811 = vmatpush.bf16.msrb.mxu1 %v5476_v18  ;;  %v6503_v31 = vld [vmem:[#allocation12 + $0x348] sm:$0xff]  ;;  %v6540_v18 = vld [vmem:[#allocation9 + $0x42c] sm:$0xf] }
 0x362   :  { %2929 = vmatpush.bf16.msrb.mxu3 %v5572_v33  ;;  %2799 = vmatmul.bf16.vlgmr.msrb.gmra.mxu0 %v7139_v23 }
 0x363   :  { %2812 = vmatmul.bf16.vlgmr.msrb.gmra.mxu1 %v7139_v23  ;;  %3081 = vmatpush.bf16.msra.mxu0 %v6501_v24 }
 0x364   :  { %2920 = vmatpush.bf16.msrb.mxu2 %v5536_v19  ;;  %3094 = vmatpush.bf16.msra.mxu1 %v6509_v25  ;;  %v5785_v19 = vld [vmem:[#allocation9 + $0x470] sm:$0xf0]  ;;  %v5687_v25 = vld [vmem:[#allocation8 + $0x1e8] sm:$0xf] }
 0x365   :  { %v5788_v24 = vor.u32 %v6540_v18, %v5785_v19  ;;  %v5735_v18 = vld [vmem:[#allocation9 + $0xc8] sm:$0xf]  ;;  %v6529_v19 = vld [vmem:[#allocation9 + $0x10c] sm:$0xf0] }
 0x366   :  { %2930 = vmatpush.bf16.msrb.mxu3 %v5564_v44  ;;  %v6506_v44 = vld [vmem:[#allocation12 + $0x360] sm:$0xff] }
 0x367   :  { %3082 = vmatpush.bf16.msra.mxu0 %v6500_v26  ;;  %v6516_v26 = vld [vmem:[#allocation8 + $0x1ec] sm:$0xf] }
 0x368   :  { %3095 = vmatpush.bf16.msra.mxu1 %v6508_v27 }
 0x36a   :  { %2931 = vmatpush.bf16.msrb.mxu3 %v5556_v58  ;;  %v6522_v58 = vld [vmem:[#allocation8 + $0x39c] sm:$0xf] }
 0x36b   :  { %3083 = vmatpush.bf16.msra.mxu0 %v6499_v35  ;;  %v5716_v2 = vor.u32 %v6522_v58, %v5713_v62  ;;  %v5759_v58 = vld [vmem:[#allocation9 + $0x278] sm:$0xf]  ;;  %v6534_v62 = vld [vmem:[#allocation9 + $0x27c] sm:$0xf] }
 0x36c   :  { %3096 = vmatpush.bf16.msra.mxu1 %v6507_v36 }
 0x36e   :  { %2932 = vmatpush.bf16.msrb.mxu3 %v5548_v32  ;;  %v5695_v32 = vld [vmem:[#allocation8 + $0x278] sm:$0xf] }
 0x36f   :  { %3084 = vmatpush.bf16.msra.mxu0 %v6498_v40  ;;  %v5696_v12 = vor.u32 %v6519_v10, %v5695_v32  ;;  %v6515_v40 = vld [vmem:[#allocation8 + $0x19c] sm:$0xf0]  ;;  %v6532_v32 = vld [vmem:[#allocation9 + $0x1ec] sm:$0xf] }
 0x370   :  { %3097 = vmatpush.bf16.msra.mxu1 %v6506_v44 }
 0x372   :  { %2933 = vmatpush.bf16.msrb.mxu3 %v5540_v20 }
 0x374   :  { %3098 = vmatpush.bf16.msra.mxu1 %v6505_v53 }
 0x378   :  { %3099 = vmatpush.bf16.msra.mxu1 %v6504_v1 }
 0x37c   :  { %3100 = vmatpush.bf16.msra.mxu1 %v6503_v31  ;;  %v6533_v31 = vld [vmem:[#allocation9 + $0x22c] sm:$0xf0] }
 0x380   :  { %3101 = vmatpush.bf16.msra.mxu1 %v6502_v16  ;;  %v5745_v16 = vld [vmem:[#allocation9 + $0x1a0] sm:$0xf0] }
 0x384   :  { %3341 = vmatpush.bf16.msrb.mxu1 %v5788_v24  ;;  %v5737_v24 = vld [vmem:[#allocation9 + $0x110] sm:$0xf0] }
 0x3bf   :  { %v2260_v8 = vpop.f32.mrf.mxu0 }
 0x3c0   :  { %v2273_v13 = vpop.f32.mrf.mxu1 }
 0x3c1   :  { %v2274_v39 = vadd.f32 %v2273_v13, %v2260_v8  ;;  %v6495_v8 = vld [vmem:[#allocation12 + $0x308] sm:$0xff]  ;;  %v5697_v13 = vld [vmem:[#allocation8 + $0x2c0] sm:$0xf0] }
 0x3c2   :  { %v5700_v14 = vor.u32 %v6518_v11, %v5697_v13  ;;  %v5753_v11 = vld [vmem:[#allocation9 + $0x230] sm:$0xf0]  ;;  %v5743_v13 = vld [vmem:[#allocation9 + $0x158] sm:$0xf] }
 0x3c3   :  { %v7137_v59 = vadd.f32 %v2274_v39, %v7126_v9  ;;  %v2526_v9 = vld [vmem:[#allocation11 + $0xa] sm:$0x3]  ;;  %v6541_v39 = vld [vmem:[#allocation9 + $0x46c] sm:$0xf0] }
 0x3c4   :  { %v2528_v30 = vperm.slane %v2526_v9, 0  ;;  %v2529_v34 = vperm.slane %v2526_v9, 1  ;;  %v6517_v9 = vld [vmem:[#allocation8 + $0x22c] sm:$0xf0] }
 0x3c5   :  { %v5688_v27 = vor.u32 %v6517_v9, %v5687_v25  ;;  %v5736_v9 = vor.u32 %v6529_v19, %v5735_v18  ;;  %v5903_v18 = vld [vmem:[#allocation8 + $0x3a0] sm:$0xf]  ;;  %v6571_v19 = vld [vmem:[#allocation8 + $0x3e4] sm:$0xf0] }
 0x3c7   :  { %v2262_v21 = vpop.f32.mrf.mxu0 }
 0x3c8   :  { %v2275_v22 = vpop.f32.mrf.mxu1 }
 0x3c9   :  { %v5784_v22 = vor.u32 %v6541_v39, %v5783_v17 }
 0x3cf   :  { %v2507_v33 = vpop.f32.mrf.mxu0 }
 0x3d0   :  { %v2524_v37 = vmax.f32 %v7132_v54, %v2507_v33  ;;  %v2520_v38 = vpop.f32.mrf.mxu1  ;;  %v5775_v33 = vld [vmem:[#allocation9 + $0x398] sm:$0xf] }
 0x3d1   :  { %v2525_v61 = vmax.f32 %v7134_v55, %v2520_v38  ;;  %v6497_v55 = vld [vmem:[#allocation12 + $0x318] sm:$0xff]  ;;  %v5777_v38 = vld [vmem:[#allocation9 + $0x3e0] sm:$0xf0] }
 0x3d2   :  { %v2532_v63 = vadd.f32 %v2528_v30, %v2524_v37  ;;  %3085 = vmatpush.bf16.msra.mxu0 %v6497_v55  ;;  %v5689_v30 = vld [vmem:[#allocation8 + $0x230] sm:$0xf0]  ;;  %v6538_v37 = vld [vmem:[#allocation9 + $0x39c] sm:$0xf]  ;;  %v6513_v55 = vld [vmem:[#allocation8 + $0x10c] sm:$0xf0] }
 0x3d3   :  { %v2533_v43 = vadd.f32 %v2529_v34, %v2525_v61  ;;  %v6539_v34 = vld [vmem:[#allocation9 + $0x3dc] sm:$0xf0]  ;;  %v5692_v35 = vor.u32 %v6516_v26, %v5689_v30  ;;  %v5780_v61 = vor.u32 %v6538_v37, %v5777_v38 }
 0x3d4   :  { %v2534_v48 = vmax.f32 %v2532_v63, 0.0  ;;  %v5776_v36 = vor.u32 %v6539_v34, %v5775_v33  ;;  %v5679_v63 = vld [vmem:[#allocation8 + $0x158] sm:$0xf]  ;;  %v6527_v33 = vld [vmem:[#allocation9 + $0x7c] sm:$0xf0] }
 0x3d5   :  { %v2535_v49 = vmax.f32 %v2533_v43, 0.0  ;;  %v5680_v42 = vor.u32 %v6515_v40, %v5679_v63  ;;  %v5681_v43 = vld [vmem:[#allocation8 + $0x1a0] sm:$0xf0]  ;;  %3342 = vmatpush.bf16.msrb.mxu1 %v5780_v61  ;;  %v6526_v34 = vld [vmem:[#allocation9 + $0x3c] sm:$0xf] }
 0x3d6   :  { %v2536_v51 = vpack.c.bf16 %v2534_v48, %v2534_v48  ;;  %3086 = vmatpush.bf16.msra.mxu0 %v6496_v0  ;;  %v5684_v44 = vor.u32 %v6514_v41, %v5681_v43  ;;  %v6536_v48 = vld [vmem:[#allocation9 + $0x30c] sm:$0xf]  ;;  %v5761_v0 = vld [vmem:[#allocation9 + $0x2c0] sm:$0xf0] }
 0x3d7   :  { %v2537_v28 = vpack.c.bf16 %v2535_v49, %v2535_v49  ;;  %v2509_v54 = vpop.f32.mrf.mxu0  ;;  %v5768_v49 = vor.u32 %v6537_v47, %v5767_v46  ;;  %v5764_v1 = vor.u32 %v6534_v62, %v5761_v0  ;;  %v6549_v41 = vld [vmem:[#allocation12 + $0x3b8] sm:$0xff]  ;;  %v6556_v46 = vld [vmem:[#allocation12 + $0x3f0] sm:$0xff] }
 0x3d8   :  { %v2522_v56 = vpop.f32.mrf.mxu1  ;;  %2674 = vmatmul.bf16.vlgmr.msra.gmra.mxu2 %v2536_v51  ;;  %v5671_v54 = vld [vmem:[#allocation8 + $0xc8] sm:$0xf]  ;;  %v2941_v43 = vld [vmem:[#allocation11 + $0xc] sm:$0x3] }
 0x3d9   :  { %2687 = vmatmul.bf16.vlgmr.msra.gmra.mxu3 %v2537_v28  ;;  %3206 = vmatpush.bf16.msra.mxu2 %v5720_v50  ;;  %v5769_v50 = vld [vmem:[#allocation9 + $0x350] sm:$0xf0]  ;;  %v5672_v53 = vor.u32 %v6513_v55, %v5671_v54  ;;  %v6512_v56 = vld [vmem:[#allocation8 + $0xcc] sm:$0xf]  ;;  %v2943_v47 = vperm.slane %v2941_v43, 0 }
 0x3da   :  { %3219 = vmatpush.bf16.msra.mxu3 %v5724_v52  ;;  %3087 = vmatpush.bf16.msra.mxu0 %v6495_v8  ;;  %v5772_v28 = vor.u32 %v6536_v48, %v5769_v50  ;;  %v5676_v29 = vor.u32 %v6512_v56, %v5673_v57  ;;  %v5751_v8 = vld [vmem:[#allocation9 + $0x1e8] sm:$0xf]  ;;  %v6555_v50 = vld [vmem:[#allocation12 + $0x3e8] sm:$0xff]  ;;  %v6554_v56 = vld [vmem:[#allocation12 + $0x3e0] sm:$0xff] }
 0x3db   :  { %v5752_v10 = vor.u32 %v6533_v31, %v5751_v8  ;;  %v6553_v0 = vld [vmem:[#allocation12 + $0x3d8] sm:$0xff]  ;;  %v5913_v8 = vld [vmem:[#allocation8 + $0x478] sm:$0xf0] }
 0x3dc   :  { %3343 = vmatpush.bf16.msrb.mxu1 %v5772_v28 }
 0x3dd   :  { %3207 = vmatpush.bf16.msra.mxu2 %v5712_v60  ;;  %v6535_v60 = vld [vmem:[#allocation9 + $0x2bc] sm:$0xf0] }
 0x3de   :  { %3220 = vmatpush.bf16.msra.mxu3 %v5716_v2  ;;  %3088 = vmatpush.bf16.msra.mxu0 %v6494_v15  ;;  %v5760_v2 = vor.u32 %v6535_v60, %v5759_v58  ;;  %v6530_v15 = vld [vmem:[#allocation9 + $0x15c] sm:$0xf] }
 0x3df   :  { %v7147_v20 = vpop.f32.mrf.mxu0  ;;  %v5748_v39 = vor.u32 %v6530_v15, %v5745_v16 }
 0x3e0   :  { %v7149_v21 = vpop.f32.mrf.mxu1  ;;  %3344 = vmatpush.bf16.msrb.mxu1 %v5764_v1 }
 0x3e1   :  { %3208 = vmatpush.bf16.msra.mxu2 %v5704_v5  ;;  %v5664_v5 = vor.u32 %v6511_v3, %v5663_v45  ;;  %v6543_v45 = vld [vmem:[#allocation12 + $0x388] sm:$0xff] }
 0x3e2   :  { %3221 = vmatpush.bf16.msra.mxu3 %v5708_v7  ;;  %3328 = vmatpush.bf16.msrb.mxu0 %v5784_v22  ;;  %v5668_v7 = vor.u32 %v6510_v4, %v5665_v6  ;;  %v6528_v22 = vld [vmem:[#allocation9 + $0xcc] sm:$0xf]  ;;  %v6551_v3 = vld [vmem:[#allocation12 + $0x3c8] sm:$0xff]  ;;  %v5911_v4 = vld [vmem:[#allocation8 + $0x430] sm:$0xf] }
 0x3e3   :  { %v5740_v26 = vor.u32 %v6528_v22, %v5737_v24  ;;  %v6572_v6 = vld [vmem:[#allocation8 + $0x434] sm:$0xf]  ;;  %v6570_v22 = vld [vmem:[#allocation8 + $0x3a4] sm:$0xf]  ;;  %v5904_v24 = vor.u32 %v6571_v19, %v5903_v18  ;;  %v5937_v18 = vld [vmem:[#allocation9 + $0x1a8] sm:$0xf0] }
 0x3e4   :  { %v5916_v31 = vor.u32 %v6572_v6, %v5913_v8  ;;  %v5945_v6 = vld [vmem:[#allocation9 + $0x238] sm:$0xf0]  ;;  %v5871_v8 = vld [vmem:[#allocation8 + $0x160] sm:$0xf]  ;;  %v5863_v19 = vld [vmem:[#allocation8 + $0xd0] sm:$0xf] }
 0x3e5   :  { %3209 = vmatpush.bf16.msra.mxu2 %v5696_v12  ;;  %v5756_v12 = vor.u32 %v6532_v32, %v5753_v11  ;;  %v6542_v32 = vld [vmem:[#allocation12 + $0x380] sm:$0xff] }
 0x3e6   :  { %3222 = vmatpush.bf16.msra.mxu3 %v5700_v14  ;;  %3329 = vmatpush.bf16.msrb.mxu0 %v5776_v36  ;;  %v6531_v14 = vld [vmem:[#allocation9 + $0x19c] sm:$0xf0]  ;;  %v5975_v11 = vld [vmem:[#allocation9 + $0x430] sm:$0xf] }
 0x3e7   :  { %v2802_v51 = vpop.f32.mrf.mxu0  ;;  %3345 = vmatpush.bf16.msrb.mxu1 %v5756_v12  ;;  %v5744_v17 = vor.u32 %v6531_v14, %v5743_v13  ;;  %v6589_v12 = vld [vmem:[#allocation9 + $0x474] sm:$0xf0]  ;;  %v6588_v13 = vld [vmem:[#allocation9 + $0x434] sm:$0xf]  ;;  %v5977_v14 = vld [vmem:[#allocation9 + $0x478] sm:$0xf0] }
 0x3e8   :  { %2921 = vmatmul.bf16.vlgmr.msrb.gmra.mxu2 %v7139_v23  ;;  %v2815_v52 = vpop.f32.mrf.mxu1 }
 0x3e9   :  { %2934 = vmatmul.bf16.vlgmr.msrb.gmra.mxu3 %v7139_v23  ;;  %3210 = vmatpush.bf16.msra.mxu2 %v5688_v27  ;;  %v5727_v27 = vld [vmem:[#allocation9 + $0x38] sm:$0xf] }
 0x3ea   :  { %3223 = vmatpush.bf16.msra.mxu3 %v5692_v35  ;;  %3330 = vmatpush.bf16.msrb.mxu0 %v5768_v49  ;;  %v5729_v35 = vld [vmem:[#allocation9 + $0x80] sm:$0xf0]  ;;  %v5728_v38 = vor.u32 %v6527_v33, %v5727_v27  ;;  %v2944_v49 = vperm.slane %v2941_v43, 1  ;;  %v6585_v43 = vld [vmem:[#allocation9 + $0x354] sm:$0xf0] }
 0x3eb   :  { %3346 = vmatpush.bf16.msrb.mxu1 %v5748_v39  ;;  %v5732_v61 = vor.u32 %v6526_v34, %v5729_v35  ;;  %v5980_v39 = vor.u32 %v6588_v13, %v5977_v14  ;;  %v6586_v33 = vld [vmem:[#allocation9 + $0x3a4] sm:$0xf]  ;;  %v5969_v34 = vld [vmem:[#allocation9 + $0x3e8] sm:$0xf0]  ;;  %v6579_v13 = vld [vmem:[#allocation9 + $0x1a4] sm:$0xf0] }
 0x3ec   :  { %v5972_v35 = vor.u32 %v6586_v33, %v5969_v34  ;;  %v6577_v33 = vld [vmem:[#allocation9 + $0x114] sm:$0xf0]  ;;  %v6576_v34 = vld [vmem:[#allocation9 + $0xd4] sm:$0xf] }
 0x3ed   :  { %3211 = vmatpush.bf16.msra.mxu2 %v5680_v42  ;;  %v6557_v42 = vld [vmem:[#allocation12 + $0x3f8] sm:$0xff] }
 0x3ee   :  { %3224 = vmatpush.bf16.msra.mxu3 %v5684_v44  ;;  %3331 = vmatpush.bf16.msrb.mxu0 %v5760_v2  ;;  %v6548_v44 = vld [vmem:[#allocation12 + $0x3b0] sm:$0xff]  ;;  %v6545_v2 = vld [vmem:[#allocation12 + $0x398] sm:$0xff] }
 0x3ef   :  { %3347 = vmatpush.bf16.msrb.mxu1 %v5740_v26  ;;  %v6587_v26 = vld [vmem:[#allocation9 + $0x3e4] sm:$0xf0] }
 0x3f1   :  { %3212 = vmatpush.bf16.msra.mxu2 %v5672_v53  ;;  %v6546_v53 = vld [vmem:[#allocation12 + $0x3a0] sm:$0xff] }
 0x3f2   :  { %3225 = vmatpush.bf16.msra.mxu3 %v5676_v29  ;;  %3332 = vmatpush.bf16.msrb.mxu0 %v5752_v10  ;;  %v6550_v10 = vld [vmem:[#allocation12 + $0x3c0] sm:$0xff] }
 0x3f3   :  { %3348 = vmatpush.bf16.msrb.mxu1 %v5732_v61  ;;  %v6568_v61 = vld [vmem:[#allocation8 + $0x314] sm:$0xf] }
 0x3f5   :  { %3213 = vmatpush.bf16.msra.mxu2 %v5664_v5  ;;  %v6573_v5 = vld [vmem:[#allocation8 + $0x474] sm:$0xf0] }
 0x3f6   :  { %3226 = vmatpush.bf16.msra.mxu3 %v5668_v7  ;;  %3333 = vmatpush.bf16.msrb.mxu0 %v5744_v17  ;;  %v5912_v7 = vor.u32 %v6573_v5, %v5911_v4  ;;  %v5976_v17 = vor.u32 %v6589_v12, %v5975_v11  ;;  %v6580_v4 = vld [vmem:[#allocation9 + $0x1f4] sm:$0xf]  ;;  %v5873_v11 = vld [vmem:[#allocation8 + $0x1a8] sm:$0xf0]  ;;  %v5935_v12 = vld [vmem:[#allocation9 + $0x160] sm:$0xf] }
 0x3f8   :  { %3214 = vmatmul.bf16.vlgmr.msra.gmra.mxu2 %v7139_v23 }
 0x3f9   :  { %3227 = vmatmul.bf16.vlgmr.msra.gmra.mxu3 %v7139_v23  ;;  %3496 = vmatpush.bf16.msrb.mxu2 %v6549_v41 }
 0x3fa   :  { %3334 = vmatpush.bf16.msrb.mxu0 %v5736_v9  ;;  %3509 = vmatpush.bf16.msrb.mxu3 %v6557_v42  ;;  %v5967_v9 = vld [vmem:[#allocation9 + $0x3a0] sm:$0xf]  ;;  %v5959_v42 = vld [vmem:[#allocation9 + $0x310] sm:$0xf] }
 0x3fd   :  { %3497 = vmatpush.bf16.msrb.mxu2 %v6548_v44  ;;  %v6584_v44 = vld [vmem:[#allocation9 + $0x314] sm:$0xf] }
 0x3fe   :  { %3335 = vmatpush.bf16.msrb.mxu0 %v5728_v38  ;;  %3510 = vmatpush.bf16.msrb.mxu3 %v6556_v46  ;;  %v6569_v38 = vld [vmem:[#allocation8 + $0x354] sm:$0xf0]  ;;  %v5960_v46 = vor.u32 %v6585_v43, %v5959_v42  ;;  %v5857_v42 = vld [vmem:[#allocation8 + $0x88] sm:$0xf0]  ;;  %v5919_v43 = vld [vmem:[#allocation9 + $0x40] sm:$0xf] }
 0x402   :  { %3511 = vmatpush.bf16.msrb.mxu3 %v6555_v50  ;;  %v5887_v50 = vld [vmem:[#allocation8 + $0x280] sm:$0xf] }
 0x406   :  { %3512 = vmatpush.bf16.msrb.mxu3 %v6554_v56  ;;  %v6583_v56 = vld [vmem:[#allocation9 + $0x2c4] sm:$0xf0] }
 0x40a   :  { %3513 = vmatpush.bf16.msrb.mxu3 %v6553_v0  ;;  %v6564_v0 = vld [vmem:[#allocation8 + $0x1f4] sm:$0xf] }
 0x45b   :  { %v2675_v25 = vpop.f32.mrf.mxu2 }
 0x45c   :  { %v2688_v30 = vpop.f32.mrf.mxu3 }
 0x45d   :  { %v2689_v36 = vadd.f32 %v2688_v30, %v2675_v25  ;;  %v5905_v25 = vld [vmem:[#allocation8 + $0x3e8] sm:$0xf0]  ;;  %v5968_v30 = vor.u32 %v6587_v26, %v5967_v9  ;;  %v5865_v9 = vld [vmem:[#allocation8 + $0x118] sm:$0xf0] }
 0x45e   :  { %v5908_v27 = vor.u32 %v6570_v22, %v5905_v25  ;;  %v6560_v25 = vld [vmem:[#allocation8 + $0xd4] sm:$0xf] }
 0x45f   :  { %v7154_v37 = vadd.f32 %v2689_v36, %v7137_v59  ;;  %v6547_v59 = vld [vmem:[#allocation12 + $0x3a8] sm:$0xff]  ;;  %v5895_v36 = vld [vmem:[#allocation8 + $0x310] sm:$0xf] }
 0x460   :  { %3498 = vmatpush.bf16.msrb.mxu2 %v6547_v59 }
 0x463   :  { %v2677_v63 = vpop.f32.mrf.mxu2 }
 0x464   :  { %v2690_v40 = vpop.f32.mrf.mxu3  ;;  %3499 = vmatpush.bf16.msrb.mxu2 %v6546_v53  ;;  %v5896_v63 = vor.u32 %v6569_v38, %v5895_v36  ;;  %v5951_v53 = vld [vmem:[#allocation9 + $0x280] sm:$0xf]  ;;  %v6559_v38 = vld [vmem:[#allocation8 + $0x84] sm:$0xf0] }
 0x465   :  { %v5897_v40 = vld [vmem:[#allocation8 + $0x358] sm:$0xf0]  ;;  %v5855_v36 = vld [vmem:[#allocation8 + $0x40] sm:$0xf] }
 0x466   :  { %v5900_v41 = vor.u32 %v6568_v61, %v5897_v40 }
 0x468   :  { %3500 = vmatpush.bf16.msrb.mxu2 %v6545_v2  ;;  %v6565_v2 = vld [vmem:[#allocation8 + $0x234] sm:$0xf0] }
 0x46b   :  { %v2922_v48 = vpop.f32.mrf.mxu2 }
 0x46c   :  { %v2939_v51 = vmax.f32 %v7147_v20, %v2922_v48  ;;  %v2935_v52 = vpop.f32.mrf.mxu3  ;;  %v6544_v20 = vld [vmem:[#allocation12 + $0x390] sm:$0xff] }
 0x46d   :  { %v2940_v28 = vmax.f32 %v7149_v21, %v2935_v52  ;;  %v6552_v21 = vld [vmem:[#allocation12 + $0x3d0] sm:$0xff]  ;;  %3501 = vmatpush.bf16.msrb.mxu2 %v6544_v20  ;;  %v5881_v20 = vld [vmem:[#allocation8 + $0x238] sm:$0xf0] }
 0x46e   :  { %v2947_v54 = vadd.f32 %v2943_v47, %v2939_v51  ;;  %3514 = vmatpush.bf16.msrb.mxu3 %v6552_v21  ;;  %v5961_v47 = vld [vmem:[#allocation9 + $0x358] sm:$0xf0]  ;;  %v6567_v51 = vld [vmem:[#allocation8 + $0x2c4] sm:$0xf0]  ;;  %v5884_v21 = vor.u32 %v6564_v0, %v5881_v20 }
 0x46f   :  { %v2948_v55 = vadd.f32 %v2944_v49, %v2940_v28  ;;  %v5964_v59 = vor.u32 %v6584_v44, %v5961_v47  ;;  %v5888_v52 = vor.u32 %v6567_v51, %v5887_v50  ;;  %v6566_v28 = vld [vmem:[#allocation8 + $0x284] sm:$0xf]  ;;  %v6575_v47 = vld [vmem:[#allocation9 + $0x84] sm:$0xf0] }
 0x470   :  { %v2949_v57 = vmax.f32 %v2947_v54, 0.0  ;;  %v5889_v54 = vld [vmem:[#allocation8 + $0x2c8] sm:$0xf0] }
 0x471   :  { %v2950_v29 = vmax.f32 %v2948_v55, 0.0  ;;  %3502 = vmatpush.bf16.msrb.mxu2 %v6543_v45  ;;  %v5892_v55 = vor.u32 %v6566_v28, %v5889_v54  ;;  %v5943_v45 = vld [vmem:[#allocation9 + $0x1f0] sm:$0xf] }
 0x472   :  { %v2951_v58 = vpack.c.bf16 %v2949_v57, %v2949_v57  ;;  %3515 = vmatpush.bf16.msrb.mxu3 %v6551_v3  ;;  %v6582_v57 = vld [vmem:[#allocation9 + $0x284] sm:$0xf]  ;;  %v6581_v3 = vld [vmem:[#allocation9 + $0x234] sm:$0xf0] }
 0x473   :  { %v2952_v60 = vpack.c.bf16 %v2950_v29, %v2950_v29  ;;  %v2924_v62 = vpop.f32.mrf.mxu2  ;;  %v5952_v29 = vor.u32 %v6583_v56, %v5951_v53  ;;  %v5944_v5 = vor.u32 %v6581_v3, %v5943_v45  ;;  %v6597_v53 = vld [vmem:[#allocation12 + $0x438] sm:$0xff] }
 0x474   :  { %v2937_v1 = vpop.f32.mrf.mxu3  ;;  %3089 = vmatmul.bf16.vlgmr.msra.gmra.mxu0 %v2951_v58  ;;  %v5953_v58 = vld [vmem:[#allocation9 + $0x2c8] sm:$0xf0]  ;;  %v5879_v62 = vld [vmem:[#allocation8 + $0x1f0] sm:$0xf] }
 0x475   :  { %3102 = vmatmul.bf16.vlgmr.msra.gmra.mxu1 %v2952_v60  ;;  %3621 = vmatpush.bf16.msra.mxu0 %v5912_v7  ;;  %v5956_v60 = vor.u32 %v6582_v57, %v5953_v58  ;;  %v5880_v1 = vor.u32 %v6565_v2, %v5879_v62  ;;  %v5948_v7 = vor.u32 %v6580_v4, %v5945_v6  ;;  %v6605_v56 = vld [vmem:[#allocation12 + $0x478] sm:$0xff] }
 0x476   :  { %3634 = vmatpush.bf16.msra.mxu1 %v5916_v31  ;;  %3503 = vmatpush.bf16.msrb.mxu2 %v6542_v32  ;;  %v6563_v31 = vld [vmem:[#allocation8 + $0x1a4] sm:$0xf0]  ;;  %v6562_v32 = vld [vmem:[#allocation8 + $0x164] sm:$0xf]  ;;  %v3356_v57 = vld [vmem:[#allocation11 + $0xe] sm:$0x3] }
 0x477   :  { %3516 = vmatpush.bf16.msrb.mxu3 %v6550_v10  ;;  %v5872_v10 = vor.u32 %v6563_v31, %v5871_v8  ;;  %v5876_v14 = vor.u32 %v6562_v32, %v5873_v11  ;;  %v3358_v58 = vperm.slane %v3356_v57, 0  ;;  %v3359_v62 = vperm.slane %v3356_v57, 1  ;;  %v6595_v8 = vld [vmem:[#allocation12 + $0x428] sm:$0xff]  ;;  %v6593_v32 = vld [vmem:[#allocation12 + $0x418] sm:$0xff] }
 0x478   :  { %v6603_v31 = vld [vmem:[#allocation12 + $0x468] sm:$0xff] }
 0x479   :  { %3622 = vmatpush.bf16.msra.mxu0 %v5904_v24  ;;  %v6561_v24 = vld [vmem:[#allocation8 + $0x114] sm:$0xf0] }
 0x47a   :  { %3743 = vmatpush.bf16.msra.mxu2 %v5976_v17  ;;  %3635 = vmatpush.bf16.msra.mxu1 %v5908_v27  ;;  %v5936_v17 = vor.u32 %v6579_v13, %v5935_v12  ;;  %v5864_v26 = vor.u32 %v6561_v24, %v5863_v19  ;;  %v5868_v27 = vor.u32 %v6560_v25, %v5865_v9  ;;  %v6592_v13 = vld [vmem:[#allocation12 + $0x410] sm:$0xff]  ;;  %v6590_v19 = vld [vmem:[#allocation12 + $0x400] sm:$0xff]  ;;  %v6621_v24 = vld [vmem:[#allocation15 + $0x38] sm:$0xff] }
 0x47b   :  { %v7160_v15 = vpop.f32.mrf.mxu2  ;;  %3756 = vmatpush.bf16.msra.mxu3 %v5980_v39  ;;  %v6578_v39 = vld [vmem:[#allocation9 + $0x164] sm:$0xf]  ;;  %v6613_v25 = vld [vmem:[#allocation14 + $0x38] sm:$0xff] }
 0x47c   :  { %v7162_v16 = vpop.f32.mrf.mxu3  ;;  %v5940_v22 = vor.u32 %v6578_v39, %v5937_v18  ;;  %v6620_v9 = vld [vmem:[#allocation15 + $0x30] sm:$0xff] }
 0x47d   :  { %3623 = vmatpush.bf16.msra.mxu0 %v5896_v63 }
 0x47e   :  { %3744 = vmatpush.bf16.msra.mxu2 %v5968_v30  ;;  %3636 = vmatpush.bf16.msra.mxu1 %v5900_v41  ;;  %v5927_v30 = vld [vmem:[#allocation9 + $0xd0] sm:$0xf]  ;;  %v6558_v41 = vld [vmem:[#allocation8 + $0x44] sm:$0xf] }
 0x47f   :  { %3757 = vmatpush.bf16.msra.mxu3 %v5972_v35  ;;  %v5929_v35 = vld [vmem:[#allocation9 + $0x118] sm:$0xf0]  ;;  %v5928_v63 = vor.u32 %v6577_v33, %v5927_v30  ;;  %v5860_v50 = vor.u32 %v6558_v41, %v5857_v42  ;;  %v6609_v42 = vld [vmem:[#allocation14 + $0x18] sm:$0xff] }
 0x480   :  { %v5932_v40 = vor.u32 %v6576_v34, %v5929_v35  ;;  %v6619_v30 = vld [vmem:[#allocation15 + $0x28] sm:$0xff] }
 0x481   :  { %3624 = vmatpush.bf16.msra.mxu0 %v5888_v52  ;;  %v5920_v52 = vor.u32 %v6575_v47, %v5919_v43  ;;  %v6611_v34 = vld [vmem:[#allocation14 + $0x28] sm:$0xff]  ;;  %v3771_v43 = vld [vmem:[#allocation11 + $0x10] sm:$0x3] }
 0x482   :  { %3745 = vmatpush.bf16.msra.mxu2 %v5960_v46  ;;  %3637 = vmatpush.bf16.msra.mxu1 %v5892_v55  ;;  %v5856_v46 = vor.u32 %v6559_v38, %v5855_v36  ;;  %v6618_v38 = vld [vmem:[#allocation15 + $0x20] sm:$0xff] }
 0x483   :  { %v3217_v48 = vpop.f32.mrf.mxu2  ;;  %3758 = vmatpush.bf16.msra.mxu3 %v5964_v59 }
 0x484   :  { %3336 = vmatmul.bf16.vlgmr.msrb.gmra.mxu0 %v7139_v23  ;;  %v3230_v49 = vpop.f32.mrf.mxu3  ;;  %v6574_v48 = vld [vmem:[#allocation9 + $0x44] sm:$0xf] }
 0x485   :  { %3349 = vmatmul.bf16.vlgmr.msrb.gmra.mxu1 %v7139_v23  ;;  %3625 = vmatpush.bf16.msra.mxu0 %v5880_v1  ;;  %v5921_v49 = vld [vmem:[#allocation9 + $0x88] sm:$0xf0] }
 0x486   :  { %3746 = vmatpush.bf16.msra.mxu2 %v5952_v29  ;;  %3638 = vmatpush.bf16.msra.mxu1 %v5884_v21  ;;  %v5924_v28 = vor.u32 %v6574_v48, %v5921_v49  ;;  %v6604_v29 = vld [vmem:[#allocation12 + $0x470] sm:$0xff]  ;;  %v3774_v48 = vperm.slane %v3771_v43, 1  ;;  %v6615_v49 = vld [vmem:[#allocation15 + $0x8] sm:$0xff] }
 0x487   :  { %3759 = vmatpush.bf16.msra.mxu3 %v5956_v60 }
 0x489   :  { %3626 = vmatpush.bf16.msra.mxu0 %v5872_v10  ;;  %v6601_v10 = vld [vmem:[#allocation12 + $0x458] sm:$0xff] }
 0x48a   :  { %3747 = vmatpush.bf16.msra.mxu2 %v5944_v5  ;;  %3639 = vmatpush.bf16.msra.mxu1 %v5876_v14  ;;  %v6600_v14 = vld [vmem:[#allocation12 + $0x450] sm:$0xff] }
 0x48b   :  { %3760 = vmatpush.bf16.msra.mxu3 %v5948_v7 }
 0x48d   :  { %3627 = vmatpush.bf16.msra.mxu0 %v5864_v26  ;;  %v6612_v26 = vld [vmem:[#allocation14 + $0x30] sm:$0xff] }
 0x48e   :  { %3748 = vmatpush.bf16.msra.mxu2 %v5936_v17  ;;  %3640 = vmatpush.bf16.msra.mxu1 %v5868_v27  ;;  %v6591_v17 = vld [vmem:[#allocation12 + $0x408] sm:$0xff] }
 0x48f   :  { %3761 = vmatpush.bf16.msra.mxu3 %v5940_v22  ;;  %v6598_v22 = vld [vmem:[#allocation12 + $0x440] sm:$0xff] }
 0x491   :  { %3628 = vmatpush.bf16.msra.mxu0 %v5856_v46  ;;  %v3773_v46 = vperm.slane %v3771_v43, 0 }
 0x492   :  { %3749 = vmatpush.bf16.msra.mxu2 %v5928_v63  ;;  %3641 = vmatpush.bf16.msra.mxu1 %v5860_v50 }
 0x493   :  { %3762 = vmatpush.bf16.msra.mxu3 %v5932_v40  ;;  %v6617_v40 = vld [vmem:[#allocation15 + $0x18] sm:$0xff] }
 0x494   :  { %3629 = vmatmul.bf16.vlgmr.msra.gmra.mxu0 %v7139_v23 }
 0x495   :  { %3642 = vmatmul.bf16.vlgmr.msra.gmra.mxu1 %v7139_v23  ;;  %3911 = vmatpush.bf16.msrb.mxu0 %v6597_v53 }
 0x496   :  { %3750 = vmatpush.bf16.msra.mxu2 %v5920_v52  ;;  %3924 = vmatpush.bf16.msrb.mxu1 %v6605_v56 }
 0x497   :  { %3763 = vmatpush.bf16.msra.mxu3 %v5924_v28 }
 0x49a   :  { %3925 = vmatpush.bf16.msrb.mxu1 %v6604_v29  ;;  %v6614_v29 = vld [vmem:[#allocation15] sm:$0xff] }
 0x49e   :  { %3926 = vmatpush.bf16.msrb.mxu1 %v6603_v31 }
 0x4f1   :  { %v3090_v61 = vpop.f32.mrf.mxu0 }
 0x4f2   :  { %v3103_v44 = vpop.f32.mrf.mxu1 }
 0x4f3   :  { %v3104_v59 = vadd.f32 %v3103_v44, %v3090_v61  ;;  %v6610_v61 = vld [vmem:[#allocation14 + $0x20] sm:$0xff]  ;;  %v6616_v44 = vld [vmem:[#allocation15 + $0x10] sm:$0xff] }
 0x4f5   :  { %v7165_v51 = vadd.f32 %v3104_v59, %v7154_v37  ;;  %v6596_v37 = vld [vmem:[#allocation12 + $0x430] sm:$0xff] }
 0x4f6   :  { %3912 = vmatpush.bf16.msrb.mxu0 %v6596_v37 }
 0x4f9   :  { %v3092_v54 = vpop.f32.mrf.mxu0 }
 0x4fa   :  { %v3105_v55 = vpop.f32.mrf.mxu1  ;;  %3913 = vmatpush.bf16.msrb.mxu0 %v6595_v8 }
 0x501   :  { %v3337_v60 = vpop.f32.mrf.mxu0 }
 0x502   :  { %v3354_v2 = vmax.f32 %v7160_v15, %v3337_v60  ;;  %v3350_v0 = vpop.f32.mrf.mxu1  ;;  %v6594_v15 = vld [vmem:[#allocation12 + $0x420] sm:$0xff]  ;;  %v206_v60 = vld [vmem:[#allocation6] sm:$0xf] }
 0x503   :  { %v3355_v1 = vmax.f32 %v7162_v16, %v3350_v0  ;;  %v6602_v16 = vld [vmem:[#allocation12 + $0x460] sm:$0xff]  ;;  %3914 = vmatpush.bf16.msrb.mxu0 %v6594_v15  ;;  %v6629_v0 = vld [vmem:[#allocation17 + $0x38] sm:$0xff] }
 0x504   :  { %v3362_v20 = vadd.f32 %v3358_v58, %v3354_v2  ;;  %3927 = vmatpush.bf16.msrb.mxu1 %v6602_v16  ;;  %v6608_v58 = vld [vmem:[#allocation14 + $0x10] sm:$0xff]  ;;  %v6606_v2 = vld [vmem:[#allocation14] sm:$0xff] }
 0x505   :  { %v3363_v21 = vadd.f32 %v3359_v62, %v3355_v1  ;;  %v6607_v62 = vld [vmem:[#allocation14 + $0x8] sm:$0xff]  ;;  %v6628_v1 = vld [vmem:[#allocation17 + $0x30] sm:$0xff] }
 0x506   :  { %v3364_v45 = vmax.f32 %v3362_v20, 0.0  ;;  %v6627_v20 = vld [vmem:[#allocation17 + $0x28] sm:$0xff] }
 0x507   :  { %v3365_v3 = vmax.f32 %v3363_v21, 0.0  ;;  %3915 = vmatpush.bf16.msrb.mxu0 %v6593_v32  ;;  %v6626_v21 = vld [vmem:[#allocation17 + $0x20] sm:$0xff]  ;;  %v6625_v32 = vld [vmem:[#allocation17 + $0x18] sm:$0xff] }
 0x508   :  { %v3366_v4 = vpack.c.bf16 %v3364_v45, %v3364_v45  ;;  %3928 = vmatpush.bf16.msrb.mxu1 %v6601_v10  ;;  %v6624_v10 = vld [vmem:[#allocation17 + $0x10] sm:$0xff] }
 0x509   :  { %v3367_v5 = vpack.c.bf16 %v3365_v3, %v3365_v3  ;;  %v3339_v6 = vpop.f32.mrf.mxu0 }
 0x50a   :  { %v3352_v7 = vpop.f32.mrf.mxu1  ;;  %3504 = vmatmul.bf16.vlgmr.msrb.gmra.mxu2 %v3366_v4 }
 0x50b   :  { %3517 = vmatmul.bf16.vlgmr.msrb.gmra.mxu3 %v3367_v5  ;;  %3916 = vmatpush.bf16.msrb.mxu0 %v6592_v13  ;;  %v6652_v5 = vld [vmem:[%s7198_s6] ss:$0 sm:$0xff]  ;;  %v6623_v13 = vld [vmem:[#allocation17 + $0x8] sm:$0xff] }
 0x50c   :  { %3929 = vmatpush.bf16.msrb.mxu1 %v6600_v14  ;;  %4028 = vmatpush.bf16.msrb.mxu2 %v6621_v24  ;;  %v6622_v14 = vld [vmem:[#allocation17] sm:$0xff] }
 0x50d   :  { %4089 = vmatpush.bf16.msrb.mxu3 %v6613_v25  ;;  %v6653_v24 = vld [vmem:[%s7201_s9] ss:$0 sm:$0xff] }
 0x50f   :  { %3917 = vmatpush.bf16.msrb.mxu0 %v6591_v17  ;;  %v6637_v17 = vld [vmem:[#allocation18 + $0x38] sm:$0xff] }
 0x510   :  { %4029 = vmatpush.bf16.msrb.mxu2 %v6620_v9 }
 0x511   :  { %v3630_v11 = vpop.f32.mrf.mxu0  ;;  %4090 = vmatpush.bf16.msrb.mxu3 %v6612_v26 }
 0x512   :  { %v3643_v12 = vpop.f32.mrf.mxu1 }
 0x513   :  { %3918 = vmatpush.bf16.msrb.mxu0 %v6590_v19  ;;  %v6633_v19 = vld [vmem:[#allocation18 + $0x18] sm:$0xff] }
 0x514   :  { %4030 = vmatpush.bf16.msrb.mxu2 %v6619_v30 }
 0x515   :  { %4091 = vmatpush.bf16.msrb.mxu3 %v6611_v34  ;;  %v6631_v34 = vld [vmem:[#allocation18 + $0x8] sm:$0xff] }
 0x517   :  { %4177 = vmatpush.bf16.msra.mxu0 %v6629_v0 }
 0x518   :  { %4031 = vmatpush.bf16.msrb.mxu2 %v6618_v38 }
 0x519   :  { %v3632_v39 = vpop.f32.mrf.mxu0  ;;  %4092 = vmatpush.bf16.msrb.mxu3 %v6610_v61 }
 0x51a   :  { %3751 = vmatmul.bf16.vlgmr.msra.gmra.mxu2 %v7139_v23  ;;  %v3645_v18 = vpop.f32.mrf.mxu1  ;;  %v6635_v39 = vld [vmem:[#allocation18 + $0x28] sm:$0xff] }
 0x51b   :  { %3764 = vmatmul.bf16.vlgmr.msra.gmra.mxu3 %v7139_v23  ;;  %v6599_v23 = vld [vmem:[#allocation12 + $0x448] sm:$0xff]  ;;  %4178 = vmatpush.bf16.msra.mxu0 %v6628_v1  ;;  %v6634_v18 = vld [vmem:[#allocation18 + $0x20] sm:$0xff] }
 0x51c   :  { %3930 = vmatpush.bf16.msrb.mxu1 %v6599_v23  ;;  %4032 = vmatpush.bf16.msrb.mxu2 %v6617_v40  ;;  %v6636_v23 = vld [vmem:[#allocation18 + $0x30] sm:$0xff] }
 0x51d   :  { %4093 = vmatpush.bf16.msrb.mxu3 %v6609_v42  ;;  %v6655_v42 = vld [vmem:[%s7205_s13] ss:$0 sm:$0xff] }
 0x51f   :  { %4179 = vmatpush.bf16.msra.mxu0 %v6627_v20 }
 0x520   :  { %3931 = vmatpush.bf16.msrb.mxu1 %v6598_v22  ;;  %4033 = vmatpush.bf16.msrb.mxu2 %v6616_v44  ;;  %v6632_v22 = vld [vmem:[#allocation18 + $0x10] sm:$0xff] }
 0x521   :  { %4094 = vmatpush.bf16.msrb.mxu3 %v6608_v58 }
 0x523   :  { %4180 = vmatpush.bf16.msra.mxu0 %v6626_v21 }
 0x524   :  { %4034 = vmatpush.bf16.msrb.mxu2 %v6615_v49  ;;  %4260 = vmatpush.bf16.msra.mxu1 %v6637_v17 }
 0x525   :  { %4095 = vmatpush.bf16.msrb.mxu3 %v6607_v62 }
 0x527   :  { %4181 = vmatpush.bf16.msra.mxu0 %v6625_v32 }
 0x528   :  { %4035 = vmatpush.bf16.msrb.mxu2 %v6614_v29  ;;  %4261 = vmatpush.bf16.msra.mxu1 %v6636_v23 }
 0x529   :  { %4096 = vmatpush.bf16.msrb.mxu3 %v6606_v2 }
 0x52b   :  { %4036 = vmatmul.bf16.vlgmr.msrb.gmra.mxu2 %v206_v60  ;;  %4182 = vmatpush.bf16.msra.mxu0 %v6624_v10 }
 0x52c   :  { %4262 = vmatpush.bf16.msra.mxu1 %v6635_v39 }
 0x52f   :  { %4183 = vmatpush.bf16.msra.mxu0 %v6623_v13 }
 0x530   :  { %4263 = vmatpush.bf16.msra.mxu1 %v6634_v18 }
 0x533   :  { %4184 = vmatpush.bf16.msra.mxu0 %v6622_v14 }
 0x534   :  { %4264 = vmatpush.bf16.msra.mxu1 %v6633_v19 }
 0x538   :  { %4265 = vmatpush.bf16.msra.mxu1 %v6632_v22 }
 0x53c   :  { %4266 = vmatpush.bf16.msra.mxu1 %v6631_v34 }
 0x58d   :  { %v3505_v27 = vpop.f32.mrf.mxu2 }
 0x58e   :  { %v3518_v33 = vpop.f32.mrf.mxu3 }
 0x58f   :  { %v3519_v35 = vadd.f32 %v3518_v33, %v3505_v27 }
 0x591   :  { %v3523_v36 = vadd.f32 %v3519_v35, %v7165_v51  ;;  %v6630_v35 = vld [vmem:[#allocation18] sm:$0xff] }
 0x592   :  { %4267 = vmatpush.bf16.msra.mxu1 %v6630_v35 }
 0x595   :  { %v3507_v63 = vpop.f32.mrf.mxu2 }
 0x596   :  { %v3520_v41 = vpop.f32.mrf.mxu3 }
 0x59d   :  { %v3752_v47 = vpop.f32.mrf.mxu2 }
 0x59e   :  { %v3769_v59 = vmax.f32 %v3630_v11, %v3752_v47  ;;  %v3765_v50 = vpop.f32.mrf.mxu3 }
 0x59f   :  { %v3770_v51 = vmax.f32 %v3643_v12, %v3765_v50 }
 0x5a0   :  { %v3777_v52 = vadd.f32 %v3773_v46, %v3769_v59  ;;  %v6656_v46 = vld [vmem:[%s7206_s14] ss:$0 sm:$0xff] }
 0x5a1   :  { %v3778_v28 = vadd.f32 %v3774_v48, %v3770_v51  ;;  %v6657_v59 = vld [vmem:[#allocation3] ss:$0 sm:$0xff] }
 0x5a2   :  { %v3779_v54 = vmax.f32 %v3777_v52, 0.0 }
 0x5a3   :  { %v3780_v55 = vmax.f32 %v3778_v28, 0.0 }
 0x5a4   :  { %v3781_v53 = vpack.c.bf16 %v3779_v54, %v3779_v54 }
 0x5a5   :  { %v3782_v56 = vpack.c.bf16 %v3780_v55, %v3780_v55  ;;  %v3754_v57 = vpop.f32.mrf.mxu2 }
 0x5a6   :  { %v3767_v37 = vpop.f32.mrf.mxu3  ;;  %3919 = vmatmul.bf16.vlgmr.msrb.gmra.mxu0 %v3781_v53 }
 0x5a7   :  { %3932 = vmatmul.bf16.vlgmr.msrb.gmra.mxu1 %v3782_v56 }
 0x5ae   :  { %v4037_v11 = vpop.f32.mrf.mxu2 }
 0x5b6   :  { %v4039_v12 = vpop.f32.mrf.mxu2 }
 0x623   :  { %v3920_v45 = vpop.f32.mrf.mxu0 }
 0x624   :  { %v3933_v3 = vpop.f32.mrf.mxu1 }
 0x625   :  { %v3934_v4 = vadd.f32 %v3933_v3, %v3920_v45 }
 0x627   :  { %v3938_v6 = vadd.f32 %v3934_v4, %v3523_v36  ;;  %v6654_v36 = vld [vmem:[%s7203_s11] ss:$0 sm:$0xff] }
 0x629   :  { %v3945_v7 = vadd.f32 %v6652_v5, %v3938_v6 }
 0x62b   :  { %v3946_v8 = vmax.f32 %v3945_v7, 0.0  ;;  %v3922_v31 = vpop.f32.mrf.mxu0 }
 0x62c   :  { %v3935_v15 = vpop.f32.mrf.mxu1 }
 0x62d   :  { %v3947_v16 = vpack.c.bf16 %v3946_v8, %v3946_v8 }
 0x62f   :  { %4097 = vmatmul.bf16.vlgmr.msrb.gmra.mxu3 %v3947_v16 }
 0x6b2   :  { %v4098_v25 = vpop.f32.mrf.mxu3 }
 0x6b3   :  { %v4099_v9 = vadd.f32 %v4098_v25, %v4037_v11 }
 0x6b5   :  { %v4106_v26 = vadd.f32 %v6653_v24, %v4099_v9 }
 0x6b7   :  { %v4107_v27 = vmax.f32 %v4106_v26, 0.0 }
 0x6b9   :  { %v4108_v30 = vpack.c.bf16 %v4107_v27, %v4107_v27 }
 0x6ba   :  { %v4100_v33 = vpop.f32.mrf.mxu3 }
 0x6bb   :  { %4185 = vmatmul.bf16.vlgmr.msra.gmra.mxu0 %v4108_v30 }
 0x738   :  { %v4186_v38 = vpop.f32.mrf.mxu0 }
 0x739   :  { %v4187_v61 = vadd.f32 %v6654_v36, %v4186_v38 }
 0x73b   :  { %v4190_v63 = vmax.f32 %v4187_v61, 0.0 }
 0x73d   :  { %v4191_v40 = vpack.c.bf16 %v4190_v63, %v4190_v63 }
 0x73f   :  { %4268 = vmatmul.bf16.vlgmr.msra.gmra.mxu1 %v4191_v40 }
 0x740   :  { %v4188_v41 = vpop.f32.mrf.mxu0 }
 0x7bc   :  { %v4269_v43 = vpop.f32.mrf.mxu1 }
 0x7bd   :  { %v4270_v44 = vadd.f32 %v6655_v42, %v4269_v43 }
 0x7bf   :  { %v4273_v47 = vmax.f32 %v4270_v44, 0.0 }
 0x7c1   :  { %v4278_v48 = vmul.f32 %v6656_v46, %v4273_v47 }
 0x7c3   :  { %4279 = vadd.xlane.f32.xlu0 %v4278_v48 }
 0x7c4   :  { %v4271_v49 = vpop.f32.mrf.mxu1 }
 0x836   :  { %v4280_v50 = vpop.xlane.xlu0 %4279 }
 0x837   :  { %v4285_v51 = vadd.f32 %v6657_v59, %v4280_v50 }
 0x839   :  { %v6173_v52 = vmul.f32 -1.442695, %v4285_v51 }
 0x83b   :  { %6658 = vpow2.f32 %v6173_v52 }
 0x841   :  { %v6659_v28 = vpop.eup %6658 }
 0x842   :  { %v4289_v54 = vadd.f32 1.0, %v6659_v28 }
 0x844   :  { %6660 = vrcp.f32 %v4289_v54  ;;  %v4301_v57 = vand.u32 2147483648, %v4289_v54  ;;  %v4299_v29 = vand.u32 2147483647, %v4289_v54  ;;  %vm4295_vm1 = vweird.f32 %v4289_v54 }
 0x846   :  { %v4302_v60 = vor.u32 1.1754944e-38, %v4301_v57  ;;  %vm4300_vm4 = vcmp.eq.f32.partialorder %v4299_v29, 8.507059e+37 }
 0x84a   :  { %v6661_v55 = vpop.eup %6660 }
 0x84b   :  { %v4291_v53 = vmul.f32 %v6661_v55, %v4289_v54  ;;  %vm4296_vm0 = vweird.f32 %v6661_v55 }
 0x84c   :  { %vm4297_vm2 = vmor %vm4295_vm1, %vm4296_vm0 }
 0x84d   :  { %v4292_v56 = vsub.f32 1.0, %v4291_v53 }
 0x84f   :  { %v4293_v37 = vmul.f32 %v6661_v55, %v4292_v56 }
 0x851   :  { %v4294_v58 = vadd.f32 %v6661_v55, %v4293_v37 }
 0x853   :  { %v4298_v62 = vsel %vm4297_vm2, %v6661_v55, %v4294_v58 }
 0x854   :  { %v4303_v2 = vsel %vm4300_vm4, %v4302_v60, %v4298_v62 }
 0x855   :  { %4306 = vst.msk [vmem:[%s7208_s16] sm:$0xff] %vm4305_vm3, %v4303_v2 }
 0x856   :  { %4311 = vsyncpa [#allocation5], 1 }
 0x857   :  { %4312 = vsyncpa [#allocation7], 1 }
 0x858   :  { %4313 = vsyncpa [#allocation10], 1 }
 0x859   :  { %4314 = vsyncpa [#allocation13], 1 }
 0x85a   :  { %4315 = vsyncpa [#allocation16], 1 }
 0x85b   :  { %4316 = vsyncpa [#allocation19], 1 }

</bundles_post_ra>
